<compile_context>
chip_gen: v7x
topology: tpu7x:2x2x1
jax: 0.10.0
libtpu: 0.0.40
codegen_flags: <defaults>
</compile_context>

<pallas_src>
import functools

import numpy as np
import jax
import jax.numpy as jnp
from jax.experimental import pallas as pl
from jax.experimental.pallas import tpu as pltpu


COMPUTE_DTYPE = jnp.bfloat16   # MXU feed dtype; set to jnp.float32 for a tight check


# ------------------------------ fused kernel ------------------------------- #

def _lenet_kernel(x_ref, t1_ref, b1_ref, u2_ref, b2_ref,
                  v1_ref, fb1_ref, w2_ref, fb2_ref, w3_ref, fb3_ref,
                  out_ref, z_scr, p1_scr, p2_scr):
    """Whole LeNet-5 forward for a block of BB images.

    x_ref    : (BB*32, 32)  stacked rows, image b occupies rows [32b, 32b+32)
    t1/u2    : banded conv taps with kh folded along K and the two W-pool
               phases concatenated along N (N = 2*128)
    v1/w2/w3 : lane-dense FC weights, pre-transposed to (K, N)
    out_ref  : (BB, 128)    logits in cols [0, 10)
    """
    wd = t1_ref.dtype                     # MXU feed dtype (bf16 or f32)
    rows = x_ref.shape[0]                 # BB * 32
    bb = rows // 32
    l1, n1 = rows - 4, bb * 16 - 2        # conv1: matmul rows / H-pool pairs
    l2, n2 = bb * 16 - 4, bb * 8 - 2      # conv2: matmul rows / H-pool pairs

    def mxu(a, w_ref):
        return jnp.dot(a, w_ref[...], preferred_element_type=jnp.float32)

    # ---- conv1 (1->6, 5x5) + 2x2/2 max-pool + bias + ReLU ------------------
    # shifted-row concat folds the kh taps into one K=160 contraction.
    cat1 = jnp.concatenate(
        [x_ref[pl.ds(kh, l1), :].astype(wd) for kh in range(5)], axis=-1)
    z1 = mxu(cat1, t1_ref)                                           # (l1, 256)
    z_scr[0:l1, :] = jnp.maximum(z1[:, 0:128], z1[:, 128:256])       # W-pool
    p1 = jnp.maximum(z_scr[pl.ds(0, n1, stride=2), :],
                     z_scr[pl.ds(1, n1, stride=2), :])               # H-pool
    p1_scr[0:n1, :] = jnp.maximum(p1 + b1_ref[...], 0.0)             # bias+ReLU

    # ---- conv2 (6->16, 5x5) + 2x2/2 max-pool + bias + ReLU -----------------
    cat2 = jnp.concatenate(
        [p1_scr[pl.ds(kh, l2), :].astype(wd) for kh in range(5)], axis=-1)
    z2 = mxu(cat2, u2_ref)                                           # (l2, 256)
    z_scr[0:l2, :] = jnp.maximum(z2[:, 0:128], z2[:, 128:256])       # W-pool
    p2 = jnp.maximum(z_scr[pl.ds(0, n2, stride=2), :],
                     z_scr[pl.ds(1, n2, stride=2), :])               # H-pool
    p2_scr[0:n2, :] = jnp.maximum(p2 + b2_ref[...], 0.0)             # bias+ReLU

    # ---- flatten + fc1 + fc2 + fc3 ------------------------------------------
    # Per-image flatten = lane concat of the 5 pooled rows (stride-8 gather).
    fc_in = jnp.concatenate(
        [p2_scr[pl.ds(i, bb, stride=8), :].astype(wd) for i in range(5)],
        axis=-1)                                                     # (bb, 640)
    h = jnp.maximum(mxu(fc_in, v1_ref) + fb1_ref[...], 0.0)          # (bb, 128)
    h = jnp.maximum(mxu(h.astype(wd), w2_ref) + fb2_ref[...], 0.0)   # (bb, 128)
    logits = mxu(h.astype(wd), w3_ref) + fb3_ref[...]                # (bb, 128)
    out_ref[...] = logits.astype(out_ref.dtype)


# --------------------------- weight pre-packing ---------------------------- #

def init_params(key):
    # PyTorch-default-style uniform(-1/sqrt(fan_in), 1/sqrt(fan_in))
    def uniform(k, shape, fan_in):
        bound = 1.0 / (fan_in ** 0.5)
        return jax.random.uniform(k, shape, jnp.float32, -bound, bound)

    ks = jax.random.split(key, 10)
    return {
        "conv1_w": uniform(ks[0], (6, 1, 5, 5), 1 * 5 * 5),
        "conv1_b": uniform(ks[1], (6,), 1 * 5 * 5),
        "conv2_w": uniform(ks[2], (16, 6, 5, 5), 6 * 5 * 5),
        "conv2_b": uniform(ks[3], (16,), 6 * 5 * 5),
        "fc1_w": uniform(ks[4], (120, 16 * 5 * 5), 16 * 5 * 5),
        "fc1_b": uniform(ks[5], (120,), 16 * 5 * 5),
        "fc2_w": uniform(ks[6], (84, 120), 120),
        "fc2_b": uniform(ks[7], (84,), 120),
        "fc3_w": uniform(ks[8], (10, 84), 84),
        "fc3_b": uniform(ks[9], (10,), 84),
    }


def pack_params(params, compute_dtype=COMPUTE_DTYPE):
    """One-time repack of PyTorch-layout weights into lane-dense matrices."""
    g = lambda n: np.asarray(jax.device_get(params[n]), np.float32)
    w1, b1 = g("conv1_w"), g("conv1_b")          # (6,1,5,5), (6,)
    w2, b2 = g("conv2_w"), g("conv2_b")          # (16,6,5,5), (16,)

    # conv1 taps: K = 5*32 (kh,w), N = 2*128 (W-pool phase, c*14+j)
    T1 = np.zeros((5 * 32, 2 * 128), np.float32)
    for kh in range(5):
        for c in range(6):
            for j in range(14):
                for par in range(2):
                    for kw in range(5):
                        T1[kh * 32 + 2 * j + par + kw,
                           par * 128 + c * 14 + j] = w1[c, 0, kh, kw]
    b1c = np.zeros((1, 128), np.float32); b1c[0, :84] = np.repeat(b1, 14)

    # conv2 taps: K = 5*128 (kh, c1*14+w), N = 2*128 (phase, c2*5+j)
    U2 = np.zeros((5 * 128, 2 * 128), np.float32)
    for kh in range(5):
        for c2 in range(16):
            for c1 in range(6):
                for j in range(5):
                    for par in range(2):
                        for kw in range(5):
                            U2[kh * 128 + c1 * 14 + 2 * j + par + kw,
                               par * 128 + c2 * 5 + j] = w2[c2, c1, kh, kw]
    b2c = np.zeros((1, 128), np.float32); b2c[0, :80] = np.repeat(b2, 5)

    # fc1: kernel k-index = i*128 + c2*5 + j  <->  torch flat = c2*25 + i*5 + j
    fc1_w, fc1_b = g("fc1_w"), g("fc1_b")
    V1 = np.zeros((5 * 128, 128), np.float32)
    for i in range(5):
        for c2 in range(16):
            for j in range(5):
                V1[i * 128 + c2 * 5 + j, :120] = fc1_w[:, c2 * 25 + i * 5 + j]
    fb1 = np.zeros((1, 128), np.float32); fb1[0, :120] = fc1_b

    # fc2 / fc3: pre-transposed to (K, N) and zero-padded to lane-dense 128.
    fc2_w, fc2_b = g("fc2_w"), g("fc2_b")
    W2p = np.zeros((128, 128), np.float32); W2p[:120, :84] = fc2_w.T
    fb2 = np.zeros((1, 128), np.float32); fb2[0, :84] = fc2_b
    fc3_w, fc3_b = g("fc3_w"), g("fc3_b")
    W3p = np.zeros((128, 128), np.float32); W3p[:84, :10] = fc3_w.T
    fb3 = np.zeros((1, 128), np.float32); fb3[0, :10] = fc3_b

    cd = compute_dtype
    return {
        "T1": jnp.asarray(T1, cd), "b1c": jnp.asarray(b1c),
        "U2": jnp.asarray(U2, cd), "b2c": jnp.asarray(b2c),
        "V1": jnp.asarray(V1, cd), "fb1": jnp.asarray(fb1),
        "W2p": jnp.asarray(W2p, cd), "fb2": jnp.asarray(fb2),
        "W3p": jnp.asarray(W3p, cd), "fb3": jnp.asarray(fb3),
    }


# -------------------------------- forward ---------------------------------- #

@functools.partial(jax.jit, static_argnames=("block_b",))
def simple_classifier_forward(packed, x, *, block_b=16):
    """x: (B, 1, 32, 32) NCHW float -> logits (B, 10)."""
    B = x.shape[0]
    BB = int(min(block_b, B))                 # images per grid step
    n_blocks = -(-B // BB)                    # ceil
    B_pad = n_blocks * BB

    # stacked-row layout: image b occupies rows [32b, 32b+32)
    x2d = x.reshape(B * 32, 32).astype(jnp.float32)
    if B_pad != B:                            # batch tail handling
        x2d = jnp.pad(x2d, ((0, (B_pad - B) * 32), (0, 0)))

    def full(a):                              # whole (2-D) array, VMEM-resident
        return pl.BlockSpec(a.shape, lambda i: (0, 0))

    weights = (packed["T1"], packed["b1c"], packed["U2"], packed["b2c"],
               packed["V1"], packed["fb1"], packed["W2p"], packed["fb2"],
               packed["W3p"], packed["fb3"])

    out = pl.pallas_call(
        _lenet_kernel,
        out_shape=jax.ShapeDtypeStruct((B_pad, 128), jnp.float32),
        grid=(n_blocks,),
        in_specs=[pl.BlockSpec((BB * 32, 32), lambda i: (i, 0))]
                 + [full(w) for w in weights],
        out_specs=pl.BlockSpec((BB, 128), lambda i: (i, 0)),
        scratch_shapes=[pltpu.VMEM((BB * 32, 128), jnp.float32),   # z_scr
                        pltpu.VMEM((BB * 16, 128), jnp.float32),   # p1_scr
                        pltpu.VMEM((BB * 8, 128), jnp.float32)],   # p2_scr
        compiler_params=pltpu.CompilerParams(
            dimension_semantics=("parallel",)),
    )(x2d, *weights)
    return out[:B, :10]


# --------------------------- pure-JAX reference ----------------------------- #

def reference_forward(params, x):
    def conv(x, w, b):
        y = jax.lax.conv_general_dilated(
            x, w, (1, 1), "VALID", dimension_numbers=("NCHW", "OIHW", "NCHW"))
        return jax.nn.relu(y + b[None, :, None, None])

    def pool(x):
        return jax.lax.reduce_window(
            x, -jnp.inf, jax.lax.max, (1, 1, 2, 2), (1, 1, 2, 2), "VALID")

    x = pool(conv(x, params["conv1_w"], params["conv1_b"]))
    x = pool(conv(x, params["conv2_w"], params["conv2_b"]))
    x = x.reshape(x.shape[0], -1)
    x = jax.nn.relu(x @ params["fc1_w"].T + params["fc1_b"])
    x = jax.nn.relu(x @ params["fc2_w"].T + params["fc2_b"])
    return x @ params["fc3_w"].T + params["fc3_b"]


if __name__ == "__main__":
    key = jax.random.PRNGKey(0)
    pkey, xkey = jax.random.split(key)
    params = init_params(pkey)
    packed = pack_params(params)

    B = 32                                     # grid = 2 blocks of 16 images
    x = jax.random.normal(xkey, (B, 1, 32, 32), jnp.float32)

    out = jax.block_until_ready(simple_classifier_forward(packed, x))
    assert out.shape == (B, 10)

    ref = reference_forward(params, x)
    tol = 2e-3 if COMPUTE_DTYPE == jnp.float32 else 4e-2   # bf16 MXU feed
    np.testing.assert_allclose(np.asarray(out), np.asarray(ref),
                               atol=tol, rtol=tol)
    print("KERNEL_OK")
</pallas_src>

<mosaic_0001>
module attributes {stable_mosaic.version = 11 : i64} {
  func.func @_lenet_kernel(%arg0: i32, %arg1: memref<512x32xf32, #tpu.memory_space<vmem>>, %arg2: memref<160x256xbf16, #tpu.memory_space<vmem>>, %arg3: memref<1x128xf32, #tpu.memory_space<vmem>>, %arg4: memref<640x256xbf16, #tpu.memory_space<vmem>>, %arg5: memref<1x128xf32, #tpu.memory_space<vmem>>, %arg6: memref<640x128xbf16, #tpu.memory_space<vmem>>, %arg7: memref<1x128xf32, #tpu.memory_space<vmem>>, %arg8: memref<128x128xbf16, #tpu.memory_space<vmem>>, %arg9: memref<1x128xf32, #tpu.memory_space<vmem>>, %arg10: memref<128x128xbf16, #tpu.memory_space<vmem>>, %arg11: memref<1x128xf32, #tpu.memory_space<vmem>>, %arg12: memref<16x128xf32, #tpu.memory_space<vmem>>, %arg13: memref<512x128xf32, #tpu.memory_space<vmem>>, %arg14: memref<256x128xf32, #tpu.memory_space<vmem>>, %arg15: memref<128x128xf32, #tpu.memory_space<vmem>>) attributes {dimension_semantics = [#tpu.dimension_semantics<parallel>], iteration_bounds = array<i64: 2>, scalar_prefetch = 0 : i64, scratch_operands = 3 : i64, tpu.core_type = #tpu.core_type<tc>, window_params = [{transform_indices = @transform_0, window_bounds = array<i64: 512, 32>}, {pipeline_mode = #tpu.pipeline_mode<synchronous>, transform_indices = @transform_1, window_bounds = array<i64: 160, 256>}, {pipeline_mode = #tpu.pipeline_mode<synchronous>, transform_indices = @transform_2, window_bounds = array<i64: 1, 128>}, {pipeline_mode = #tpu.pipeline_mode<synchronous>, transform_indices = @transform_3, window_bounds = array<i64: 640, 256>}, {pipeline_mode = #tpu.pipeline_mode<synchronous>, transform_indices = @transform_4, window_bounds = array<i64: 1, 128>}, {pipeline_mode = #tpu.pipeline_mode<synchronous>, transform_indices = @transform_5, window_bounds = array<i64: 640, 128>}, {pipeline_mode = #tpu.pipeline_mode<synchronous>, transform_indices = @transform_6, window_bounds = array<i64: 1, 128>}, {pipeline_mode = #tpu.pipeline_mode<synchronous>, transform_indices = @transform_7, window_bounds = array<i64: 128, 128>}, {pipeline_mode = #tpu.pipeline_mode<synchronous>, transform_indices = @transform_8, window_bounds = array<i64: 1, 128>}, {pipeline_mode = #tpu.pipeline_mode<synchronous>, transform_indices = @transform_9, window_bounds = array<i64: 128, 128>}, {pipeline_mode = #tpu.pipeline_mode<synchronous>, transform_indices = @transform_10, window_bounds = array<i64: 1, 128>}, {transform_indices = @transform_11, window_bounds = array<i64: 16, 128>}]} {
    %c0 = arith.constant 0 : index
    %c0_0 = arith.constant 0 : index
    %0 = vector.load %arg1[%c0, %c0_0] : memref<512x32xf32, #tpu.memory_space<vmem>>, vector<508x32xf32>
    %1 = arith.truncf %0 : vector<508x32xf32> to vector<508x32xbf16>
    %c1 = arith.constant 1 : index
    %c0_1 = arith.constant 0 : index
    %2 = vector.load %arg1[%c1, %c0_1] : memref<512x32xf32, #tpu.memory_space<vmem>>, vector<508x32xf32>
    %3 = arith.truncf %2 : vector<508x32xf32> to vector<508x32xbf16>
    %c2 = arith.constant 2 : index
    %c0_2 = arith.constant 0 : index
    %4 = vector.load %arg1[%c2, %c0_2] : memref<512x32xf32, #tpu.memory_space<vmem>>, vector<508x32xf32>
    %5 = arith.truncf %4 : vector<508x32xf32> to vector<508x32xbf16>
    %c3 = arith.constant 3 : index
    %c0_3 = arith.constant 0 : index
    %6 = vector.load %arg1[%c3, %c0_3] : memref<512x32xf32, #tpu.memory_space<vmem>>, vector<508x32xf32>
    %7 = arith.truncf %6 : vector<508x32xf32> to vector<508x32xbf16>
    %c4 = arith.constant 4 : index
    %c0_4 = arith.constant 0 : index
    %8 = vector.load %arg1[%c4, %c0_4] : memref<512x32xf32, #tpu.memory_space<vmem>>, vector<508x32xf32>
    %9 = arith.truncf %8 : vector<508x32xf32> to vector<508x32xbf16>
    %10 = tpu.concatenate %1, %3, %5, %7, %9 in 1 : vector<508x32xbf16>, vector<508x32xbf16>, vector<508x32xbf16>, vector<508x32xbf16>, vector<508x32xbf16> -> vector<508x160xbf16>
    %c0_5 = arith.constant 0 : index
    %c0_6 = arith.constant 0 : index
    %11 = vector.load %arg2[%c0_5, %c0_6] : memref<160x256xbf16, #tpu.memory_space<vmem>>, vector<160x256xbf16>
    %cst = arith.constant dense<0.000000e+00> : vector<508x256xf32>
    %12 = tpu.matmul %10, %11, %cst {dimension_numbers = #tpu.dot_dimension_numbers<[1], [0], [0], [1], [0, 0, 1, 1], [], []>} : vector<508x160xbf16>, vector<160x256xbf16>, vector<508x256xf32> -> vector<508x256xf32>
    %13 = vector.extract_strided_slice %12 {offsets = [0, 0], sizes = [508, 128], strides = [1, 1]} : vector<508x256xf32> to vector<508x128xf32>
    %14 = vector.extract_strided_slice %12 {offsets = [0, 128], sizes = [508, 128], strides = [1, 1]} : vector<508x256xf32> to vector<508x128xf32>
    %15 = arith.maximumf %13, %14 : vector<508x128xf32>
    %c0_7 = arith.constant 0 : index
    %c0_8 = arith.constant 0 : index
    %16 = vector.load %arg13[%c0_7, %c0_8] : memref<512x128xf32, #tpu.memory_space<vmem>>, vector<508x128xf32>
    tpu.vector_store %arg13[%c0_7, %c0_8], %15 {strides = array<i32>} : memref<512x128xf32, #tpu.memory_space<vmem>>, vector<508x128xf32>,
    %c0_9 = arith.constant 0 : index
    %c0_10 = arith.constant 0 : index
    %17 = tpu.strided_load %arg13[%c0_9, %c0_10] {strides = array<i32: 2, 1>} : memref<512x128xf32, #tpu.memory_space<vmem>>, vector<254x128xf32>
    %c1_11 = arith.constant 1 : index
    %c0_12 = arith.constant 0 : index
    %18 = tpu.strided_load %arg13[%c1_11, %c0_12] {strides = array<i32: 2, 1>} : memref<512x128xf32, #tpu.memory_space<vmem>>, vector<254x128xf32>
    %19 = arith.maximumf %17, %18 : vector<254x128xf32>
    %c0_13 = arith.constant 0 : index
    %c0_14 = arith.constant 0 : index
    %20 = vector.load %arg3[%c0_13, %c0_14] : memref<1x128xf32, #tpu.memory_space<vmem>>, vector<1x128xf32>
    %21 = vector.broadcast %20 : vector<1x128xf32> to vector<254x128xf32>
    %22 = arith.addf %19, %21 : vector<254x128xf32>
    %cst_15 = arith.constant 0.000000e+00 : f32
    %23 = vector.broadcast %cst_15 : f32 to vector<254x128xf32>
    %24 = arith.maximumf %22, %23 : vector<254x128xf32>
    %c0_16 = arith.constant 0 : index
    %c0_17 = arith.constant 0 : index
    %25 = vector.load %arg14[%c0_16, %c0_17] : memref<256x128xf32, #tpu.memory_space<vmem>>, vector<254x128xf32>
    tpu.vector_store %arg14[%c0_16, %c0_17], %24 {strides = array<i32>} : memref<256x128xf32, #tpu.memory_space<vmem>>, vector<254x128xf32>,
    %c0_18 = arith.constant 0 : index
    %c0_19 = arith.constant 0 : index
    %26 = vector.load %arg14[%c0_18, %c0_19] : memref<256x128xf32, #tpu.memory_space<vmem>>, vector<252x128xf32>
    %27 = arith.truncf %26 : vector<252x128xf32> to vector<252x128xbf16>
    %c1_20 = arith.constant 1 : index
    %c0_21 = arith.constant 0 : index
    %28 = vector.load %arg14[%c1_20, %c0_21] : memref<256x128xf32, #tpu.memory_space<vmem>>, vector<252x128xf32>
    %29 = arith.truncf %28 : vector<252x128xf32> to vector<252x128xbf16>
    %c2_22 = arith.constant 2 : index
    %c0_23 = arith.constant 0 : index
    %30 = vector.load %arg14[%c2_22, %c0_23] : memref<256x128xf32, #tpu.memory_space<vmem>>, vector<252x128xf32>
    %31 = arith.truncf %30 : vector<252x128xf32> to vector<252x128xbf16>
    %c3_24 = arith.constant 3 : index
    %c0_25 = arith.constant 0 : index
    %32 = vector.load %arg14[%c3_24, %c0_25] : memref<256x128xf32, #tpu.memory_space<vmem>>, vector<252x128xf32>
    %33 = arith.truncf %32 : vector<252x128xf32> to vector<252x128xbf16>
    %c4_26 = arith.constant 4 : index
    %c0_27 = arith.constant 0 : index
    %34 = vector.load %arg14[%c4_26, %c0_27] : memref<256x128xf32, #tpu.memory_space<vmem>>, vector<252x128xf32>
    %35 = arith.truncf %34 : vector<252x128xf32> to vector<252x128xbf16>
    %36 = tpu.concatenate %27, %29, %31, %33, %35 in 1 : vector<252x128xbf16>, vector<252x128xbf16>, vector<252x128xbf16>, vector<252x128xbf16>, vector<252x128xbf16> -> vector<252x640xbf16>
    %c0_28 = arith.constant 0 : index
    %c0_29 = arith.constant 0 : index
    %37 = vector.load %arg4[%c0_28, %c0_29] : memref<640x256xbf16, #tpu.memory_space<vmem>>, vector<640x256xbf16>
    %cst_30 = arith.constant dense<0.000000e+00> : vector<252x256xf32>
    %38 = tpu.matmul %36, %37, %cst_30 {dimension_numbers = #tpu.dot_dimension_numbers<[1], [0], [0], [1], [0, 0, 1, 1], [], []>} : vector<252x640xbf16>, vector<640x256xbf16>, vector<252x256xf32> -> vector<252x256xf32>
    %39 = vector.extract_strided_slice %38 {offsets = [0, 0], sizes = [252, 128], strides = [1, 1]} : vector<252x256xf32> to vector<252x128xf32>
    %40 = vector.extract_strided_slice %38 {offsets = [0, 128], sizes = [252, 128], strides = [1, 1]} : vector<252x256xf32> to vector<252x128xf32>
    %41 = arith.maximumf %39, %40 : vector<252x128xf32>
    %c0_31 = arith.constant 0 : index
    %c0_32 = arith.constant 0 : index
    %42 = vector.load %arg13[%c0_31, %c0_32] : memref<512x128xf32, #tpu.memory_space<vmem>>, vector<252x128xf32>
    tpu.vector_store %arg13[%c0_31, %c0_32], %41 {strides = array<i32>} : memref<512x128xf32, #tpu.memory_space<vmem>>, vector<252x128xf32>,
    %c0_33 = arith.constant 0 : index
    %c0_34 = arith.constant 0 : index
    %43 = tpu.strided_load %arg13[%c0_33, %c0_34] {strides = array<i32: 2, 1>} : memref<512x128xf32, #tpu.memory_space<vmem>>, vector<126x128xf32>
    %c1_35 = arith.constant 1 : index
    %c0_36 = arith.constant 0 : index
    %44 = tpu.strided_load %arg13[%c1_35, %c0_36] {strides = array<i32: 2, 1>} : memref<512x128xf32, #tpu.memory_space<vmem>>, vector<126x128xf32>
    %45 = arith.maximumf %43, %44 : vector<126x128xf32>
    %c0_37 = arith.constant 0 : index
    %c0_38 = arith.constant 0 : index
    %46 = vector.load %arg5[%c0_37, %c0_38] : memref<1x128xf32, #tpu.memory_space<vmem>>, vector<1x128xf32>
    %47 = vector.broadcast %46 : vector<1x128xf32> to vector<126x128xf32>
    %48 = arith.addf %45, %47 : vector<126x128xf32>
    %cst_39 = arith.constant 0.000000e+00 : f32
    %49 = vector.broadcast %cst_39 : f32 to vector<126x128xf32>
    %50 = arith.maximumf %48, %49 : vector<126x128xf32>
    %c0_40 = arith.constant 0 : index
    %c0_41 = arith.constant 0 : index
    %51 = vector.load %arg15[%c0_40, %c0_41] : memref<128x128xf32, #tpu.memory_space<vmem>>, vector<126x128xf32>
    tpu.vector_store %arg15[%c0_40, %c0_41], %50 {strides = array<i32>} : memref<128x128xf32, #tpu.memory_space<vmem>>, vector<126x128xf32>,
    %c0_42 = arith.constant 0 : index
    %c0_43 = arith.constant 0 : index
    %52 = tpu.strided_load %arg15[%c0_42, %c0_43] {strides = array<i32: 8, 1>} : memref<128x128xf32, #tpu.memory_space<vmem>>, vector<16x128xf32>
    %53 = arith.truncf %52 : vector<16x128xf32> to vector<16x128xbf16>
    %c1_44 = arith.constant 1 : index
    %c0_45 = arith.constant 0 : index
    %54 = tpu.strided_load %arg15[%c1_44, %c0_45] {strides = array<i32: 8, 1>} : memref<128x128xf32, #tpu.memory_space<vmem>>, vector<16x128xf32>
    %55 = arith.truncf %54 : vector<16x128xf32> to vector<16x128xbf16>
    %c2_46 = arith.constant 2 : index
    %c0_47 = arith.constant 0 : index
    %56 = tpu.strided_load %arg15[%c2_46, %c0_47] {strides = array<i32: 8, 1>} : memref<128x128xf32, #tpu.memory_space<vmem>>, vector<16x128xf32>
    %57 = arith.truncf %56 : vector<16x128xf32> to vector<16x128xbf16>
    %c3_48 = arith.constant 3 : index
    %c0_49 = arith.constant 0 : index
    %58 = tpu.strided_load %arg15[%c3_48, %c0_49] {strides = array<i32: 8, 1>} : memref<128x128xf32, #tpu.memory_space<vmem>>, vector<16x128xf32>
    %59 = arith.truncf %58 : vector<16x128xf32> to vector<16x128xbf16>
    %c4_50 = arith.constant 4 : index
    %c0_51 = arith.constant 0 : index
    %60 = tpu.strided_load %arg15[%c4_50, %c0_51] {strides = array<i32: 8, 1>} : memref<128x128xf32, #tpu.memory_space<vmem>>, vector<16x128xf32>
    %61 = arith.truncf %60 : vector<16x128xf32> to vector<16x128xbf16>
    %62 = tpu.concatenate %53, %55, %57, %59, %61 in 1 : vector<16x128xbf16>, vector<16x128xbf16>, vector<16x128xbf16>, vector<16x128xbf16>, vector<16x128xbf16> -> vector<16x640xbf16>
    %c0_52 = arith.constant 0 : index
    %c0_53 = arith.constant 0 : index
    %63 = vector.load %arg6[%c0_52, %c0_53] : memref<640x128xbf16, #tpu.memory_space<vmem>>, vector<640x128xbf16>
    %cst_54 = arith.constant dense<0.000000e+00> : vector<16x128xf32>
    %64 = tpu.matmul %62, %63, %cst_54 {dimension_numbers = #tpu.dot_dimension_numbers<[1], [0], [0], [1], [0, 0, 1, 1], [], []>} : vector<16x640xbf16>, vector<640x128xbf16>, vector<16x128xf32> -> vector<16x128xf32>
    %c0_55 = arith.constant 0 : index
    %c0_56 = arith.constant 0 : index
    %65 = vector.load %arg7[%c0_55, %c0_56] : memref<1x128xf32, #tpu.memory_space<vmem>>, vector<1x128xf32>
    %66 = vector.broadcast %65 : vector<1x128xf32> to vector<16x128xf32>
    %67 = arith.addf %64, %66 : vector<16x128xf32>
    %cst_57 = arith.constant 0.000000e+00 : f32
    %68 = vector.broadcast %cst_57 : f32 to vector<16x128xf32>
    %69 = arith.maximumf %67, %68 : vector<16x128xf32>
    %70 = arith.truncf %69 : vector<16x128xf32> to vector<16x128xbf16>
    %c0_58 = arith.constant 0 : index
    %c0_59 = arith.constant 0 : index
    %71 = vector.load %arg8[%c0_58, %c0_59] : memref<128x128xbf16, #tpu.memory_space<vmem>>, vector<128x128xbf16>
    %cst_60 = arith.constant dense<0.000000e+00> : vector<16x128xf32>
    %72 = tpu.matmul %70, %71, %cst_60 {dimension_numbers = #tpu.dot_dimension_numbers<[1], [0], [0], [1], [0, 0, 1, 1], [], []>} : vector<16x128xbf16>, vector<128x128xbf16>, vector<16x128xf32> -> vector<16x128xf32>
    %c0_61 = arith.constant 0 : index
    %c0_62 = arith.constant 0 : index
    %73 = vector.load %arg9[%c0_61, %c0_62] : memref<1x128xf32, #tpu.memory_space<vmem>>, vector<1x128xf32>
    %74 = vector.broadcast %73 : vector<1x128xf32> to vector<16x128xf32>
    %75 = arith.addf %72, %74 : vector<16x128xf32>
    %cst_63 = arith.constant 0.000000e+00 : f32
    %76 = vector.broadcast %cst_63 : f32 to vector<16x128xf32>
    %77 = arith.maximumf %75, %76 : vector<16x128xf32>
    %78 = arith.truncf %77 : vector<16x128xf32> to vector<16x128xbf16>
    %c0_64 = arith.constant 0 : index
    %c0_65 = arith.constant 0 : index
    %79 = vector.load %arg10[%c0_64, %c0_65] : memref<128x128xbf16, #tpu.memory_space<vmem>>, vector<128x128xbf16>
    %cst_66 = arith.constant dense<0.000000e+00> : vector<16x128xf32>
    %80 = tpu.matmul %78, %79, %cst_66 {dimension_numbers = #tpu.dot_dimension_numbers<[1], [0], [0], [1], [0, 0, 1, 1], [], []>} : vector<16x128xbf16>, vector<128x128xbf16>, vector<16x128xf32> -> vector<16x128xf32>
    %c0_67 = arith.constant 0 : index
    %c0_68 = arith.constant 0 : index
    %81 = vector.load %arg11[%c0_67, %c0_68] : memref<1x128xf32, #tpu.memory_space<vmem>>, vector<1x128xf32>
    %82 = vector.broadcast %81 : vector<1x128xf32> to vector<16x128xf32>
    %83 = arith.addf %80, %82 : vector<16x128xf32>
    %c0_69 = arith.constant 0 : index
    %c0_70 = arith.constant 0 : index
    %84 = vector.load %arg12[%c0_69, %c0_70] : memref<16x128xf32, #tpu.memory_space<vmem>>, vector<16x128xf32>
    tpu.vector_store %arg12[%c0_69, %c0_70], %83 {strides = array<i32>} : memref<16x128xf32, #tpu.memory_space<vmem>>, vector<16x128xf32>,
    return
  }
  func.func @transform_0(%arg0: i32) -> (i32, i32) {
    %c0_i32 = arith.constant 0 : i32
    %c0_i32_0 = arith.constant 0 : i32
    return %arg0, %c0_i32 : i32, i32
  }
  func.func @transform_1(%arg0: i32) -> (i32, i32) {
    %c0_i32 = arith.constant 0 : i32
    %c0_i32_0 = arith.constant 0 : i32
    %c0_i32_1 = arith.constant 0 : i32
    return %c0_i32, %c0_i32_0 : i32, i32
  }
  func.func @transform_2(%arg0: i32) -> (i32, i32) {
    %c0_i32 = arith.constant 0 : i32
    %c0_i32_0 = arith.constant 0 : i32
    %c0_i32_1 = arith.constant 0 : i32
    return %c0_i32, %c0_i32_0 : i32, i32
  }
  func.func @transform_3(%arg0: i32) -> (i32, i32) {
    %c0_i32 = arith.constant 0 : i32
    %c0_i32_0 = arith.constant 0 : i32
    %c0_i32_1 = arith.constant 0 : i32
    return %c0_i32, %c0_i32_0 : i32, i32
  }
  func.func @transform_4(%arg0: i32) -> (i32, i32) {
    %c0_i32 = arith.constant 0 : i32
    %c0_i32_0 = arith.constant 0 : i32
    %c0_i32_1 = arith.constant 0 : i32
    return %c0_i32, %c0_i32_0 : i32, i32
  }
  func.func @transform_5(%arg0: i32) -> (i32, i32) {
    %c0_i32 = arith.constant 0 : i32
    %c0_i32_0 = arith.constant 0 : i32
    %c0_i32_1 = arith.constant 0 : i32
    return %c0_i32, %c0_i32_0 : i32, i32
  }
  func.func @transform_6(%arg0: i32) -> (i32, i32) {
    %c0_i32 = arith.constant 0 : i32
    %c0_i32_0 = arith.constant 0 : i32
    %c0_i32_1 = arith.constant 0 : i32
    return %c0_i32, %c0_i32_0 : i32, i32
  }
  func.func @transform_7(%arg0: i32) -> (i32, i32) {
    %c0_i32 = arith.constant 0 : i32
    %c0_i32_0 = arith.constant 0 : i32
    %c0_i32_1 = arith.constant 0 : i32
    return %c0_i32, %c0_i32_0 : i32, i32
  }
  func.func @transform_8(%arg0: i32) -> (i32, i32) {
    %c0_i32 = arith.constant 0 : i32
    %c0_i32_0 = arith.constant 0 : i32
    %c0_i32_1 = arith.constant 0 : i32
    return %c0_i32, %c0_i32_0 : i32, i32
  }
  func.func @transform_9(%arg0: i32) -> (i32, i32) {
    %c0_i32 = arith.constant 0 : i32
    %c0_i32_0 = arith.constant 0 : i32
    %c0_i32_1 = arith.constant 0 : i32
    return %c0_i32, %c0_i32_0 : i32, i32
  }
  func.func @transform_10(%arg0: i32) -> (i32, i32) {
    %c0_i32 = arith.constant 0 : i32
    %c0_i32_0 = arith.constant 0 : i32
    %c0_i32_1 = arith.constant 0 : i32
    return %c0_i32, %c0_i32_0 : i32, i32
  }
  func.func @transform_11(%arg0: i32) -> (i32, i32) {
    %c0_i32 = arith.constant 0 : i32
    %c0_i32_0 = arith.constant 0 : i32
    return %arg0, %c0_i32 : i32, i32
  }
}

</mosaic_0001>

<bundles_post_ra>
// kernel: simple_classifier_forward.1
= control target key start
LH: loop header
LB: loop body
LE: loop exit
PB: predicated region body
PF: predicated region fallthrough
CT: control target
= control target key end

     0   :  { %s6869_s0 = inlined_call_operand.hbm [shape: f32[1024,32], index: 0, kind: input, shape index: {}]   ;;  %s6870_s1 = inlined_call_operand.hbm [shape: bf16[160,256], index: 1, kind: input, shape index: {}]   ;;  %s6871_s2 = inlined_call_operand.vmem [shape: f32[1,128], index: 2, kind: input, shape index: {}]   ;;  %s6872_s3 = inlined_call_operand.hbm [shape: bf16[640,256], index: 3, kind: input, shape index: {}]   ;;  %s6873_s4 = inlined_call_operand.vmem [shape: f32[1,128], index: 4, kind: input, shape index: {}]   ;;  %s6874_s5 = inlined_call_operand.hbm [shape: bf16[640,128], index: 5, kind: input, shape index: {}]   ;;  %s6875_s6 = inlined_call_operand.vmem [shape: f32[1,128], index: 6, kind: input, shape index: {}]   ;;  %s6876_s7 = inlined_call_operand.hbm [shape: bf16[128,128], index: 7, kind: input, shape index: {}]   ;;  %s6877_s8 = inlined_call_operand.vmem [shape: f32[1,128], index: 8, kind: input, shape index: {}]   ;;  %s6878_s9 = inlined_call_operand.hbm [shape: bf16[128,128], index: 9, kind: input, shape index: {}]   ;;  %s6879_s10 = inlined_call_operand.vmem [shape: f32[1,128], index: 10, kind: input, shape index: {}]   ;;  %s6880_s11 = inlined_call_operand.vmem [shape: f32[32,128], index: 11, kind: output, shape index: {}]  }
   0x1   :  { %6891 = sst [smem:[#allocation19_spill]] %s6870_s1 }
   0x2   :  { %6892 = sst [smem:[#allocation20_spill]] %s6877_s8 }
   0x3   :  { %6893 = sst [smem:[#allocation21_spill]] %s6879_s10 }
   0x4   :  { %6894 = sst [smem:[#allocation22_spill]] %s6880_s11 }
   0x5   :  { %16 = vsyncpa [#allocation6], 0 }
   0x6   :  { %18 = vsyncpa [#allocation6 + $0x1], 0 }
   0x7   :  { %19 = vsyncpa [#allocation8], 0 }
   0x8   :  { %20 = vsyncpa [#allocation11], 0 }
   0x9   :  { %21 = vsyncpa [#allocation14], 0  ;;  %s5853_s17 = smov 0   ;;  %s5855_s18 = smov 0  }
   0xa   :  { %s5857_s19 = smov 0   ;;  %s5859_s20 = smov 0  }
   0xb LB: > { %s5777_s21 = smov [#allocation7]   ;;  %s6881_s23 = sadd.s32 4294967295, %s5775_s20   ;;  %s5775_s20 = sphi %s5859_s20, %s6915_s20   ;;  %s5771_s19 = sphi %s5857_s19, %s6914_s19   ;;  %s5767_s18 = sphi %s5855_s18, %s6913_s18   ;;  %s5763_s17 = sphi %s5853_s17, %s6912_s17  }
   0xc   : > { %s306_s22 = sshll.u32 %s5777_s21, 4  ;;  %p4778_p0 = scmp.ge.s32.totalorder %s5775_s20, 1  ;;  %s5882_s22 = int_to_ptr.vmem [resolvable:$true] %s306_s22 }
   0xd   : > { %p5877_p1 = scmp.eq.s32.totalorder %s6881_s23, 0  ;;  %p294_p2 = scmp.lt.s32.totalorder %s5775_s20, 3 }
   0xe   : > { %s5778_s26 = smov [#allocation10]   ;;  %s5779_s29 = smov [#allocation9]  }
   0xf   : > { %s6895_s24 = scalar_select %p5877_p1, 1, 0 }
  0x10   : > { %p5884_p3 = pnand %p4778_p0, %p294_p2  ;;  %s338_s27 = sshll.u32 %s5778_s26, 4  ;;  %s5896_s27 = int_to_ptr.vmem [resolvable:$true] %s338_s27 }
  0x11   : > { %s5898_s30 = sshll.u32 %s5779_s29, 4  ;;  %s6898_s1 = sld [smem:[#allocation19_spill]]  ;;  %s323_s30 = int_to_ptr.vmem [resolvable:$true] %s5898_s30 }
  0x12   : > { %s6896_s25 = scalar_select %p5884_p3, 1, 0 }
  0x13   : > { %p5274_p4 = pneg %p5884_p3 }
  0x15   : > { %p5892_p5 = pnand %p5274_p4, %p5877_p1 }
  0x17   : > { %s5559_s14 = scalar_lea.hbm %s6898_s1, 2560  ;;  %p5908_p7 = pneg %p5892_p5 }
  0x18   : > { %p5560_p6 = scmp.ne.s32.totalorder %s6898_s1, %s5559_s14  ;;  %p5566_p10 = scmp.lt.u32.totalorder %s5559_s14, %s6898_s1 }
  0x1a   : > { %p5562_p8 = pnand %p5908_p7, %p5560_p6 }
  0x1c   : > { %p5563_p9 = pneg %p5562_p8 }
  0x1e   : > { %p5568_p11 = pnand %p5566_p10, %p5563_p9 }
  0x20   : > { %5571 = shalt.err (!%p5568_p11)
}
  0x21   : > { %s5572_s12 = scalar_lea.vmem %s5882_s22, 2560  ;;  %p5580_p2 = scmp.lt.s32.totalorder %s5882_s22, %s5882_s22 }
  0x22   : > { %p5573_p12 = scmp.ne.s32.totalorder %s5882_s22, %s5572_s12  ;;  %p5581_p4 = scmp.lt.s32.totalorder %s5572_s12, %s5572_s12 }
  0x24   : > { %p5575_p13 = pnand %p5573_p12, %p5908_p7  ;;  %p5582_p6 = por %p5581_p4, %p5580_p2 }
  0x26   : > { %p5576_p0 = pneg %p5575_p13 }
  0x28   : > { %p5583_p8 = pnand %p5582_p6, %p5576_p0 }
  0x2a   : > { %5586 = shalt.err (!%p5583_p8)
}
  0x2b   : > { %s6882_s13 = smov 128   ;;  %s5781_s14 = smov 8  }
  0x2c   : > { %5277 = dma.hbm_to_vmem [thread:$0]  (!%p5892_p5), %s6898_s1, 2560, %s5882_s22, [#allocation8], %s6882_s13, %s6882_s13, %s5781_s14  }
  0x2d   : > { %s5587_s12 = scalar_lea.hbm %s6874_s5, 5120 }
  0x2e   : > { %p5588_p9 = scmp.ne.s32.totalorder %s6874_s5, %s5587_s12  ;;  %p5594_p12 = scmp.lt.u32.totalorder %s5587_s12, %s6874_s5 }
  0x30   : > { %p5590_p10 = pnand %p5588_p9, %p5908_p7 }
  0x32   : > { %p5591_p11 = pneg %p5590_p10 }
  0x34   : > { %p5596_p13 = pnand %p5594_p12, %p5591_p11 }
  0x36   : > { %5599 = shalt.err (!%p5596_p13)
}
  0x37   : > { %s5600_s22 = scalar_lea.vmem %s5896_s27, 5120  ;;  %p5608_p6 = scmp.lt.s32.totalorder %s5896_s27, %s5896_s27 }
  0x38   : > { %p5601_p0 = scmp.ne.s32.totalorder %s5896_s27, %s5600_s22  ;;  %p5609_p8 = scmp.lt.s32.totalorder %s5600_s22, %s5600_s22 }
  0x3a   : > { %p5603_p2 = pnand %p5601_p0, %p5908_p7  ;;  %p5610_p9 = por %p5609_p8, %p5608_p6 }
  0x3c   : > { %p5604_p4 = pneg %p5603_p2 }
  0x3e   : > { %p5611_p10 = pnand %p5610_p9, %p5604_p4 }
  0x40   : > { %5614 = shalt.err (!%p5611_p10)
}
  0x41   : > { %s6887_s11 = smov 64   ;;  %s6889_s8 = smov 4  }
  0x42   : > { %5283 = dma.hbm_to_vmem [thread:$0]  (!%p5892_p5), %s6874_s5, 5120, %s5896_s27, [#allocation11], %s6887_s11, %s6887_s11, %s6889_s8  }
  0x43   : > { %s5615_s26 = scalar_lea.hbm %s6872_s3, 10240 }
  0x44   : > { %p5616_p11 = scmp.ne.s32.totalorder %s6872_s3, %s5615_s26  ;;  %p5622_p0 = scmp.lt.u32.totalorder %s5615_s26, %s6872_s3 }
  0x46   : > { %p5618_p12 = pnand %p5616_p11, %p5908_p7 }
  0x48   : > { %p5619_p13 = pneg %p5618_p12 }
  0x4a   : > { %p5624_p2 = pnand %p5622_p0, %p5619_p13 }
  0x4c   : > { %5627 = shalt.err (!%p5624_p2)
}
  0x4d   : > { %s5628_s10 = scalar_lea.vmem %s323_s30, 10240  ;;  %p5636_p9 = scmp.lt.s32.totalorder %s323_s30, %s323_s30 }
  0x4e   : > { %p5629_p4 = scmp.ne.s32.totalorder %s323_s30, %s5628_s10  ;;  %p5637_p10 = scmp.lt.s32.totalorder %s5628_s10, %s5628_s10 }
  0x50   : > { %p5631_p6 = pnand %p5629_p4, %p5908_p7  ;;  %p5638_p3 = por %p5637_p10, %p5636_p9 }
  0x52   : > { %p5632_p8 = pneg %p5631_p6 }
  0x54   : > { %p5639_p1 = pnand %p5638_p3, %p5632_p8 }
  0x56   : > { %5642 = shalt.err (!%p5639_p1)
}
  0x57   : > { %s6900_s27 = smov 128   ;;  %s5784_s15 = smov [#allocation12]  }
  0x58   : > { %5280 = dma.hbm_to_vmem [thread:$0]  (!%p5892_p5), %s6872_s3, 10240, %s323_s30, [#allocation8], %s6900_s27, %s6900_s27, %s5781_s14  }
  0x59   : > { %s354_s16 = sshll.u32 %s5784_s15, 4  ;;  %s5785_s26 = smov [#allocation13]   ;;  %s355_s16 = int_to_ptr.vmem [resolvable:$true] %s354_s16 }
  0x5a   : > { %s370_s29 = sshll.u32 %s5785_s26, 4  ;;  %s5643_s10 = scalar_lea.hbm %s6876_s7, 1024  ;;  %s371_s29 = int_to_ptr.vmem [resolvable:$true] %s370_s29 }
  0x5b   : > { %p5644_p1 = scmp.ne.s32.totalorder %s6876_s7, %s5643_s10  ;;  %p5650_p12 = scmp.lt.u32.totalorder %s5643_s10, %s6876_s7 }
  0x5d   : > { %p5646_p3 = pnand %p5644_p1, %p5908_p7 }
  0x5f   : > { %p5647_p11 = pneg %p5646_p3 }
  0x61   : > { %p5652_p13 = pnand %p5650_p12, %p5647_p11 }
  0x63   : > { %5655 = shalt.err (!%p5652_p13)
}
  0x64   : > { %s5656_s30 = scalar_lea.vmem %s355_s16, 1024  ;;  %p5664_p6 = scmp.lt.s32.totalorder %s355_s16, %s355_s16 }
  0x65   : > { %p5657_p0 = scmp.ne.s32.totalorder %s355_s16, %s5656_s30  ;;  %p5665_p8 = scmp.lt.s32.totalorder %s5656_s30, %s5656_s30 }
  0x67   : > { %p5659_p2 = pnand %p5657_p0, %p5908_p7  ;;  %p5666_p9 = por %p5665_p8, %p5664_p6 }
  0x69   : > { %p5660_p4 = pneg %p5659_p2 }
  0x6b   : > { %p5667_p10 = pnand %p5666_p9, %p5660_p4 }
  0x6d   : > { %5670 = shalt.err (!%p5667_p10)
}
  0x6e   : > { %s6901_s11 = smov 4   ;;  %s6902_s8 = smov 64  }
  0x6f   : > { %5286 = dma.hbm_to_vmem [thread:$0]  (!%p5892_p5), %s6876_s7, 1024, %s355_s16, [#allocation11], %s6902_s8, %s6902_s8, %s6901_s11  }
  0x70   : > { %s5671_s12 = scalar_lea.hbm %s6878_s9, 1024 }
  0x71   : > { %p5672_p1 = scmp.ne.s32.totalorder %s6878_s9, %s5671_s12  ;;  %p5678_p12 = scmp.lt.u32.totalorder %s5671_s12, %s6878_s9 }
  0x73   : > { %p5674_p3 = pnand %p5672_p1, %p5908_p7 }
  0x75   : > { %p5675_p11 = pneg %p5674_p3 }
  0x77   : > { %p5680_p13 = pnand %p5678_p12, %p5675_p11 }
  0x79   : > { %5683 = shalt.err (!%p5680_p13)
}
  0x7a   : > { %s5684_s1 = scalar_lea.vmem %s371_s29, 1024  ;;  %p5692_p6 = scmp.lt.s32.totalorder %s371_s29, %s371_s29 }
  0x7b   : > { %p5685_p0 = scmp.ne.s32.totalorder %s371_s29, %s5684_s1  ;;  %p5693_p8 = scmp.lt.s32.totalorder %s5684_s1, %s5684_s1 }
  0x7d   : > { %p5687_p2 = pnand %p5685_p0, %p5908_p7  ;;  %p5694_p9 = por %p5693_p8, %p5692_p6 }
  0x7f   : > { %p5688_p4 = pneg %p5687_p2 }
  0x81   : > { %p5695_p10 = pnand %p5694_p9, %p5688_p4 }
  0x83   : > { %5698 = shalt.err (!%p5695_p10)
}
  0x84   : > { %5289 = dma.hbm_to_vmem [thread:$0]  (!%p5892_p5), %s6878_s9, 1024, %s371_s29, [#allocation14], %s6902_s8, %s6902_s8, %s6901_s11  }
  0x85   : > { %s6023_s28 = sadd.s32 1, %s5775_s20   ;;  %s34_s15 = sadd.s32 1, %s5771_s19 }
  0x86   : > { %s31_s21 = ssub.s32 %s5775_s20, %s6023_s28  ;;  %p41_p1 = scmp.ne.s32.totalorder %s5771_s19, %s5767_s18 }
  0x87   : > { %p32_p7 = scmp.eq.s32.totalorder %s31_s21, 0  ;;  %p42_p3 = scmp.eq.s32.totalorder %s5775_s20, 0 }
  0x88   : > { %p47_p11 = scmp.ne.s32.totalorder %s5767_s18, %s5763_s17  ;;  %p6903_p13 = scmp.ne.s32.totalorder %s6895_s24, 0 }
  0x89   : > { %s6034_s26 = scalar_select %p32_p7, %s5771_s19, %s34_s15  }
  0x8a   : > { %p43_p12 = por %p42_p3, %p41_p1  ;;  %p6038_p0 = por %p6903_p13, %p47_p11 }
  0x8b   : > { %p5299_p2 = scmp.lt.s32.totalorder %s5775_s20, 2  ;;  %s387_s22 = sand.u32 1, %s5771_s19  }
  0x8c   : > { %s4785_s29 = sshll.u32 %s387_s22, 9  ;;  %s4992_s11 = sshll.u32 %s5775_s20, 13 }
  0x8d   : > { %s6048_s13 = scalar_lea.hbm %s6869_s0, %s4992_s11  ;;  %s391_s17 = scalar_lea.vmem [#allocation5], %s4785_s29 }
  0x8e   : > { %s398_s30 = sshll.u32 %s391_s17, 4  ;;  %p6052_p5 = pnand %p5299_p2, %p43_p12  ;;  %s6050_s30 = int_to_ptr.vmem [resolvable:$true] %s398_s30 }
  0x8f   : > { %s6056_s16 = scalar_lea.sflag [#allocation6], %s387_s22  ;;  %s5699_s23 = scalar_lea.hbm %s6048_s13, 8192 }
  0x90   : > { %p5700_p4 = scmp.ne.s32.totalorder %s6048_s13, %s5699_s23  ;;  %p5701_p6 = pneg %p6052_p5 }
  0x91   : > { %s5704_s29 = scalar_lea.hbm %s6869_s0, 16384  ;;  %p5705_p10 = scmp.lt.u32.totalorder %s6048_s13, %s6869_s0 }
  0x92   : > { %p5702_p8 = pnand %p5701_p6, %p5700_p4  ;;  %p5706_p7 = scmp.lt.u32.totalorder %s5704_s29, %s5699_s23 }
  0x93   : > { %p5708_p3 = scmp.lt.u32.totalorder %s5699_s23, %s6048_s13 }
  0x94   : > { %p5703_p9 = pneg %p5702_p8  ;;  %p5707_p1 = por %p5706_p7, %p5705_p10 }
  0x96   : > { %p5709_p11 = por %p5708_p3, %p5707_p1 }
  0x98   : > { %p5710_p12 = pnand %p5709_p11, %p5703_p9 }
  0x9a   : > { %5713 = shalt.err (!%p5710_p12)
}
  0x9b   : > { %s5714_s22 = scalar_lea.vmem %s6050_s30, 8192  ;;  %s5786_s10 = smov [#allocation5]  }
  0x9c   : > { %p5715_p13 = scmp.ne.s32.totalorder %s6050_s30, %s5714_s22  ;;  %s5719_s17 = sshll.u32 %s5786_s10, 4  ;;  %s5720_s17 = int_to_ptr.vmem [resolvable:$false] %s5719_s17 }
  0x9d   : > { %s5721_s21 = scalar_lea.vmem %s5720_s17, 16384  ;;  %p5722_p8 = scmp.lt.s32.totalorder %s6050_s30, %s5720_s17 }
  0x9e   : > { %p5717_p2 = pnand %p5715_p13, %p5701_p6  ;;  %p5723_p10 = scmp.lt.s32.totalorder %s5721_s21, %s5714_s22 }
  0xa0   : > { %p5718_p4 = pneg %p5717_p2  ;;  %p5724_p7 = por %p5723_p10, %p5722_p8 }
  0xa2   : > { %p5725_p1 = pnand %p5724_p7, %p5718_p4 }
  0xa4   : > { %5728 = shalt.err (!%p5725_p1)
}
  0xa5   : > { %5293 = dma.hbm_to_vmem [thread:$0]  (!%p6052_p5), %s6048_s13, 8192, %s6050_s30, %s6056_s16, %s6900_s27, %s6900_s27, %s5781_s14  }
  0xa6   : > { %p6906_p6 = scmp.ne.s32.totalorder %s6896_s25, 0 }
  0xa7   : > { %s412_s23 = sand.u32 (!%p6906_p6), 1, %s5767_s18  }
  0xa8   : > { %410 = sbr.rel (%p6906_p6) target bundleno = 2018 (0x7e2), region = 64  ;;  %s4789_s15 = sshll.u32 (!%p6906_p6), %s412_s23, 9 }
  0xa9   : > { %s413_s29 = scalar_lea.sflag (!%p6906_p6), [#allocation6], %s412_s23  ;;  %s6090_s11 = scalar_lea.vmem (!%p6906_p6), [#allocation5], %s4789_s15 }
  0xaf   : > { %5746 = dma.done.wait (%p6038_p0), %s413_s29, 8192  }
  0xb0   : > { %5748 = vsyncadd (%p6038_p0), %s413_s29, 4294959104  ;;  %p6907_p9 = scmp.ne.s32.totalorder %s6895_s24, 0 }
  0xb2   : > { %5750 = dma.done.wait (%p6907_p9), [#allocation8], 12800  }
  0xb3   : > { %5752 = vsyncadd (%p6907_p9), [#allocation8], 4294954496 }
  0xb4   : > { %5754 = dma.done.wait (%p6907_p9), [#allocation11], 6144  }
  0xb5   : > { %5756 = vsyncadd (%p6907_p9), [#allocation11], 4294961152 }
  0xb6   : > { %5758 = dma.done.wait (%p6907_p9), [#allocation14], 1024  }
  0xb7   : > { %5760 = vsyncadd (%p6907_p9), [#allocation14], 4294966272  ;;  %v579_v0 = vld [vmem:[%s6090_s11 + $0x1] sm:$0xff]  ;;  %v580_v1 = vld [vmem:[%s6090_s11 + $0x9] sm:$0xff]  ;;  %s5787_s24 = smov 32   ;;  %s5788_s25 = smov 96  }
  0xb8   : > { %v771_v2 = vld [vmem:[%s6090_s11 + $0x3] sm:$0xff]  ;;  %v643_v3 = vpack.c.bf16 %v580_v1, %v579_v0  ;;  %v772_v4 = vld [vmem:[%s6090_s11 + $0xb] sm:$0xff]  ;;  %v582_v9 = vld [vmem:[%s6090_s11 + $0x19] sm:$0xff]  ;;  %s5789_s14 = smov 64   ;;  %vm1251_vm0 = vcmask 261120   ;;  %vm1348_vm1 = vcmask 523264  }
  0xb9   : > { %v675_v5 = vld [vmem:[%s6090_s11 + $0x2] sm:$0xff]  ;;  %v676_v6 = vld [vmem:[%s6090_s11 + $0xa] sm:$0xff]  ;;  %v835_v7 = vpack.c.bf16 %v772_v4, %v771_v2  ;;  %v677_v12 = vld [vmem:[%s6090_s11 + $0x12] sm:$0xff]  ;;  %vm1413_vm2 = vcmask 785408   ;;  %vm5792_vm3 = vmmov 0   ;;  %s6908_s21 = sld [smem:[#allocation20_spill]] }
  0xba   : > { %v581_v8 = vld [vmem:[%s6090_s11 + $0x11] sm:$0xff]  ;;  %995 = vrot.lane.b32.xlu0 %v643_v3, %s5787_s24  ;;  %v739_v10 = vpack.c.bf16 %v676_v6, %v675_v5  ;;  %v678_v13 = vld [vmem:[%s6090_s11 + $0x1a] sm:$0xff]  ;;  %v584_v19 = vld [vmem:[%s6090_s11 + $0x29] sm:$0xff]  ;;  %s6909_s23 = sadd.s32 4294967295, %s5775_s20   ;;  %s6911_s12 = sld [smem:[#allocation22_spill]] }
  0xbb   : > { %1187 = vrot.lane.b32.xlu1 %v835_v7, %s5788_s25  ;;  %v644_v11 = vpack.c.bf16 %v582_v9, %v581_v8  ;;  %v773_v14 = vld [vmem:[%s6090_s11 + $0x13] sm:$0xff]  ;;  %v774_v15 = vld [vmem:[%s6090_s11 + $0x1b] sm:$0xff]  ;;  %v740_v16 = vpack.c.bf16 %v678_v13, %v677_v12  ;;  %v680_v21 = vld [vmem:[%s6090_s11 + $0x2a] sm:$0xff]  ;;  %s4795_s15 = sshll.u32 %s6909_s23, 1 }
  0xbc   : > { %v836_v17 = vpack.c.bf16 %v774_v15, %v773_v14  ;;  %v583_v18 = vld [vmem:[%s6090_s11 + $0x21] sm:$0xff]  ;;  %v776_v25 = vld [vmem:[%s6090_s11 + $0x2b] sm:$0xff]  ;;  %v586_v27 = vld [vmem:[%s6090_s11 + $0x39] sm:$0xff]  ;;  %p477_p0 = scmp.lt.s32.totalorder %s4795_s15, 3 }
  0xbd   : > { %v679_v20 = vld [vmem:[%s6090_s11 + $0x22] sm:$0xff]  ;;  %v645_v22 = vpack.c.bf16 %v584_v19, %v583_v18  ;;  %v585_v26 = vld [vmem:[%s6090_s11 + $0x31] sm:$0xff]  ;;  %v682_v31 = vld [vmem:[%s6090_s11 + $0x3a] sm:$0xff] }
  0xbe   : > { %1091 = vrot.lane.b32.xlu0 %v739_v10, %s5789_s14  ;;  %v741_v23 = vpack.c.bf16 %v680_v21, %v679_v20  ;;  %v775_v24 = vld [vmem:[%s6090_s11 + $0x23] sm:$0xff]  ;;  %v646_v29 = vpack.c.bf16 %v586_v27, %v585_v26  ;;  %v681_v30 = vld [vmem:[%s6090_s11 + $0x32] sm:$0xff]  ;;  %v778_v33 = vld [vmem:[%s6090_s11 + $0x3b] sm:$0xff]  ;;  %s6917_s15 = smov (!%p477_p0, %s4795_s15), 3 }
  0xbf   : > { %997 = vrot.lane.b32.xlu1 %v644_v11, %s5787_s24  ;;  %v837_v28 = vpack.c.bf16 %v776_v25, %v775_v24  ;;  %v777_v32 = vld [vmem:[%s6090_s11 + $0x33] sm:$0xff]  ;;  %v742_v34 = vpack.c.bf16 %v682_v31, %v681_v30  ;;  %v587_v35 = vld [vmem:[%s6090_s11 + $0x41] sm:$0xff]  ;;  %v588_v36 = vld [vmem:[%s6090_s11 + $0x49] sm:$0xff]  ;;  %s4796_s29 = sshll.u32 %s6917_s15, 3 }
  0xc0   : > { %v838_v37 = vpack.c.bf16 %v778_v33, %v777_v32  ;;  %v683_v38 = vld [vmem:[%s6090_s11 + $0x42] sm:$0xff]  ;;  %v684_v39 = vld [vmem:[%s6090_s11 + $0x4a] sm:$0xff]  ;;  %v647_v43 = vpack.c.bf16 %v588_v36, %v587_v35  ;;  %v5355_v47 = vld [vmem:[#allocation7 + $0x14] ss:$8 sps:$4 sm:$0xff]   ;;  %s480_s13 = scalar_lea.vmem %s6911_s12, %s4796_s29 }
  0xc1   : > { %v5352_v40 = vld [vmem:[#allocation7 + $0x4] ss:$8 sps:$4 sm:$0xff]   ;;  %v5354_v41 = vld [vmem:[#allocation7] ss:$8 sps:$4 sm:$0xff]   ;;  %v743_v45 = vpack.c.bf16 %v684_v39, %v683_v38  ;;  %v589_v46 = vld [vmem:[%s6090_s11 + $0x51] sm:$0xff] }
  0xc2   : > { %1093 = vrot.lane.b32.xlu0 %v740_v16, %s5789_s14  ;;  %v779_v42 = vld [vmem:[%s6090_s11 + $0x43] sm:$0xff]  ;;  %v780_v44 = vld [vmem:[%s6090_s11 + $0x4b] sm:$0xff]  ;;  %1726 = vmatprep.subr.bf16.mxu0 %v5352_v40  ;;  %v590_v49 = vld [vmem:[%s6090_s11 + $0x59] sm:$0xff] }
  0xc3   : > { %1189 = vrot.lane.b32.xlu1 %v836_v17, %s5788_s25  ;;  %1727 = vmatpush1.bf16.msra.mxu0 %v5354_v41  ;;  %v5357_v48 = vld [vmem:[#allocation7 + $0x10] ss:$8 sps:$4 sm:$0xff]   ;;  %v5358_v50 = vld [vmem:[#allocation7 + $0x24] ss:$8 sps:$4 sm:$0xff]   ;;  %v839_v51 = vpack.c.bf16 %v780_v44, %v779_v42  ;;  %v648_v54 = vpack.c.bf16 %v590_v49, %v589_v46  ;;  %v5360_v55 = vld [vmem:[#allocation7 + $0x20] ss:$8 sps:$4 sm:$0xff]  }
  0xc4   : > { %1728 = vmatprep.subr.bf16.mxu0 %v5355_v47  ;;  %v685_v52 = vld [vmem:[%s6090_s11 + $0x52] sm:$0xff]  ;;  %v686_v53 = vld [vmem:[%s6090_s11 + $0x5a] sm:$0xff]  ;;  %v592_v61 = vld [vmem:[%s6090_s11 + $0x69] sm:$0xff] }
  0xc5   : > { %v781_v56 = vld [vmem:[%s6090_s11 + $0x53] sm:$0xff]  ;;  %v782_v57 = vld [vmem:[%s6090_s11 + $0x5b] sm:$0xff]  ;;  %v744_v59 = vpack.c.bf16 %v686_v53, %v685_v52  ;;  %v688_v1 = vld [vmem:[%s6090_s11 + $0x6a] sm:$0xff] }
  0xc6   : > { %999 = vrot.lane.b32.xlu0 %v645_v22, %s5787_s24  ;;  %v5361_v58 = vld [vmem:[#allocation7 + $0x34] ss:$8 sps:$4 sm:$0xff]   ;;  %v591_v60 = vld [vmem:[%s6090_s11 + $0x61] sm:$0xff]  ;;  %v840_v62 = vpack.c.bf16 %v782_v57, %v781_v56  ;;  %v5363_v0 = vld [vmem:[#allocation7 + $0x30] ss:$8 sps:$4 sm:$0xff]  }
  0xc7   : > { %1095 = vrot.lane.b32.xlu1 %v741_v23, %s5789_s14  ;;  %1729 = vmatpush1.bf16.msra.mxu0 %v5357_v48  ;;  %v687_v63 = vld [vmem:[%s6090_s11 + $0x62] sm:$0xff]  ;;  %v649_v3 = vpack.c.bf16 %v592_v61, %v591_v60  ;;  %v784_v5 = vld [vmem:[%s6090_s11 + $0x6b] sm:$0xff]  ;;  %v594_v8 = vld [vmem:[%s6090_s11 + $0x79] sm:$0xff] }
  0xc8   : > { %1730 = vmatprep.subr.bf16.mxu0 %v5358_v50  ;;  %v5364_v2 = vld [vmem:[#allocation7 + $0x44] ss:$8 sps:$4 sm:$0xff]   ;;  %v745_v6 = vpack.c.bf16 %v688_v1, %v687_v63  ;;  %v593_v7 = vld [vmem:[%s6090_s11 + $0x71] sm:$0xff]  ;;  %v5366_v9 = vld [vmem:[#allocation7 + $0x40] ss:$8 sps:$4 sm:$0xff]  }
  0xc9   : > { %v783_v4 = vld [vmem:[%s6090_s11 + $0x63] sm:$0xff]  ;;  %v5367_v10 = vld [vmem:[#allocation7 + $0x54] ss:$8 sps:$4 sm:$0xff]   ;;  %v650_v12 = vpack.c.bf16 %v594_v8, %v593_v7  ;;  %v5369_v15 = vld [vmem:[#allocation7 + $0x50] ss:$8 sps:$4 sm:$0xff]  }
  0xca   : > { %1191 = vrot.lane.b32.xlu0 %v837_v28, %s5788_s25  ;;  %v841_v11 = vpack.c.bf16 %v784_v5, %v783_v4  ;;  %v689_v13 = vld [vmem:[%s6090_s11 + $0x72] sm:$0xff]  ;;  %v690_v14 = vld [vmem:[%s6090_s11 + $0x7a] sm:$0xff]  ;;  %v5370_v18 = vld [vmem:[#allocation7 + $0x64] ss:$8 sps:$4 sm:$0xff]  }
  0xcb   : > { %1001 = vrot.lane.b32.xlu1 %v646_v29, %s5787_s24  ;;  %1731 = vmatpush1.bf16.msra.mxu0 %v5360_v55  ;;  %v785_v16 = vld [vmem:[%s6090_s11 + $0x73] sm:$0xff]  ;;  %v786_v17 = vld [vmem:[%s6090_s11 + $0x7b] sm:$0xff]  ;;  %v746_v19 = vpack.c.bf16 %v690_v14, %v689_v13  ;;  %v596_v21 = vld [vmem:[%s6090_s11 + $0x89] sm:$0xff] }
  0xcc   : > { %1732 = vmatprep.subr.bf16.mxu0 %v5361_v58  ;;  %v595_v20 = vld [vmem:[%s6090_s11 + $0x81] sm:$0xff]  ;;  %v842_v22 = vpack.c.bf16 %v786_v17, %v785_v16  ;;  %v692_v26 = vld [vmem:[%s6090_s11 + $0x8a] sm:$0xff]  ;;  %v5373_v27 = vld [vmem:[#allocation7 + $0x74] ss:$8 sps:$4 sm:$0xff]  }
  0xcd   : > { %v691_v23 = vld [vmem:[%s6090_s11 + $0x82] sm:$0xff]  ;;  %v868_v28 = vld [vmem:[%s6090_s11 + $0xc] sm:$0xff]  ;;  %v651_v30 = vpack.c.bf16 %v596_v21, %v595_v20  ;;  %v598_v36 = vld [vmem:[%s6090_s11 + $0x99] sm:$0xff] }
  0xce   : > { %1097 = vrot.lane.b32.xlu0 %v742_v34, %s5789_s14  ;;  %v5372_v24 = vld [vmem:[#allocation7 + $0x60] ss:$8 sps:$4 sm:$0xff]   ;;  %v747_v31 = vpack.c.bf16 %v692_v26, %v691_v23  ;;  %v5375_v34 = vld [vmem:[#allocation7 + $0x70] ss:$8 sps:$4 sm:$0xff]  }
  0xcf   : > { %1193 = vrot.lane.b32.xlu1 %v838_v37, %s5788_s25  ;;  %1733 = vmatpush1.bf16.msra.mxu0 %v5363_v0  ;;  %v867_v25 = vld [vmem:[%s6090_s11 + $0x4] sm:$0xff]  ;;  %v597_v35 = vld [vmem:[%s6090_s11 + $0x91] sm:$0xff]  ;;  %v694_v41 = vld [vmem:[%s6090_s11 + $0x9a] sm:$0xff] }
  0xd0   : > { %1734 = vmatprep.subr.bf16.mxu0 %v5364_v2  ;;  %v931_v29 = vpack.c.bf16 %v868_v28, %v867_v25  ;;  %v787_v32 = vld [vmem:[%s6090_s11 + $0x83] sm:$0xff]  ;;  %v788_v33 = vld [vmem:[%s6090_s11 + $0x8b] sm:$0xff]  ;;  %v652_v39 = vpack.c.bf16 %v598_v36, %v597_v35  ;;  %v790_v44 = vld [vmem:[%s6090_s11 + $0x9b] sm:$0xff] }
  0xd1   : > { %v5376_v37 = vld [vmem:[#allocation7 + $0x84] ss:$8 sps:$4 sm:$0xff]   ;;  %v843_v38 = vpack.c.bf16 %v788_v33, %v787_v32  ;;  %v693_v40 = vld [vmem:[%s6090_s11 + $0x92] sm:$0xff]  ;;  %v5378_v42 = vld [vmem:[#allocation7 + $0x80] ss:$8 sps:$4 sm:$0xff]  }
  0xd2   : > { %1003 = vrot.lane.b32.xlu0 %v647_v43, %s5787_s24  ;;  %4817 = vmatprep.mubr.msk.bf16.mxu0 %vm1251_vm0, %v931_v29  ;;  %v789_v43 = vld [vmem:[%s6090_s11 + $0x93] sm:$0xff]  ;;  %v748_v46 = vpack.c.bf16 %v694_v41, %v693_v40  ;;  %v599_v48 = vld [vmem:[%s6090_s11 + $0xa1] sm:$0xff]  ;;  %v600_v49 = vld [vmem:[%s6090_s11 + $0xa9] sm:$0xff] }
  0xd3   : > { %1099 = vrot.lane.b32.xlu1 %v743_v45, %s5789_s14  ;;  %1735 = vmatpush1.bf16.msra.mxu0 %v5366_v9  ;;  %v5379_v45 = vld [vmem:[#allocation7 + $0x94] ss:$8 sps:$4 sm:$0xff]   ;;  %v844_v47 = vpack.c.bf16 %v790_v44, %v789_v43  ;;  %v5381_v50 = vld [vmem:[#allocation7 + $0x90] ss:$8 sps:$4 sm:$0xff]   ;;  %v653_v53 = vpack.c.bf16 %v600_v49, %v599_v48  ;;  %v791_v55 = vld [vmem:[%s6090_s11 + $0xa3] sm:$0xff] }
  0xd4   : > { %1736 = vmatprep.subr.bf16.mxu0 %v5367_v10  ;;  %v696_v52 = vld [vmem:[%s6090_s11 + $0xaa] sm:$0xff]  ;;  %v602_v58 = vld [vmem:[%s6090_s11 + $0xb9] sm:$0xff]  ;;  %v699_v5 = vld [vmem:[%s6090_s11 + $0xc2] sm:$0xff] }
  0xd5   : > { %v792_v56 = vld [vmem:[%s6090_s11 + $0xab] sm:$0xff]  ;;  %v793_v63 = vld [vmem:[%s6090_s11 + $0xb3] sm:$0xff]  ;;  %v794_v0 = vld [vmem:[%s6090_s11 + $0xbb] sm:$0xff] }
  0xd6   : > { %1195 = vrot.lane.b32.xlu0 %v839_v51, %s5788_s25  ;;  %v695_v51 = vld [vmem:[%s6090_s11 + $0xa2] sm:$0xff]  ;;  %v601_v57 = vld [vmem:[%s6090_s11 + $0xb1] sm:$0xff]  ;;  %v846_v2 = vpack.c.bf16 %v794_v0, %v793_v63  ;;  %v702_v16 = vld [vmem:[%s6090_s11 + $0xda] sm:$0xff] }
  0xd7   : > { %1005 = vrot.lane.b32.xlu1 %v648_v54, %s5787_s24  ;;  %1737 = vmatpush1.bf16.msra.mxu0 %v5369_v15  ;;  %v749_v54 = vpack.c.bf16 %v696_v52, %v695_v51  ;;  %v654_v60 = vpack.c.bf16 %v602_v58, %v601_v57  ;;  %v697_v61 = vld [vmem:[%s6090_s11 + $0xb2] sm:$0xff]  ;;  %v604_v4 = vld [vmem:[%s6090_s11 + $0xc9] sm:$0xff]  ;;  %v607_v21 = vld [vmem:[%s6090_s11 + $0xe1] sm:$0xff] }
  0xd8   : > { %1738 = vmatprep.subr.bf16.mxu0 %v5370_v18  ;;  %v795_v9 = vld [vmem:[%s6090_s11 + $0xc3] sm:$0xff]  ;;  %v796_v10 = vld [vmem:[%s6090_s11 + $0xcb] sm:$0xff]  ;;  %v797_v17 = vld [vmem:[%s6090_s11 + $0xd3] sm:$0xff] }
  0xd9   : > { %v847_v13 = vpack.c.bf16 %v796_v10, %v795_v9  ;;  %v701_v15 = vld [vmem:[%s6090_s11 + $0xd2] sm:$0xff]  ;;  %v798_v18 = vld [vmem:[%s6090_s11 + $0xdb] sm:$0xff]  ;;  %v612_v40 = vld [vmem:[%s6090_s11 + $0x109] sm:$0xff] }
  0xda   : > { %1101 = vrot.lane.b32.xlu0 %v744_v59, %s5789_s14  ;;  %v845_v59 = vpack.c.bf16 %v792_v56, %v791_v55  ;;  %v848_v20 = vpack.c.bf16 %v798_v18, %v797_v17  ;;  %v703_v23 = vld [vmem:[%s6090_s11 + $0xe2] sm:$0xff]  ;;  %v800_v28 = vld [vmem:[%s6090_s11 + $0xeb] sm:$0xff]  ;;  %v706_v32 = vld [vmem:[%s6090_s11 + $0xfa] sm:$0xff] }
  0xdb   : > { %1197 = vrot.lane.b32.xlu1 %v840_v62, %s5788_s25  ;;  %1739 = vmatpush1.bf16.msra.mxu0 %v5372_v24  ;;  %v698_v62 = vld [vmem:[%s6090_s11 + $0xba] sm:$0xff]  ;;  %v704_v24 = vld [vmem:[%s6090_s11 + $0xea] sm:$0xff]  ;;  %v707_v41 = vld [vmem:[%s6090_s11 + $0x102] sm:$0xff] }
  0xdc   : > { %1740 = vmatprep.subr.bf16.mxu0 %v5373_v27  ;;  %v750_v1 = vpack.c.bf16 %v698_v62, %v697_v61  ;;  %v753_v26 = vpack.c.bf16 %v704_v24, %v703_v23  ;;  %v799_v27 = vld [vmem:[%s6090_s11 + $0xe3] sm:$0xff]  ;;  %v609_v29 = vld [vmem:[%s6090_s11 + $0xf1] sm:$0xff]  ;;  %v802_v35 = vld [vmem:[%s6090_s11 + $0xfb] sm:$0xff] }
  0xdd   : > { %v849_v33 = vpack.c.bf16 %v800_v28, %v799_v27  ;;  %v803_v43 = vld [vmem:[%s6090_s11 + $0x103] sm:$0xff]  ;;  %v804_v44 = vld [vmem:[%s6090_s11 + $0x10b] sm:$0xff]  ;;  %v710_v52 = vld [vmem:[%s6090_s11 + $0x11a] sm:$0xff] }
  0xde   : > { %1007 = vrot.lane.b32.xlu0 %v649_v3, %s5787_s24  ;;  %v603_v3 = vld [vmem:[%s6090_s11 + $0xc1] sm:$0xff]  ;;  %v851_v49 = vpack.c.bf16 %v804_v44, %v803_v43  ;;  %v709_v51 = vld [vmem:[%s6090_s11 + $0x112] sm:$0xff]  ;;  %v616_v56 = vld [vmem:[%s6090_s11 + $0x129] sm:$0xff] }
  0xdf   : > { %1103 = vrot.lane.b32.xlu1 %v745_v6, %s5789_s14  ;;  %1741 = vmatpush1.bf16.msra.mxu0 %v5375_v34  ;;  %v700_v6 = vld [vmem:[%s6090_s11 + $0xca] sm:$0xff]  ;;  %v655_v7 = vpack.c.bf16 %v604_v4, %v603_v3  ;;  %v801_v34 = vld [vmem:[%s6090_s11 + $0xf3] sm:$0xff]  ;;  %v615_v55 = vld [vmem:[%s6090_s11 + $0x121] sm:$0xff]  ;;  %v756_v57 = vpack.c.bf16 %v710_v52, %v709_v51 }
  0xe0   : > { %1742 = vmatprep.subr.bf16.mxu0 %v5376_v37  ;;  %v751_v8 = vpack.c.bf16 %v700_v6, %v699_v5  ;;  %v711_v58 = vld [vmem:[%s6090_s11 + $0x122] sm:$0xff]  ;;  %v661_v61 = vpack.c.bf16 %v616_v56, %v615_v55  ;;  %v808_v0 = vld [vmem:[%s6090_s11 + $0x12b] sm:$0xff]  ;;  %v714_v4 = vld [vmem:[%s6090_s11 + $0x13a] sm:$0xff] }
  0xe1   : > { %v807_v63 = vld [vmem:[%s6090_s11 + $0x123] sm:$0xff]  ;;  %v713_v3 = vld [vmem:[%s6090_s11 + $0x132] sm:$0xff]  ;;  %v718_v44 = vld [vmem:[%s6090_s11 + $0x15a] sm:$0xff] }
  0xe2   : > { %1199 = vrot.lane.b32.xlu0 %v841_v11, %s5788_s25  ;;  %v605_v11 = vld [vmem:[%s6090_s11 + $0xd1] sm:$0xff]  ;;  %v853_v5 = vpack.c.bf16 %v808_v0, %v807_v63  ;;  %v483_v9 = vld [vmem:[%s6090_s11] sm:$0xff]  ;;  %v484_v10 = vld [vmem:[%s6090_s11 + $0x8] sm:$0xff] }
  0xe3   : > { %1009 = vrot.lane.b32.xlu1 %v650_v12, %s5787_s24  ;;  %1743 = vmatpush1.bf16.msra.mxu0 %v5378_v42  ;;  %v606_v12 = vld [vmem:[%s6090_s11 + $0xd9] sm:$0xff]  ;;  %v708_v42 = vld [vmem:[%s6090_s11 + $0x10a] sm:$0xff]  ;;  %v719_v52 = vld [vmem:[%s6090_s11 + $0x162] sm:$0xff] }
  0xe4   : > { %1744 = vmatprep.subr.bf16.mxu0 %v5379_v45  ;;  %v656_v14 = vpack.c.bf16 %v606_v12, %v605_v11  ;;  %v755_v48 = vpack.c.bf16 %v708_v42, %v707_v41  ;;  %v809_v6 = vld [vmem:[%s6090_s11 + $0x133] sm:$0xff]  ;;  %v758_v11 = vpack.c.bf16 %v714_v4, %v713_v3  ;;  %v620_v17 = vld [vmem:[%s6090_s11 + $0x149] sm:$0xff] }
  0xe5   : > { %v485_v12 = vld [vmem:[%s6090_s11 + $0x10] sm:$0xff]  ;;  %v811_v24 = vld [vmem:[%s6090_s11 + $0x143] sm:$0xff]  ;;  %v622_v28 = vld [vmem:[%s6090_s11 + $0x159] sm:$0xff] }
  0xe6   : > { %1105 = vrot.lane.b32.xlu0 %v746_v19, %s5789_s14  ;;  %v752_v19 = vpack.c.bf16 %v702_v16, %v701_v15  ;;  %v619_v16 = vld [vmem:[%s6090_s11 + $0x141] sm:$0xff]  ;;  %v621_v27 = vld [vmem:[%s6090_s11 + $0x151] sm:$0xff] }
  0xe7   : > { %1201 = vrot.lane.b32.xlu1 %v842_v22, %s5788_s25  ;;  %1745 = vmatpush1.bf16.msra.mxu0 %v5381_v50  ;;  %v608_v22 = vld [vmem:[%s6090_s11 + $0xe9] sm:$0xff]  ;;  %v664_v42 = vpack.c.bf16 %v622_v28, %v621_v27  ;;  %v717_v43 = vld [vmem:[%s6090_s11 + $0x152] sm:$0xff]  ;;  %v627_v28 = vld [vmem:[%s6090_s11 + $0x181] sm:$0xff] }
  0xe8   : > { %v657_v25 = vpack.c.bf16 %v608_v22, %v607_v21  ;;  %v715_v21 = vld [vmem:[%s6090_s11 + $0x142] sm:$0xff]  ;;  %v716_v22 = vld [vmem:[%s6090_s11 + $0x14a] sm:$0xff]  ;;  %v760_v51 = vpack.c.bf16 %v718_v44, %v717_v43  ;;  %v490_v0 = vld [vmem:[%s6090_s11 + $0x38] sm:$0xff] }
  0xe9   : > { %v872_v41 = vld [vmem:[%s6090_s11 + $0x2c] sm:$0xff]  ;;  %v815_v4 = vld [vmem:[%s6090_s11 + $0x163] sm:$0xff] }
  0xea   : > { %1011 = vrot.lane.b32.xlu0 %v651_v30, %s5787_s24  ;;  %v610_v30 = vld [vmem:[%s6090_s11 + $0xf9] sm:$0xff]  ;;  %v489_v63 = vld [vmem:[%s6090_s11 + $0x30] sm:$0xff] }
  0xeb   : > { %1107 = vrot.lane.b32.xlu1 %v747_v31, %s5789_s14  ;;  %v705_v31 = vld [vmem:[%s6090_s11 + $0xf2] sm:$0xff]  ;;  %v658_v36 = vpack.c.bf16 %v610_v30, %v609_v29  ;;  %v759_v29 = vpack.c.bf16 %v716_v22, %v715_v21 }
  0xec   : > { %v754_v37 = vpack.c.bf16 %v706_v32, %v705_v31 }
  0xee   : > { %1203 = vrot.lane.b32.xlu0 %v843_v38, %s5788_s25  ;;  %v850_v38 = vpack.c.bf16 %v802_v35, %v801_v34 }
  0xef   : > { %1013 = vrot.lane.b32.xlu1 %v652_v39, %s5787_s24  ;;  %v611_v39 = vld [vmem:[%s6090_s11 + $0x101] sm:$0xff] }
  0xf0   : > { %v659_v45 = vpack.c.bf16 %v612_v40, %v611_v39  ;;  %v488_v39 = vld [vmem:[%s6090_s11 + $0x28] sm:$0xff] }
  0xf1   : > { %v871_v40 = vld [vmem:[%s6090_s11 + $0x24] sm:$0xff] }
  0xf2   : > { %1109 = vrot.lane.b32.xlu0 %v748_v46, %s5789_s14  ;;  %v613_v46 = vld [vmem:[%s6090_s11 + $0x111] sm:$0xff] }
  0xf3   : > { %1205 = vrot.lane.b32.xlu1 %v844_v47, %s5788_s25  ;;  %v614_v47 = vld [vmem:[%s6090_s11 + $0x119] sm:$0xff] }
  0xf4   : > { %v660_v50 = vpack.c.bf16 %v614_v47, %v613_v46  ;;  %v813_v47 = vld [vmem:[%s6090_s11 + $0x153] sm:$0xff] }
  0xf6   : > { %1015 = vrot.lane.b32.xlu0 %v653_v53, %s5787_s24  ;;  %v805_v53 = vld [vmem:[%s6090_s11 + $0x113] sm:$0xff] }
  0xf7   : > { %1111 = vrot.lane.b32.xlu1 %v749_v54, %s5789_s14  ;;  %v806_v54 = vld [vmem:[%s6090_s11 + $0x11b] sm:$0xff] }
  0xfa   : > { %1207 = vrot.lane.b32.xlu0 %v845_v59, %s5788_s25  ;;  %v712_v59 = vld [vmem:[%s6090_s11 + $0x12a] sm:$0xff] }
  0xfb   : > { %1017 = vrot.lane.b32.xlu1 %v654_v60, %s5787_s24  ;;  %v852_v60 = vpack.c.bf16 %v806_v54, %v805_v53  ;;  %v757_v62 = vpack.c.bf16 %v712_v59, %v711_v58  ;;  %v720_v53 = vld [vmem:[%s6090_s11 + $0x16a] sm:$0xff]  ;;  %v933_v58 = vpack.c.bf16 %v872_v41, %v871_v40 }
  0xfc   : > { %v761_v3 = vpack.c.bf16 %v720_v53, %v719_v52  ;;  %v725_v52 = vld [vmem:[%s6090_s11 + $0x192] sm:$0xff]  ;;  %v726_v53 = vld [vmem:[%s6090_s11 + $0x19a] sm:$0xff] }
  0xfe   : > { %1113 = vrot.lane.b32.xlu0 %v750_v1, %s5789_s14  ;;  %v617_v1 = vld [vmem:[%s6090_s11 + $0x131] sm:$0xff] }
  0xff   : > { %1209 = vrot.lane.b32.xlu1 %v846_v2, %s5788_s25  ;;  %v618_v2 = vld [vmem:[%s6090_s11 + $0x139] sm:$0xff] }
 0x102   : > { %1019 = vrot.lane.b32.xlu0 %v655_v7, %s5787_s24  ;;  %v810_v7 = vld [vmem:[%s6090_s11 + $0x13b] sm:$0xff] }
 0x103   : > { %1115 = vrot.lane.b32.xlu1 %v751_v8, %s5789_s14  ;;  %v662_v8 = vpack.c.bf16 %v618_v2, %v617_v1  ;;  %v854_v15 = vpack.c.bf16 %v810_v7, %v809_v6  ;;  %v873_v1 = vld [vmem:[%s6090_s11 + $0x34] sm:$0xff]  ;;  %v874_v2 = vld [vmem:[%s6090_s11 + $0x3c] sm:$0xff] }
 0x104   : > { %v625_v7 = vld [vmem:[%s6090_s11 + $0x171] sm:$0xff] }
 0x106   : > { %1211 = vrot.lane.b32.xlu0 %v847_v13, %s5788_s25  ;;  %v486_v13 = vld [vmem:[%s6090_s11 + $0x18] sm:$0xff] }
 0x107   : > { %1021 = vrot.lane.b32.xlu1 %v656_v14, %s5787_s24  ;;  %v869_v14 = vld [vmem:[%s6090_s11 + $0x14] sm:$0xff]  ;;  %v548_v32 = vpack.c.bf16 %v486_v13, %v485_v12 }
 0x108   : > { %v817_v12 = vld [vmem:[%s6090_s11 + $0x173] sm:$0xff]  ;;  %v818_v13 = vld [vmem:[%s6090_s11 + $0x17b] sm:$0xff] }
 0x109   : > { %v858_v27 = vpack.c.bf16 %v818_v13, %v817_v12  ;;  %v823_v12 = vld [vmem:[%s6090_s11 + $0x1a3] sm:$0xff]  ;;  %v824_v13 = vld [vmem:[%s6090_s11 + $0x1ab] sm:$0xff] }
 0x10a   : > { %1117 = vrot.lane.b32.xlu0 %v752_v19, %s5789_s14  ;;  %v547_v19 = vpack.c.bf16 %v484_v10, %v483_v9  ;;  %v721_v9 = vld [vmem:[%s6090_s11 + $0x172] sm:$0xff]  ;;  %v722_v10 = vld [vmem:[%s6090_s11 + $0x17a] sm:$0xff] }
 0x10b   : > { %1213 = vrot.lane.b32.xlu1 %v848_v20, %s5788_s25  ;;  %v870_v20 = vld [vmem:[%s6090_s11 + $0x1c] sm:$0xff]  ;;  %v762_v21 = vpack.c.bf16 %v722_v10, %v721_v9  ;;  %v879_v9 = vld [vmem:[%s6090_s11 + $0x64] sm:$0xff]  ;;  %v880_v10 = vld [vmem:[%s6090_s11 + $0x6c] sm:$0xff] }
 0x10e   : > { %1023 = vrot.lane.b32.xlu0 %v657_v25, %s5787_s24  ;;  %v812_v25 = vld [vmem:[%s6090_s11 + $0x14b] sm:$0xff] }
 0x10f   : > { %1119 = vrot.lane.b32.xlu1 %v753_v26, %s5789_s14  ;;  %v663_v26 = vpack.c.bf16 %v620_v17, %v619_v16  ;;  %v550_v17 = vpack.c.bf16 %v490_v0, %v489_v63 }
 0x112   : > { %1215 = vrot.lane.b32.xlu0 %v849_v33, %s5788_s25  ;;  %v932_v33 = vpack.c.bf16 %v870_v20, %v869_v14 }
 0x113   : > { %1025 = vrot.lane.b32.xlu1 %v658_v36, %s5787_s24 }
 0x116   : > { %1121 = vrot.lane.b32.xlu0 %v754_v37, %s5789_s14  ;;  %v855_v37 = vpack.c.bf16 %v812_v25, %v811_v24  ;;  %v492_v24 = vld [vmem:[%s6090_s11 + $0x48] sm:$0xff] }
 0x117   : > { %1217 = vrot.lane.b32.xlu1 %v850_v38, %s5788_s25  ;;  %v487_v38 = vld [vmem:[%s6090_s11 + $0x20] sm:$0xff] }
 0x118   : > { %v875_v25 = vld [vmem:[%s6090_s11 + $0x44] sm:$0xff] }
 0x11a   : > { %1027 = vrot.lane.b32.xlu0 %v659_v45, %s5787_s24 }
 0x11b   : > { %1123 = vrot.lane.b32.xlu1 %v755_v48, %s5789_s14  ;;  %v814_v48 = vld [vmem:[%s6090_s11 + $0x15b] sm:$0xff] }
 0x11c   : > { %v856_v56 = vpack.c.bf16 %v814_v48, %v813_v47  ;;  %v493_v47 = vld [vmem:[%s6090_s11 + $0x50] sm:$0xff]  ;;  %v494_v48 = vld [vmem:[%s6090_s11 + $0x58] sm:$0xff] }
 0x11e   : > { %1219 = vrot.lane.b32.xlu0 %v851_v49, %s5788_s25  ;;  %v623_v49 = vld [vmem:[%s6090_s11 + $0x161] sm:$0xff] }
 0x11f   : > { %1029 = vrot.lane.b32.xlu1 %v660_v50, %s5787_s24  ;;  %v624_v50 = vld [vmem:[%s6090_s11 + $0x169] sm:$0xff] }
 0x122   : > { %1125 = vrot.lane.b32.xlu0 %v756_v57, %s5789_s14  ;;  %v549_v57 = vpack.c.bf16 %v488_v39, %v487_v38 }
 0x123   : > { %1221 = vrot.lane.b32.xlu1 %v852_v60, %s5788_s25 }
 0x126   : > { %1031 = vrot.lane.b32.xlu0 %v661_v61, %s5787_s24  ;;  %v665_v61 = vpack.c.bf16 %v624_v50, %v623_v49  ;;  %v877_v49 = vld [vmem:[%s6090_s11 + $0x54] sm:$0xff]  ;;  %v878_v50 = vld [vmem:[%s6090_s11 + $0x5c] sm:$0xff] }
 0x127   : > { %1127 = vrot.lane.b32.xlu1 %v757_v62, %s5789_s14 }
 0x12a   : > { %1223 = vrot.lane.b32.xlu0 %v853_v5, %s5788_s25  ;;  %v816_v5 = vld [vmem:[%s6090_s11 + $0x16b] sm:$0xff] }
 0x12b   : > { %1033 = vrot.lane.b32.xlu1 %v662_v8, %s5787_s24  ;;  %v626_v8 = vld [vmem:[%s6090_s11 + $0x179] sm:$0xff] }
 0x12c   : > { %v996_v18 = vpop.permute.xlu0 %995  ;;  %v666_v16 = vpack.c.bf16 %v626_v8, %v625_v7  ;;  %v495_v7 = vld [vmem:[%s6090_s11 + $0x60] sm:$0xff]  ;;  %v496_v8 = vld [vmem:[%s6090_s11 + $0x68] sm:$0xff] }
 0x12d   : > { %v1188_v23 = vpop.permute.xlu1 %1187  ;;  %v1254_v30 = vsel %vm1251_vm0, %v547_v19, %v996_v18  ;;  %v934_v18 = vpack.c.bf16 %v874_v2, %v873_v1  ;;  %v552_v1 = vpack.c.bf16 %v494_v48, %v493_v47  ;;  %v936_v2 = vpack.c.bf16 %v878_v50, %v877_v49 }
 0x12e   : > { %1129 = vrot.lane.b32.xlu0 %v758_v11, %s5789_s14  ;;  %v857_v11 = vpack.c.bf16 %v816_v5, %v815_v4 }
 0x12f   : > { %1225 = vrot.lane.b32.xlu1 %v854_v15, %s5788_s25 }
 0x130   : > { %v1092_v31 = vpop.permute.xlu0 %1091 }
 0x131   : > { %v1350_v34 = vsel %vm1348_vm1, %v1254_v30, %v1092_v31  ;;  %v998_v35 = vpop.permute.xlu1 %997  ;;  %v723_v31 = vld [vmem:[%s6090_s11 + $0x182] sm:$0xff] }
 0x132   : > { %v1415_v36 = vsel %vm1413_vm2, %v1350_v34, %v1188_v23  ;;  %1035 = vrot.lane.b32.xlu0 %v663_v26, %s5787_s24  ;;  %v1257_v45 = vsel %vm1251_vm0, %v548_v32, %v998_v35  ;;  %v491_v23 = vld [vmem:[%s6090_s11 + $0x40] sm:$0xff]  ;;  %v876_v26 = vld [vmem:[%s6090_s11 + $0x4c] sm:$0xff] }
 0x133   : > { %1759 = vmatmul.mubr.bf16.vlgmr.msra.gmra.mrb[0].mxu0 %v1415_v36  ;;  %1131 = vrot.lane.b32.xlu1 %v759_v29, %s5789_s14  ;;  %v628_v29 = vld [vmem:[%s6090_s11 + $0x189] sm:$0xff]  ;;  %v629_v36 = vld [vmem:[%s6090_s11 + $0x191] sm:$0xff]  ;;  %v551_v41 = vpack.c.bf16 %v492_v24, %v491_v23 }
 0x134   : > { %v1094_v46 = vpop.permute.xlu0 %1093  ;;  %4818 = vmatprep.mubr.msk.bf16.mxu0 %vm1251_vm0, %v932_v33  ;;  %v724_v32 = vld [vmem:[%s6090_s11 + $0x18a] sm:$0xff]  ;;  %v667_v35 = vpack.c.bf16 %v628_v29, %v627_v28 }
 0x135   : > { %v1352_v54 = vsel %vm1348_vm1, %v1257_v45, %v1094_v46  ;;  %v1190_v55 = vpop.permute.xlu1 %1189  ;;  %v819_v33 = vld [vmem:[%s6090_s11 + $0x183] sm:$0xff]  ;;  %v820_v34 = vld [vmem:[%s6090_s11 + $0x18b] sm:$0xff]  ;;  %v763_v40 = vpack.c.bf16 %v724_v32, %v723_v31  ;;  %v498_v32 = vld [vmem:[%s6090_s11 + $0x78] sm:$0xff] }
 0x136   : > { %1227 = vrot.lane.b32.xlu0 %v855_v37, %s5788_s25  ;;  %v1418_v60 = vsel %vm1413_vm2, %v1352_v54, %v1190_v55  ;;  %v630_v37 = vld [vmem:[%s6090_s11 + $0x199] sm:$0xff]  ;;  %v859_v45 = vpack.c.bf16 %v820_v34, %v819_v33  ;;  %v497_v31 = vld [vmem:[%s6090_s11 + $0x70] sm:$0xff] }
 0x137   : > { %1037 = vrot.lane.b32.xlu1 %v664_v42, %s5787_s24  ;;  %v935_v42 = vpack.c.bf16 %v876_v26, %v875_v25  ;;  %v821_v55 = vld [vmem:[%s6090_s11 + $0x193] sm:$0xff]  ;;  %v553_v25 = vpack.c.bf16 %v496_v8, %v495_v7  ;;  %v937_v26 = vpack.c.bf16 %v880_v10, %v879_v9  ;;  %v882_v34 = vld [vmem:[%s6090_s11 + $0x7c] sm:$0xff]  ;;  %v554_v49 = vpack.c.bf16 %v498_v32, %v497_v31  ;;  %v736_v10 = vld [vmem:[%s6090_s11 + $0x1ea] sm:$0xff] }
 0x138   : > { %v1000_v59 = vpop.permute.xlu0 %999  ;;  %v881_v33 = vld [vmem:[%s6090_s11 + $0x74] sm:$0xff]  ;;  %v735_v9 = vld [vmem:[%s6090_s11 + $0x1e2] sm:$0xff] }
 0x139   : > { %v1096_v62 = vpop.permute.xlu1 %1095  ;;  %v1260_v6 = vsel %vm1251_vm0, %v549_v57, %v1000_v59  ;;  %v631_v57 = vld [vmem:[%s6090_s11 + $0x1a1] sm:$0xff]  ;;  %v764_v59 = vpack.c.bf16 %v726_v53, %v725_v52  ;;  %v938_v50 = vpack.c.bf16 %v882_v34, %v881_v33  ;;  %v833_v33 = vld [vmem:[%s6090_s11 + $0x1f3] sm:$0xff]  ;;  %v834_v34 = vld [vmem:[%s6090_s11 + $0x1fb] sm:$0xf] }
 0x13a   : > { %1133 = vrot.lane.b32.xlu0 %v760_v51, %s5789_s14  ;;  %v1354_v14 = vsel %vm1348_vm1, %v1260_v6, %v1096_v62  ;;  %v668_v51 = vpack.c.bf16 %v630_v37, %v629_v36  ;;  %v635_v36 = vld [vmem:[%s6090_s11 + $0x1c1] sm:$0xff]  ;;  %v636_v37 = vld [vmem:[%s6090_s11 + $0x1c9] sm:$0xff] }
 0x13b   : > { %1769 = vmatmul.mubr.bf16.gmra.mrb[4].mxu0 %v1418_v60  ;;  %1229 = vrot.lane.b32.xlu1 %v856_v56, %s5788_s25  ;;  %v822_v56 = vld [vmem:[%s6090_s11 + $0x19b] sm:$0xff] }
 0x13c   : > { %4819 = vmatprep.mubr.msk.bf16.mxu0 %vm1251_vm0, %v933_v58  ;;  %v1192_v15 = vpop.permute.xlu0 %1191  ;;  %v632_v58 = vld [vmem:[%s6090_s11 + $0x1a9] sm:$0xff]  ;;  %v860_v0 = vpack.c.bf16 %v822_v56, %v821_v55  ;;  %v499_v55 = vld [vmem:[%s6090_s11 + $0x80] sm:$0xff] }
 0x13d   : > { %v1002_v19 = vpop.permute.xlu1 %1001  ;;  %v1421_v20 = vsel %vm1413_vm2, %v1354_v14, %v1192_v15  ;;  %v727_v60 = vld [vmem:[%s6090_s11 + $0x1a2] sm:$0xff]  ;;  %v669_v5 = vpack.c.bf16 %v632_v58, %v631_v57  ;;  %v633_v15 = vld [vmem:[%s6090_s11 + $0x1b1] sm:$0xff]  ;;  %v734_v58 = vld [vmem:[%s6090_s11 + $0x1da] sm:$0xff] }
 0x13e   : > { %1039 = vrot.lane.b32.xlu0 %v665_v61, %s5787_s24  ;;  %v1263_v30 = vsel %vm1251_vm0, %v550_v17, %v1002_v19  ;;  %v728_v61 = vld [vmem:[%s6090_s11 + $0x1aa] sm:$0xff]  ;;  %v729_v17 = vld [vmem:[%s6090_s11 + $0x1b2] sm:$0xff]  ;;  %v861_v19 = vpack.c.bf16 %v824_v13, %v823_v12 }
 0x13f   : > { %1135 = vrot.lane.b32.xlu1 %v761_v3, %s5789_s14  ;;  %v733_v57 = vld [vmem:[%s6090_s11 + $0x1d2] sm:$0xff] }
 0x140   : > { %v1098_v22 = vpop.permute.xlu0 %1097 }
 0x141   : > { %v1356_v38 = vsel %vm1348_vm1, %v1263_v30, %v1098_v22  ;;  %v1194_v39 = vpop.permute.xlu1 %1193 }
 0x142   : > { %1231 = vrot.lane.b32.xlu0 %v857_v11, %s5788_s25  ;;  %v1424_v44 = vsel %vm1413_vm2, %v1356_v38, %v1194_v39  ;;  %v765_v11 = vpack.c.bf16 %v728_v61, %v727_v60  ;;  %v731_v39 = vld [vmem:[%s6090_s11 + $0x1c2] sm:$0xff]  ;;  %v829_v60 = vld [vmem:[%s6090_s11 + $0x1d3] sm:$0xff] }
 0x143   : > { %1779 = vmatmul.mubr.bf16.gmra.mrb[8].mxu0 %v1421_v20  ;;  %1041 = vrot.lane.b32.xlu1 %v666_v16, %s5787_s24  ;;  %v634_v16 = vld [vmem:[%s6090_s11 + $0x1b9] sm:$0xff] }
 0x144   : > { %4820 = vmatprep.mubr.msk.bf16.mxu0 %vm1251_vm0, %v934_v18  ;;  %v1004_v43 = vpop.permute.xlu0 %1003  ;;  %v730_v18 = vld [vmem:[%s6090_s11 + $0x1ba] sm:$0xff]  ;;  %v670_v24 = vpack.c.bf16 %v634_v16, %v633_v15  ;;  %v769_v15 = vpack.c.bf16 %v736_v10, %v735_v9  ;;  %v831_v16 = vld [vmem:[%s6090_s11 + $0x1e3] sm:$0xff] }
 0x145   : > { %v1100_v46 = vpop.permute.xlu1 %1099  ;;  %v1266_v54 = vsel %vm1251_vm0, %v551_v41, %v1004_v43  ;;  %v825_v20 = vld [vmem:[%s6090_s11 + $0x1b3] sm:$0xff]  ;;  %v766_v29 = vpack.c.bf16 %v730_v18, %v729_v17  ;;  %v827_v41 = vld [vmem:[%s6090_s11 + $0x1c3] sm:$0xff]  ;;  %v671_v43 = vpack.c.bf16 %v636_v37, %v635_v36  ;;  %v830_v61 = vld [vmem:[%s6090_s11 + $0x1db] sm:$0xff] }
 0x146   : > { %1137 = vrot.lane.b32.xlu0 %v762_v21, %s5789_s14  ;;  %v1358_v62 = vsel %vm1348_vm1, %v1266_v54, %v1100_v46  ;;  %v826_v21 = vld [vmem:[%s6090_s11 + $0x1bb] sm:$0xff]  ;;  %v832_v17 = vld [vmem:[%s6090_s11 + $0x1eb] sm:$0xff] }
 0x147   : > { %1233 = vrot.lane.b32.xlu1 %v858_v27, %s5788_s25  ;;  %v5396_v9 = vld [vmem:[#allocation9 + $0x40] ss:$8 sps:$4 sm:$0xff]  }
 0x148   : > { %v1196_v63 = vpop.permute.xlu0 %1195 }
 0x149   : > { %v1006_v3 = vpop.permute.xlu1 %1005  ;;  %v1427_v4 = vsel %vm1413_vm2, %v1358_v62, %v1196_v63  ;;  %v500_v62 = vld [vmem:[%s6090_s11 + $0x88] sm:$0xff] }
 0x14a   : > { %1043 = vrot.lane.b32.xlu0 %v667_v35, %s5787_s24  ;;  %v1269_v14 = vsel %vm1251_vm0, %v552_v1, %v1006_v3  ;;  %v862_v35 = vpack.c.bf16 %v826_v21, %v825_v20  ;;  %v883_v63 = vld [vmem:[%s6090_s11 + $0x84] sm:$0xff]  ;;  %v768_v1 = vpack.c.bf16 %v734_v58, %v733_v57  ;;  %v555_v7 = vpack.c.bf16 %v500_v62, %v499_v55  ;;  %v641_v20 = vld [vmem:[%s6090_s11 + $0x1f1] sm:$0xff]  ;;  %v642_v21 = vld [vmem:[%s6090_s11 + $0x1f9] sm:$0xf] }
 0x14b   : > { %1789 = vmatmul.mubr.bf16.gmra.mrb[12].mxu0 %v1424_v44  ;;  %1139 = vrot.lane.b32.xlu1 %v763_v40, %s5789_s14  ;;  %v732_v40 = vld [vmem:[%s6090_s11 + $0x1ca] sm:$0xff]  ;;  %v5391_v58 = vld [vmem:[#allocation9 + $0x34] ss:$8 sps:$4 sm:$0xff]  }
 0x14c   : > { %4821 = vmatprep.mubr.msk.bf16.mxu0 %vm1251_vm0, %v935_v42  ;;  %v1102_v6 = vpop.permute.xlu0 %1101  ;;  %v828_v42 = vld [vmem:[%s6090_s11 + $0x1cb] sm:$0xff]  ;;  %v767_v48 = vpack.c.bf16 %v732_v40, %v731_v39  ;;  %v866_v39 = vpack.c.bf16 %v834_v34, %v833_v33  ;;  %v889_v62 = vld [vmem:[%s6090_s11 + $0xb4] sm:$0xff] }
 0x14d   : > { %v1360_v22 = vsel %vm1348_vm1, %v1269_v14, %v1102_v6  ;;  %v1198_v23 = vpop.permute.xlu1 %1197  ;;  %v637_v44 = vld [vmem:[%s6090_s11 + $0x1d1] sm:$0xff]  ;;  %v863_v53 = vpack.c.bf16 %v828_v42, %v827_v41  ;;  %v640_v6 = vld [vmem:[%s6090_s11 + $0x1e9] sm:$0xff] }
 0x14e   : > { %1235 = vrot.lane.b32.xlu0 %v859_v45, %s5788_s25  ;;  %v1430_v28 = vsel %vm1413_vm2, %v1360_v22, %v1198_v23  ;;  %v638_v45 = vld [vmem:[%s6090_s11 + $0x1d9] sm:$0xff]  ;;  %v5382_v40 = vld [vmem:[#allocation9 + $0x4] ss:$8 sps:$4 sm:$0xff]  }
 0x14f   : > { %1045 = vrot.lane.b32.xlu1 %v668_v51, %s5787_s24  ;;  %v672_v56 = vpack.c.bf16 %v638_v45, %v637_v44  ;;  %v502_v22 = vld [vmem:[%s6090_s11 + $0x98] sm:$0xff]  ;;  %v5384_v41 = vld [vmem:[#allocation9] ss:$8 sps:$4 sm:$0xff]   ;;  %3189 = vmatprep.subr.bf16.mxu1 %v5382_v40  ;;  %v5406_v40 = vld [vmem:[#allocation9 + $0x84] ss:$8 sps:$4 sm:$0xff]  }
 0x150   : > { %v1008_v27 = vpop.permute.xlu0 %1007  ;;  %v885_v23 = vld [vmem:[%s6090_s11 + $0x94] sm:$0xff]  ;;  %v503_v44 = vld [vmem:[%s6090_s11 + $0xa0] sm:$0xff]  ;;  %v504_v45 = vld [vmem:[%s6090_s11 + $0xa8] sm:$0xff]  ;;  %3190 = vmatpush1.bf16.msra.mxu1 %v5384_v41 }
 0x151   : > { %v1104_v30 = vpop.permute.xlu1 %1103  ;;  %v1272_v38 = vsel %vm1251_vm0, %v553_v25, %v1008_v27  ;;  %v865_v25 = vpack.c.bf16 %v832_v17, %v831_v16  ;;  %v5385_v42 = vld [vmem:[#allocation9 + $0x14] ss:$8 sps:$4 sm:$0xff]   ;;  %v5390_v57 = vld [vmem:[#allocation9 + $0x20] ss:$8 sps:$4 sm:$0xff]  }
 0x152   : > { %1141 = vrot.lane.b32.xlu0 %v764_v59, %s5789_s14  ;;  %v1362_v46 = vsel %vm1348_vm1, %v1272_v38, %v1104_v30  ;;  %v738_v30 = vld [vmem:[%s6090_s11 + $0x1fa] sm:$0xf]  ;;  %3191 = vmatprep.subr.bf16.mxu1 %v5385_v42  ;;  %v511_v42 = vld [vmem:[%s6090_s11 + $0xe0] sm:$0xff] }
 0x153   : > { %1799 = vmatmul.mubr.bf16.gmra.mrb[16].mxu0 %v1427_v4  ;;  %1237 = vrot.lane.b32.xlu1 %v860_v0, %s5788_s25  ;;  %v884_v0 = vld [vmem:[%s6090_s11 + $0x8c] sm:$0xff]  ;;  %v864_v4 = vpack.c.bf16 %v830_v61, %v829_v60  ;;  %v506_v61 = vld [vmem:[%s6090_s11 + $0xb8] sm:$0xff] }
 0x154   : > { %4822 = vmatprep.mubr.msk.bf16.mxu0 %vm1251_vm0, %v936_v2  ;;  %v1200_v47 = vpop.permute.xlu0 %1199  ;;  %v939_v8 = vpack.c.bf16 %v884_v0, %v883_v63  ;;  %v505_v60 = vld [vmem:[%s6090_s11 + $0xb0] sm:$0xff]  ;;  %v890_v63 = vld [vmem:[%s6090_s11 + $0xbc] sm:$0xff] }
 0x155   : > { %v1010_v51 = vpop.permute.xlu1 %1009  ;;  %v1433_v52 = vsel %vm1413_vm2, %v1362_v46, %v1200_v47  ;;  %v887_v46 = vld [vmem:[%s6090_s11 + $0xa4] sm:$0xff]  ;;  %v888_v47 = vld [vmem:[%s6090_s11 + $0xac] sm:$0xff]  ;;  %v5397_v17 = vld [vmem:[#allocation9 + $0x54] ss:$8 sps:$4 sm:$0xff]  }
 0x156   : > { %1047 = vrot.lane.b32.xlu0 %v669_v5, %s5787_s24  ;;  %v1275_v59 = vsel %vm1251_vm0, %v554_v49, %v1010_v51  ;;  %v639_v5 = vld [vmem:[%s6090_s11 + $0x1e1] sm:$0xff]  ;;  %v557_v51 = vpack.c.bf16 %v504_v45, %v503_v44  ;;  %v5393_v0 = vld [vmem:[#allocation9 + $0x30] ss:$8 sps:$4 sm:$0xff]   ;;  %v5403_v33 = vld [vmem:[#allocation9 + $0x74] ss:$8 sps:$4 sm:$0xff]  }
 0x157   : > { %1143 = vrot.lane.b32.xlu1 %v765_v11, %s5789_s14  ;;  %v673_v13 = vpack.c.bf16 %v640_v6, %v639_v5  ;;  %v512_v44 = vld [vmem:[%s6090_s11 + $0xe8] sm:$0xff] }
 0x158   : > { %v1106_v54 = vpop.permute.xlu0 %1105  ;;  %v895_v45 = vld [vmem:[%s6090_s11 + $0xe4] sm:$0xff] }
 0x159   : > { %v1364_v2 = vsel %vm1348_vm1, %v1275_v59, %v1106_v54  ;;  %v1202_v3 = vpop.permute.xlu1 %1201 }
 0x15a   : > { %1239 = vrot.lane.b32.xlu0 %v861_v19, %s5788_s25  ;;  %v1436_v12 = vsel %vm1413_vm2, %v1364_v2, %v1202_v3  ;;  %v501_v19 = vld [vmem:[%s6090_s11 + $0x90] sm:$0xff]  ;;  %v558_v3 = vpack.c.bf16 %v506_v61, %v505_v60  ;;  %v514_v60 = vld [vmem:[%s6090_s11 + $0xf8] sm:$0xff] }
 0x15b   : > { %1809 = vmatmul.mubr.bf16.gmra.mrb[20].mxu0 %v1430_v28  ;;  %1049 = vrot.lane.b32.xlu1 %v670_v24, %s5787_s24  ;;  %v886_v24 = vld [vmem:[%s6090_s11 + $0x9c] sm:$0xff]  ;;  %v674_v28 = vpack.c.bf16 %v642_v21, %v641_v20  ;;  %v556_v31 = vpack.c.bf16 %v502_v22, %v501_v19  ;;  %v5399_v20 = vld [vmem:[#allocation9 + $0x50] ss:$8 sps:$4 sm:$0xff]  }
 0x15c   : > { %4823 = vmatprep.mubr.msk.bf16.mxu0 %vm1251_vm0, %v937_v26  ;;  %v1012_v11 = vpop.permute.xlu0 %1011  ;;  %v940_v32 = vpack.c.bf16 %v886_v24, %v885_v23  ;;  %v5400_v24 = vld [vmem:[#allocation9 + $0x64] ss:$8 sps:$4 sm:$0xff]   ;;  %v897_v61 = vld [vmem:[%s6090_s11 + $0xf4] sm:$0xff] }
 0x15d   : > { %v1108_v14 = vpop.permute.xlu1 %1107  ;;  %v1278_v18 = vsel %vm1251_vm0, %v555_v7, %v1012_v11  ;;  %v507_v11 = vld [vmem:[%s6090_s11 + $0xc0] sm:$0xff] }
 0x15e   : > { %1145 = vrot.lane.b32.xlu0 %v766_v29, %s5789_s14  ;;  %v1366_v26 = vsel %vm1348_vm1, %v1278_v18, %v1108_v14  ;;  %v737_v29 = vld [vmem:[%s6090_s11 + $0x1f2] sm:$0xff] }
 0x15f   : > { %1241 = vrot.lane.b32.xlu1 %v862_v35, %s5788_s25  ;;  %v770_v37 = vpack.c.bf16 %v738_v30, %v737_v29  ;;  %v892_v14 = vld [vmem:[%s6090_s11 + $0xcc] sm:$0xff]  ;;  %v893_v29 = vld [vmem:[%s6090_s11 + $0xd4] sm:$0xff]  ;;  %v894_v30 = vld [vmem:[%s6090_s11 + $0xdc] sm:$0xff] }
 0x160   : > { %v1204_v27 = vpop.permute.xlu0 %1203 }
 0x161   : > { %v1014_v35 = vpop.permute.xlu1 %1013  ;;  %v1439_v36 = vsel %vm1413_vm2, %v1366_v26, %v1204_v27  ;;  %v509_v26 = vld [vmem:[%s6090_s11 + $0xd0] sm:$0xff]  ;;  %v5402_v27 = vld [vmem:[#allocation9 + $0x60] ss:$8 sps:$4 sm:$0xff]  }
 0x162   : > { %1051 = vrot.lane.b32.xlu0 %v671_v43, %s5787_s24  ;;  %v1281_v43 = vsel %vm1251_vm0, %v556_v31, %v1014_v35  ;;  %v944_v35 = vpack.c.bf16 %v894_v30, %v893_v29  ;;  %v901_v29 = vld [vmem:[%s6090_s11 + $0x114] sm:$0xff]  ;;  %v902_v30 = vld [vmem:[%s6090_s11 + $0x11c] sm:$0xff] }
 0x163   : > { %1819 = vmatmul.mubr.bf16.gmra.mrb[24].mxu0 %v1433_v52  ;;  %1147 = vrot.lane.b32.xlu1 %v767_v48, %s5789_s14  ;;  %v5387_v48 = vld [vmem:[#allocation9 + $0x10] ss:$8 sps:$4 sm:$0xff]   ;;  %v941_v52 = vpack.c.bf16 %v888_v47, %v887_v46 }
 0x164   : > { %4824 = vmatprep.mubr.msk.bf16.mxu0 %vm1251_vm0, %v938_v50  ;;  %v1110_v38 = vpop.permute.xlu0 %1109  ;;  %3192 = vmatpush1.bf16.msra.mxu1 %v5387_v48  ;;  %v896_v46 = vld [vmem:[%s6090_s11 + $0xec] sm:$0xff] }
 0x165   : > { %v1368_v49 = vsel %vm1348_vm1, %v1281_v43, %v1110_v38  ;;  %v1206_v50 = vpop.permute.xlu1 %1205  ;;  %v5408_v43 = vld [vmem:[#allocation9 + $0x80] ss:$8 sps:$4 sm:$0xff]  }
 0x166   : > { %1243 = vrot.lane.b32.xlu0 %v863_v53, %s5788_s25  ;;  %v1442_v54 = vsel %vm1413_vm2, %v1368_v49, %v1206_v50  ;;  %v5409_v49 = vld [vmem:[#allocation9 + $0x94] ss:$8 sps:$4 sm:$0xff]   ;;  %v561_v50 = vpack.c.bf16 %v512_v44, %v511_v42  ;;  %v520_v42 = vld [vmem:[%s6090_s11 + $0x128] sm:$0xff] }
 0x167   : > { %1053 = vrot.lane.b32.xlu1 %v672_v56, %s5787_s24  ;;  %v5388_v56 = vld [vmem:[#allocation9 + $0x24] ss:$8 sps:$4 sm:$0xff]  }
 0x168   : > { %v1016_v53 = vpop.permute.xlu0 %1015  ;;  %3193 = vmatprep.subr.bf16.mxu1 %v5388_v56  ;;  %v5412_v56 = vld [vmem:[#allocation9 + $0xa4] ss:$8 sps:$4 sm:$0xff]  }
 0x169   : > { %v1112_v55 = vpop.permute.xlu1 %1111  ;;  %v1284_v59 = vsel %vm1251_vm0, %v557_v51, %v1016_v53  ;;  %3194 = vmatpush1.bf16.msra.mxu1 %v5390_v57  ;;  %v945_v51 = vpack.c.bf16 %v896_v46, %v895_v45  ;;  %v904_v44 = vld [vmem:[%s6090_s11 + $0x12c] sm:$0xff] }
 0x16a   : > { %1149 = vrot.lane.b32.xlu0 %v768_v1, %s5789_s14  ;;  %v1370_v1 = vsel %vm1348_vm1, %v1284_v59, %v1112_v55  ;;  %3195 = vmatprep.subr.bf16.mxu1 %v5391_v58  ;;  %v513_v58 = vld [vmem:[%s6090_s11 + $0xf0] sm:$0xff]  ;;  %v5414_v59 = vld [vmem:[#allocation9 + $0xa0] ss:$8 sps:$4 sm:$0xff]  }
 0x16b   : > { %1829 = vmatmul.mubr.bf16.gmra.mrb[28].mxu0 %v1436_v12  ;;  %1245 = vrot.lane.b32.xlu1 %v864_v4, %s5788_s25  ;;  %v942_v4 = vpack.c.bf16 %v890_v63, %v889_v62  ;;  %v508_v12 = vld [vmem:[%s6090_s11 + $0xc8] sm:$0xff]  ;;  %v898_v62 = vld [vmem:[%s6090_s11 + $0xfc] sm:$0xff] }
 0x16c   : > { %4825 = vmatprep.mubr.msk.bf16.mxu0 %vm1251_vm0, %v939_v8  ;;  %v1208_v2 = vpop.permute.xlu0 %1207  ;;  %v5394_v8 = vld [vmem:[#allocation9 + $0x44] ss:$8 sps:$4 sm:$0xff]   ;;  %v559_v18 = vpack.c.bf16 %v508_v12, %v507_v11  ;;  %v5420_v11 = vld [vmem:[#allocation9 + $0xc0] ss:$8 sps:$4 sm:$0xff]  }
 0x16d   : > { %v1018_v5 = vpop.permute.xlu1 %1017  ;;  %v1445_v6 = vsel %vm1413_vm2, %v1370_v1, %v1208_v2  ;;  %3196 = vmatpush1.bf16.msra.mxu1 %v5393_v0  ;;  %v5415_v1 = vld [vmem:[#allocation9 + $0xb4] ss:$8 sps:$4 sm:$0xff]   ;;  %v562_v2 = vpack.c.bf16 %v514_v60, %v513_v58  ;;  %v516_v12 = vld [vmem:[%s6090_s11 + $0x108] sm:$0xff] }
 0x16e   : > { %1055 = vrot.lane.b32.xlu0 %v673_v13, %s5787_s24  ;;  %v1287_v10 = vsel %vm1251_vm0, %v558_v3, %v1018_v5  ;;  %v891_v13 = vld [vmem:[%s6090_s11 + $0xc4] sm:$0xff]  ;;  %3197 = vmatprep.subr.bf16.mxu1 %v5394_v8  ;;  %v946_v3 = vpack.c.bf16 %v898_v62, %v897_v61 }
 0x16f   : > { %1151 = vrot.lane.b32.xlu1 %v769_v15, %s5789_s14  ;;  %v943_v19 = vpack.c.bf16 %v892_v14, %v891_v13  ;;  %v5418_v8 = vld [vmem:[#allocation9 + $0xc4] ss:$8 sps:$4 sm:$0xff]  }
 0x170   : > { %v1114_v7 = vpop.permute.xlu0 %1113  ;;  %v899_v13 = vld [vmem:[%s6090_s11 + $0x104] sm:$0xff]  ;;  %v900_v14 = vld [vmem:[%s6090_s11 + $0x10c] sm:$0xff] }
 0x171   : > { %3198 = vmatpush1.bf16.msra.mxu1 %v5396_v9  ;;  %v1372_v15 = vsel %vm1348_vm1, %v1287_v10, %v1114_v7  ;;  %v1210_v16 = vpop.permute.xlu1 %1209  ;;  %v515_v10 = vld [vmem:[%s6090_s11 + $0x100] sm:$0xff] }
 0x172   : > { %1247 = vrot.lane.b32.xlu0 %v865_v25, %s5788_s25  ;;  %3199 = vmatprep.subr.bf16.mxu1 %v5397_v17  ;;  %v1448_v22 = vsel %vm1413_vm2, %v1372_v15, %v1210_v16  ;;  %v5421_v17 = vld [vmem:[#allocation9 + $0xd4] ss:$8 sps:$4 sm:$0xff]  }
 0x173   : > { %1839 = vmatmul.mubr.bf16.gmra.mrb[32].mxu0 %v1439_v36  ;;  %1057 = vrot.lane.b32.xlu1 %v674_v28, %s5787_s24  ;;  %v510_v28 = vld [vmem:[%s6090_s11 + $0xd8] sm:$0xff] }
 0x174   : > { %4826 = vmatprep.mubr.msk.bf16.mxu0 %vm1251_vm0, %v940_v32  ;;  %v1020_v21 = vpop.permute.xlu0 %1019  ;;  %v560_v34 = vpack.c.bf16 %v510_v28, %v509_v26  ;;  %v5405_v36 = vld [vmem:[#allocation9 + $0x70] ss:$8 sps:$4 sm:$0xff]  }
 0x175   : > { %3200 = vmatpush1.bf16.msra.mxu1 %v5399_v20  ;;  %v1116_v23 = vpop.permute.xlu1 %1115  ;;  %v1290_v25 = vsel %vm1251_vm0, %v559_v18, %v1020_v21  ;;  %v563_v18 = vpack.c.bf16 %v516_v12, %v515_v10  ;;  %v5423_v20 = vld [vmem:[#allocation9 + $0xd0] ss:$8 sps:$4 sm:$0xff]  }
 0x176   : > { %1153 = vrot.lane.b32.xlu0 %v770_v37, %s5789_s14  ;;  %3201 = vmatprep.subr.bf16.mxu1 %v5400_v24  ;;  %v1374_v31 = vsel %vm1348_vm1, %v1290_v25, %v1116_v23  ;;  %v5424_v24 = vld [vmem:[#allocation9 + $0xe4] ss:$8 sps:$4 sm:$0xff]   ;;  %v517_v26 = vld [vmem:[%s6090_s11 + $0x110] sm:$0xff]  ;;  %v518_v28 = vld [vmem:[%s6090_s11 + $0x118] sm:$0xff] }
 0x177   : > { %1249 = vrot.lane.b32.xlu1 %v866_v39, %s5788_s25  ;;  %s6910_s25 = sld [smem:[#allocation21_spill]] }
 0x178   : > { %v1212_v32 = vpop.permute.xlu0 %1211 }
 0x179   : > { %3202 = vmatpush1.bf16.msra.mxu1 %v5402_v27  ;;  %v1022_v37 = vpop.permute.xlu1 %1021  ;;  %v1451_v38 = vsel %vm1413_vm2, %v1374_v31, %v1212_v32  ;;  %v5426_v27 = vld [vmem:[#allocation9 + $0xe0] ss:$8 sps:$4 sm:$0xff]  }
 0x17a   : > { %3203 = vmatprep.subr.bf16.mxu1 %v5403_v33  ;;  %v1293_v41 = vsel %vm1251_vm0, %v560_v34, %v1022_v37  ;;  %v5427_v33 = vld [vmem:[#allocation9 + $0xf4] ss:$8 sps:$4 sm:$0xff]   ;;  %v564_v34 = vpack.c.bf16 %v518_v28, %v517_v26  ;;  %v528_v26 = vld [vmem:[%s6090_s11 + $0x168] sm:$0xff] }
 0x17b   : > { %1849 = vmatmul.mubr.bf16.gmra.mrb[36].mxu0 %v1442_v54  ;;  %v912_v28 = vld [vmem:[%s6090_s11 + $0x16c] sm:$0xff] }
 0x17c   : > { %4827 = vmatprep.mubr.msk.bf16.mxu0 %vm1251_vm0, %v941_v52  ;;  %v1118_v39 = vpop.permute.xlu0 %1117  ;;  %v5411_v52 = vld [vmem:[#allocation9 + $0x90] ss:$8 sps:$4 sm:$0xff]  }
 0x17d   : > { %3204 = vmatpush1.bf16.msra.mxu1 %v5405_v36  ;;  %v1376_v47 = vsel %vm1348_vm1, %v1293_v41, %v1118_v39  ;;  %v1214_v48 = vpop.permute.xlu1 %1213  ;;  %v5429_v36 = vld [vmem:[#allocation9 + $0xf0] ss:$8 sps:$4 sm:$0xff]   ;;  %v519_v41 = vld [vmem:[%s6090_s11 + $0x120] sm:$0xff] }
 0x17e   : > { %3205 = vmatprep.subr.bf16.mxu1 %v5406_v40  ;;  %v1454_v54 = vsel %vm1413_vm2, %v1376_v47, %v1214_v48  ;;  %v565_v47 = vpack.c.bf16 %v520_v42, %v519_v41 }
 0x180   : > { %v1024_v53 = vpop.permute.xlu0 %1023 }
 0x181   : > { %3206 = vmatpush1.bf16.msra.mxu1 %v5408_v43  ;;  %v1120_v55 = vpop.permute.xlu1 %1119  ;;  %v1296_v57 = vsel %vm1251_vm0, %v561_v50, %v1024_v53  ;;  %v903_v43 = vld [vmem:[%s6090_s11 + $0x124] sm:$0xff]  ;;  %v521_v53 = vld [vmem:[%s6090_s11 + $0x130] sm:$0xff] }
 0x182   : > { %3207 = vmatprep.subr.bf16.mxu1 %v5409_v49  ;;  %v1378_v63 = vsel %vm1348_vm1, %v1296_v57, %v1120_v55  ;;  %v949_v48 = vpack.c.bf16 %v904_v44, %v903_v43  ;;  %v905_v55 = vld [vmem:[%s6090_s11 + $0x134] sm:$0xff] }
 0x183   : > { %1859 = vmatmul.mubr.bf16.gmra.mrb[40].mxu0 %v1445_v6 }
 0x184   : > { %4828 = vmatprep.mubr.msk.bf16.mxu0 %vm1251_vm0, %v942_v4  ;;  %v1216_v0 = vpop.permute.xlu0 %1215  ;;  %v5417_v4 = vld [vmem:[#allocation9 + $0xb0] ss:$8 sps:$4 sm:$0xff]  }
 0x185   : > { %3208 = vmatpush1.bf16.msra.mxu1 %v5411_v52  ;;  %v1026_v5 = vpop.permute.xlu1 %1025  ;;  %v1457_v6 = vsel %vm1413_vm2, %v1378_v63, %v1216_v0 }
 0x186   : > { %3209 = vmatprep.subr.bf16.mxu1 %v5412_v56  ;;  %v1299_v9 = vsel %vm1251_vm0, %v562_v2, %v1026_v5  ;;  %v906_v56 = vld [vmem:[%s6090_s11 + $0x13c] sm:$0xff]  ;;  %v524_v2 = vld [vmem:[%s6090_s11 + $0x148] sm:$0xff] }
 0x187   : > { %v950_v60 = vpack.c.bf16 %v906_v56, %v905_v55 }
 0x188   : > { %v1122_v7 = vpop.permute.xlu0 %1121 }
 0x189   : > { %3210 = vmatpush1.bf16.msra.mxu1 %v5414_v59  ;;  %v1380_v15 = vsel %vm1348_vm1, %v1299_v9, %v1122_v7  ;;  %v1218_v16 = vpop.permute.xlu1 %1217 }
 0x18a   : > { %3211 = vmatprep.subr.bf16.mxu1 %v5415_v1  ;;  %v523_v1 = vld [vmem:[%s6090_s11 + $0x140] sm:$0xff] }
 0x18b   : > { %1869 = vmatmul.mubr.bf16.gmra.mrb[44].mxu0 %v1448_v22  ;;  %v1460_v22 = vsel %vm1413_vm2, %v1380_v15, %v1218_v16  ;;  %v567_v7 = vpack.c.bf16 %v524_v2, %v523_v1  ;;  %v909_v15 = vld [vmem:[%s6090_s11 + $0x154] sm:$0xff]  ;;  %v910_v16 = vld [vmem:[%s6090_s11 + $0x15c] sm:$0xff] }
 0x18c   : > { %4829 = vmatprep.mubr.msk.bf16.mxu0 %vm1251_vm0, %v943_v19  ;;  %v947_v19 = vpack.c.bf16 %v900_v14, %v899_v13  ;;  %v1028_v21 = vpop.permute.xlu0 %1027  ;;  %v525_v13 = vld [vmem:[%s6090_s11 + $0x150] sm:$0xff]  ;;  %v526_v14 = vld [vmem:[%s6090_s11 + $0x158] sm:$0xff] }
 0x18d   : > { %3212 = vmatpush1.bf16.msra.mxu1 %v5417_v4  ;;  %v1124_v23 = vpop.permute.xlu1 %1123  ;;  %v1302_v25 = vsel %vm1251_vm0, %v563_v18, %v1028_v21  ;;  %v908_v4 = vld [vmem:[%s6090_s11 + $0x14c] sm:$0xff] }
 0x18e   : > { %3213 = vmatprep.subr.bf16.mxu1 %v5418_v8  ;;  %v1382_v31 = vsel %vm1348_vm1, %v1302_v25, %v1124_v23  ;;  %v527_v25 = vld [vmem:[%s6090_s11 + $0x160] sm:$0xff] }
 0x190   : > { %v1220_v32 = vpop.permute.xlu0 %1219 }
 0x191   : > { %3214 = vmatpush1.bf16.msra.mxu1 %v5420_v11  ;;  %v1030_v37 = vpop.permute.xlu1 %1029 }
 0x192   : > { %3215 = vmatprep.subr.bf16.mxu1 %v5421_v17  ;;  %v1305_v40 = vsel %vm1251_vm0, %v564_v34, %v1030_v37  ;;  %v529_v37 = vld [vmem:[%s6090_s11 + $0x170] sm:$0xff] }
 0x193   : > { %1879 = vmatmul.mubr.bf16.gmra.mrb[48].mxu0 %v1451_v38  ;;  %v1463_v38 = vsel %vm1413_vm2, %v1382_v31, %v1220_v32  ;;  %v569_v31 = vpack.c.bf16 %v528_v26, %v527_v25 }
 0x194   : > { %4830 = vmatprep.mubr.msk.bf16.mxu0 %vm1251_vm0, %v944_v35  ;;  %v948_v35 = vpack.c.bf16 %v902_v30, %v901_v29  ;;  %v1126_v39 = vpop.permute.xlu0 %1125 }
 0x195   : > { %3216 = vmatpush1.bf16.msra.mxu1 %v5423_v20  ;;  %v1384_v45 = vsel %vm1348_vm1, %v1305_v40, %v1126_v39  ;;  %v1222_v46 = vpop.permute.xlu1 %1221  ;;  %v952_v20 = vpack.c.bf16 %v910_v16, %v909_v15  ;;  %v913_v39 = vld [vmem:[%s6090_s11 + $0x174] sm:$0xff]  ;;  %v914_v40 = vld [vmem:[%s6090_s11 + $0x17c] sm:$0xff] }
 0x196   : > { %3217 = vmatprep.subr.bf16.mxu1 %v5424_v24  ;;  %v1466_v50 = vsel %vm1413_vm2, %v1384_v45, %v1222_v46  ;;  %v954_v44 = vpack.c.bf16 %v914_v40, %v913_v39 }
 0x198   : > { %v1032_v49 = vpop.permute.xlu0 %1031 }
 0x199   : > { %3218 = vmatpush1.bf16.msra.mxu1 %v5426_v27  ;;  %v1308_v52 = vsel %vm1251_vm0, %v565_v47, %v1032_v49  ;;  %v911_v27 = vld [vmem:[%s6090_s11 + $0x164] sm:$0xff] }
 0x19a   : > { %3219 = vmatprep.subr.bf16.mxu1 %v5427_v33  ;;  %v953_v32 = vpack.c.bf16 %v912_v28, %v911_v27  ;;  %v531_v49 = vld [vmem:[%s6090_s11 + $0x180] sm:$0xff] }
 0x19b   : > { %1889 = vmatmul.mubr.bf16.gmra.mrb[52].mxu0 %v1454_v54  ;;  %v522_v54 = vld [vmem:[%s6090_s11 + $0x138] sm:$0xff] }
 0x19c   : > { %4831 = vmatprep.mubr.msk.bf16.mxu0 %vm1251_vm0, %v945_v51  ;;  %v1128_v51 = vpop.permute.xlu1 %1127  ;;  %v1224_v58 = vpop.permute.xlu0 %1223  ;;  %v566_v59 = vpack.c.bf16 %v522_v54, %v521_v53 }
 0x19d   : > { %3220 = vmatpush1.bf16.msra.mxu1 %v5429_v36  ;;  %v1386_v57 = vsel %vm1348_vm1, %v1308_v52, %v1128_v51  ;;  %v915_v51 = vld [vmem:[%s6090_s11 + $0x184] sm:$0xff]  ;;  %v916_v52 = vld [vmem:[%s6090_s11 + $0x18c] sm:$0xff] }
 0x19e   : > { %v1469_v62 = vsel %vm1413_vm2, %v1386_v57, %v1224_v58  ;;  %v955_v56 = vpack.c.bf16 %v916_v52, %v915_v51  ;;  %v541_v51 = vld [vmem:[%s6090_s11 + $0x1d0] sm:$0xff]  ;;  %v542_v52 = vld [vmem:[%s6090_s11 + $0x1d8] sm:$0xff] }
 0x1a0   : > { %v1034_v61 = vpop.permute.xlu1 %1033  ;;  %v1130_v63 = vpop.permute.xlu0 %1129 }
 0x1a1   : > { %v1311_v0 = vsel %vm1251_vm0, %v566_v59, %v1034_v61  ;;  %v533_v61 = vld [vmem:[%s6090_s11 + $0x190] sm:$0xff] }
 0x1a2   : > { %v1388_v5 = vsel %vm1348_vm1, %v1311_v0, %v1130_v63  ;;  %v917_v63 = vld [vmem:[%s6090_s11 + $0x194] sm:$0xff]  ;;  %v918_v0 = vld [vmem:[%s6090_s11 + $0x19c] sm:$0xff] }
 0x1a3   : > { %1899 = vmatmul.mubr.bf16.gmra.mrb[56].mxu0 %v1457_v6 }
 0x1a4   : > { %4832 = vmatprep.mubr.msk.bf16.mxu0 %vm1251_vm0, %v946_v3  ;;  %v907_v3 = vld [vmem:[%s6090_s11 + $0x144] sm:$0xff]  ;;  %v1226_v6 = vpop.permute.xlu1 %1225  ;;  %v1036_v9 = vpop.permute.xlu0 %1035 }
 0x1a5   : > { %v951_v8 = vpack.c.bf16 %v908_v4, %v907_v3  ;;  %v1472_v10 = vsel %vm1413_vm2, %v1388_v5, %v1226_v6  ;;  %v1314_v12 = vsel %vm1251_vm0, %v567_v7, %v1036_v9  ;;  %v956_v4 = vpack.c.bf16 %v918_v0, %v917_v63  ;;  %v535_v9 = vld [vmem:[%s6090_s11 + $0x1a0] sm:$0xff] }
 0x1a8   : > { %v1132_v11 = vpop.permute.xlu1 %1131  ;;  %v1228_v18 = vpop.permute.xlu0 %1227 }
 0x1a9   : > { %v1390_v17 = vsel %vm1348_vm1, %v1314_v12, %v1132_v11  ;;  %v919_v11 = vld [vmem:[%s6090_s11 + $0x1a4] sm:$0xff]  ;;  %v920_v12 = vld [vmem:[%s6090_s11 + $0x1ac] sm:$0xff] }
 0x1aa   : > { %v957_v16 = vpack.c.bf16 %v920_v12, %v919_v11  ;;  %v927_v11 = vld [vmem:[%s6090_s11 + $0x1e4] sm:$0xff]  ;;  %v928_v12 = vld [vmem:[%s6090_s11 + $0x1ec] sm:$0xff] }
 0x1ab   : > { %1909 = vmatmul.mubr.bf16.gmra.mrb[60].mxu0 %v1460_v22  ;;  %v1475_v22 = vsel %vm1413_vm2, %v1390_v17, %v1228_v18 }
 0x1ac   : > { %4833 = vmatprep.mubr.msk.bf16.mxu0 %vm1251_vm0, %v947_v19  ;;  %v568_v19 = vpack.c.bf16 %v526_v14, %v525_v13  ;;  %v1038_v21 = vpop.permute.xlu1 %1037  ;;  %v1134_v23 = vpop.permute.xlu0 %1133 }
 0x1ae   : > { %v1317_v24 = vsel %vm1251_vm0, %v568_v19, %v1038_v21  ;;  %v537_v21 = vld [vmem:[%s6090_s11 + $0x1b0] sm:$0xff] }
 0x1af   : > { %v1392_v29 = vsel %vm1348_vm1, %v1317_v24, %v1134_v23  ;;  %v921_v23 = vld [vmem:[%s6090_s11 + $0x1b4] sm:$0xff]  ;;  %v922_v24 = vld [vmem:[%s6090_s11 + $0x1bc] sm:$0xff] }
 0x1b0   : > { %v1230_v30 = vpop.permute.xlu1 %1229  ;;  %v1040_v33 = vpop.permute.xlu0 %1039  ;;  %v958_v28 = vpack.c.bf16 %v922_v24, %v921_v23 }
 0x1b1   : > { %v1478_v34 = vsel %vm1413_vm2, %v1392_v29, %v1230_v30  ;;  %v1320_v36 = vsel %vm1251_vm0, %v569_v31, %v1040_v33  ;;  %v539_v33 = vld [vmem:[%s6090_s11 + $0x1c0] sm:$0xff] }
 0x1b3   : > { %1919 = vmatmul.mubr.bf16.gmra.mrb[64].mxu0 %v1463_v38  ;;  %v530_v38 = vld [vmem:[%s6090_s11 + $0x178] sm:$0xff] }
 0x1b4   : > { %4834 = vmatprep.mubr.msk.bf16.mxu0 %vm1251_vm0, %v948_v35  ;;  %v1136_v35 = vpop.permute.xlu1 %1135  ;;  %v1232_v42 = vpop.permute.xlu0 %1231  ;;  %v570_v43 = vpack.c.bf16 %v530_v38, %v529_v37 }
 0x1b5   : > { %v1394_v41 = vsel %vm1348_vm1, %v1320_v36, %v1136_v35  ;;  %v923_v35 = vld [vmem:[%s6090_s11 + $0x1c4] sm:$0xff]  ;;  %v924_v36 = vld [vmem:[%s6090_s11 + $0x1cc] sm:$0xff] }
 0x1b6   : > { %v1481_v46 = vsel %vm1413_vm2, %v1394_v41, %v1232_v42 }
 0x1b8   : > { %v1042_v45 = vpop.permute.xlu1 %1041  ;;  %v1138_v47 = vpop.permute.xlu0 %1137 }
 0x1bb   : > { %1929 = vmatmul.mubr.bf16.gmra.mrb[68].mxu0 %v1466_v50  ;;  %v532_v50 = vld [vmem:[%s6090_s11 + $0x188] sm:$0xff] }
 0x1bc   : > { %4835 = vmatprep.mubr.msk.bf16.mxu0 %vm1251_vm0, %v949_v48  ;;  %v1323_v48 = vsel %vm1251_vm0, %v570_v43, %v1042_v45  ;;  %v1234_v54 = vpop.permute.xlu1 %1233  ;;  %v571_v55 = vpack.c.bf16 %v532_v50, %v531_v49  ;;  %v1044_v57 = vpop.permute.xlu0 %1043 }
 0x1bd   : > { %v1396_v53 = vsel %vm1348_vm1, %v1323_v48, %v1138_v47 }
 0x1be   : > { %v1484_v58 = vsel %vm1413_vm2, %v1396_v53, %v1234_v54  ;;  %v925_v53 = vld [vmem:[%s6090_s11 + $0x1d4] sm:$0xff]  ;;  %v926_v54 = vld [vmem:[%s6090_s11 + $0x1dc] sm:$0xff] }
 0x1c0   : > { %v1140_v59 = vpop.permute.xlu1 %1139  ;;  %v1236_v2 = vpop.permute.xlu0 %1235 }
 0x1c3   : > { %1939 = vmatmul.mubr.bf16.gmra.mrb[72].mxu0 %v1469_v62  ;;  %v534_v62 = vld [vmem:[%s6090_s11 + $0x198] sm:$0xff] }
 0x1c4   : > { %4836 = vmatprep.mubr.msk.bf16.mxu0 %vm1251_vm0, %v950_v60  ;;  %v1326_v60 = vsel %vm1251_vm0, %v571_v55, %v1044_v57  ;;  %v572_v3 = vpack.c.bf16 %v534_v62, %v533_v61  ;;  %v1046_v5 = vpop.permute.xlu1 %1045  ;;  %v1142_v7 = vpop.permute.xlu0 %1141  ;;  %v576_v61 = vpack.c.bf16 %v542_v52, %v541_v51  ;;  %v960_v62 = vpack.c.bf16 %v926_v54, %v925_v53 }
 0x1c5   : > { %v1398_v1 = vsel %vm1348_vm1, %v1326_v60, %v1140_v59 }
 0x1c6   : > { %v1487_v6 = vsel %vm1413_vm2, %v1398_v1, %v1236_v2 }
 0x1c8   : > { %v1238_v14 = vpop.permute.xlu1 %1237  ;;  %v1048_v17 = vpop.permute.xlu0 %1047 }
 0x1cb   : > { %1949 = vmatmul.mubr.bf16.gmra.mrb[76].mxu0 %v1472_v10  ;;  %v536_v10 = vld [vmem:[%s6090_s11 + $0x1a8] sm:$0xff] }
 0x1cc   : > { %4837 = vmatprep.mubr.msk.bf16.mxu0 %vm1251_vm0, %v951_v8  ;;  %v1329_v8 = vsel %vm1251_vm0, %v572_v3, %v1046_v5  ;;  %v573_v15 = vpack.c.bf16 %v536_v10, %v535_v9  ;;  %v1144_v19 = vpop.permute.xlu1 %1143  ;;  %v1240_v26 = vpop.permute.xlu0 %1239  ;;  %v543_v9 = vld [vmem:[%s6090_s11 + $0x1e0] sm:$0xff]  ;;  %v544_v10 = vld [vmem:[%s6090_s11 + $0x1e8] sm:$0xff] }
 0x1cd   : > { %v1400_v13 = vsel %vm1348_vm1, %v1329_v8, %v1142_v7 }
 0x1ce   : > { %v1490_v18 = vsel %vm1413_vm2, %v1400_v13, %v1238_v14 }
 0x1d0   : > { %v1050_v29 = vpop.permute.xlu1 %1049  ;;  %v1146_v31 = vpop.permute.xlu0 %1145 }
 0x1d3   : > { %1959 = vmatmul.mubr.bf16.gmra.mrb[80].mxu0 %v1475_v22  ;;  %v538_v22 = vld [vmem:[%s6090_s11 + $0x1b8] sm:$0xff] }
 0x1d4   : > { %4838 = vmatprep.mubr.msk.bf16.mxu0 %vm1251_vm0, %v952_v20  ;;  %v1332_v20 = vsel %vm1251_vm0, %v573_v15, %v1048_v17  ;;  %v574_v27 = vpack.c.bf16 %v538_v22, %v537_v21  ;;  %v1242_v39 = vpop.permute.xlu1 %1241  ;;  %v961_v21 = vpack.c.bf16 %v928_v12, %v927_v11 }
 0x1d5   : > { %v1402_v25 = vsel %vm1348_vm1, %v1332_v20, %v1144_v19  ;;  %v577_v20 = vpack.c.bf16 %v544_v10, %v543_v9 }
 0x1d6   : > { %v1493_v30 = vsel %vm1413_vm2, %v1402_v25, %v1240_v26 }
 0x1d8   : > { %v1148_v49 = vpop.permute.xlu1 %1147 }
 0x1db   : > { %1969 = vmatmul.mubr.bf16.gmra.mrb[84].mxu0 %v1478_v34  ;;  %v540_v34 = vld [vmem:[%s6090_s11 + $0x1c8] sm:$0xff] }
 0x1dc   : > { %4839 = vmatprep.mubr.msk.bf16.mxu0 %vm1251_vm0, %v953_v32  ;;  %v1335_v32 = vsel %vm1251_vm0, %v574_v27, %v1050_v29  ;;  %v575_v43 = vpack.c.bf16 %v540_v34, %v539_v33  ;;  %v1054_v0 = vpop.permute.xlu1 %1053  ;;  %v546_v33 = vld [vmem:[%s6090_s11 + $0x1f8] sm:$0xf] }
 0x1dd   : > { %v1404_v38 = vsel %vm1348_vm1, %v1335_v32, %v1146_v31  ;;  %v1341_v8 = vsel %vm1251_vm0, %v576_v61, %v1054_v0  ;;  %v545_v32 = vld [vmem:[%s6090_s11 + $0x1f0] sm:$0xff] }
 0x1de   : > { %v1496_v48 = vsel %vm1413_vm2, %v1404_v38, %v1242_v39  ;;  %v929_v34 = vld [vmem:[%s6090_s11 + $0x1f4] sm:$0xff] }
 0x1e3   : > { %1979 = vmatmul.mubr.bf16.gmra.mrb[88].mxu0 %v1481_v46  ;;  %v1052_v46 = vpop.permute.xlu0 %1051 }
 0x1e4   : > { %4840 = vmatprep.mubr.msk.bf16.mxu0 %vm1251_vm0, %v954_v44  ;;  %v959_v44 = vpack.c.bf16 %v924_v36, %v923_v35  ;;  %v1338_v50 = vsel %vm1251_vm0, %v575_v43, %v1052_v46  ;;  %v930_v35 = vld [vmem:[%s6090_s11 + $0x1fc] sm:$0xf]  ;;  %v578_v43 = vpack.c.bf16 %v546_v33, %v545_v32 }
 0x1e7   : > { %v1244_v57 = vpop.permute.xlu0 %1243 }
 0x1eb   : > { %1989 = vmatmul.mubr.bf16.gmra.mrb[92].mxu0 %v1484_v58  ;;  %v1150_v5 = vpop.permute.xlu0 %1149 }
 0x1ec   : > { %4841 = vmatprep.mubr.msk.bf16.mxu0 %vm1251_vm0, %v955_v56  ;;  %v1406_v56 = vsel %vm1348_vm1, %v1338_v50, %v1148_v49  ;;  %v1408_v15 = vsel %vm1348_vm1, %v1341_v8, %v1150_v5 }
 0x1ed   : > { %v1499_v2 = vsel %vm1413_vm2, %v1406_v56, %v1244_v57 }
 0x1ef   : > { %v1056_v24 = vpop.permute.xlu0 %1055 }
 0x1f0   : > { %v1344_v31 = vsel %vm1251_vm0, %v577_v20, %v1056_v24 }
 0x1f3   : > { %1999 = vmatmul.mubr.bf16.gmra.mrb[96].mxu0 %v1487_v6  ;;  %v6635_v6 = vld [vmem:[%s6871_s2] ss:$0 sm:$0xff]  ;;  %v1248_v39 = vpop.permute.xlu0 %1247 }
 0x1f4   : > { %4842 = vmatprep.mubr.msk.bf16.mxu0 %vm1251_vm0, %v956_v4 }
 0x1f7   : > { %v1154_v54 = vpop.permute.xlu0 %1153 }
 0x1fb   : > { %2009 = vmatmul.mubr.bf16.gmra.mrb[100].mxu0 %v1490_v18 }
 0x1fc   : > { %4843 = vmatprep.mubr.msk.bf16.mxu0 %vm1251_vm0, %v957_v16  ;;  %v1246_v16 = vpop.permute.xlu1 %1245 }
 0x1fd   : > { %v1502_v26 = vsel %vm1413_vm2, %v1408_v15, %v1246_v16 }
 0x200   : > { %v1152_v29 = vpop.permute.xlu1 %1151 }
 0x201   : > { %v1410_v38 = vsel %vm1348_vm1, %v1344_v31, %v1152_v29 }
 0x202   : > { %v1505_v49 = vsel %vm1413_vm2, %v1410_v38, %v1248_v39 }
 0x203   : > { %2019 = vmatmul.mubr.bf16.gmra.mrb[104].mxu0 %v1493_v30 }
 0x204   : > { %4844 = vmatprep.mubr.msk.bf16.mxu0 %vm1251_vm0, %v958_v28 }
 0x206   : > { %v1760_v37 = vpop.f32.mrb[0].mxu0 }
 0x207   : > { %v1762_v40 = vpop.f32.mrb[1].mxu0 }
 0x208   : > { %v2079_v41 = vmax.f32 %v1760_v37, %v1762_v40  ;;  %v1764_v42 = vpop.f32.mrb[2].mxu0 }
 0x209   : > { %v1766_v45 = vpop.f32.mrb[3].mxu0 }
 0x20a   : > { %2143 = vst [vmem:[#allocation2] sm:$0xff] %v2079_v41  ;;  %v2080_v47 = vmax.f32 %v1764_v42, %v1766_v45 }
 0x20b   : > { %2029 = vmatmul.mubr.bf16.gmra.mrb[108].mxu0 %v1496_v48 }
 0x20c   : > { %2144 = vst [vmem:[#allocation2 + $0x8] sm:$0xff] %v2080_v47  ;;  %4845 = vmatprep.mubr.msk.bf16.mxu0 %vm1251_vm0, %v959_v44  ;;  %v962_v44 = vpack.c.bf16 %v930_v35, %v929_v34  ;;  %v1058_v47 = vpop.permute.xlu1 %1057 }
 0x20d   : > { %v1347_v53 = vsel %vm1251_vm0, %v578_v43, %v1058_v47  ;;  %v5436_v47 = vld [vmem:[#allocation9 + $0x120] ss:$8 sps:$4 sm:$0xff]  }
 0x20e   : > { %v1770_v55 = vpop.f32.mrb[4].mxu0  ;;  %v1412_v57 = vsel %vm1348_vm1, %v1347_v53, %v1154_v54 }
 0x20f   : > { %v1772_v58 = vpop.f32.mrb[5].mxu0 }
 0x210   : > { %v2081_v59 = vmax.f32 %v1770_v55, %v1772_v58  ;;  %v1774_v60 = vpop.f32.mrb[6].mxu0  ;;  %v1250_v58 = vpop.permute.xlu1 %1249 }
 0x211   : > { %v1776_v63 = vpop.f32.mrb[7].mxu0 }
 0x212   : > { %2145 = vst [vmem:[#allocation2 + $0x10] sm:$0xff] %v2081_v59  ;;  %v2082_v1 = vmax.f32 %v1774_v60, %v1776_v63 }
 0x213   : > { %v2207_v3 = vld [vmem:[#allocation2] ss:$2 sm:$0xff]  ;;  %v2271_v4 = vld [vmem:[#allocation2 + $0x1] ss:$2 sm:$0xff]  ;;  %2039 = vmatmul.mubr.bf16.gmra.mrb[112].mxu0 %v1499_v2 }
 0x214   : > { %v2334_v7 = vmax.f32 %v2207_v3, %v2271_v4  ;;  %2146 = vst [vmem:[#allocation2 + $0x18] sm:$0xff] %v2082_v1  ;;  %4846 = vmatprep.mubr.msk.bf16.mxu0 %vm1251_vm0, %v960_v62  ;;  %v1508_v1 = vsel %vm1413_vm2, %v1412_v57, %v1250_v58 }
 0x216   : > { %v1780_v13 = vpop.f32.mrb[8].mxu0  ;;  %v6644_v14 = vadd.f32 %v6635_v6, %v2334_v7 }
 0x217   : > { %v1782_v17 = vpop.f32.mrb[9].mxu0 }
 0x218   : > { %v2083_v18 = vmax.f32 %v1780_v13, %v1782_v17  ;;  %v1784_v19 = vpop.f32.mrb[10].mxu0  ;;  %v2405_v22 = vmax.f32 %v6644_v14, 0.0  ;;  %v5433_v14 = vld [vmem:[#allocation9 + $0x110] ss:$8 sps:$4 sm:$0xff]  }
 0x219   : > { %v1786_v23 = vpop.f32.mrb[11].mxu0 }
 0x21a   : > { %2147 = vst [vmem:[#allocation2 + $0x20] sm:$0xff] %v2083_v18  ;;  %v2084_v25 = vmax.f32 %v1784_v19, %v1786_v23  ;;  %2437 = vst [vmem:[#allocation3] sm:$0xff] %v2405_v22  ;;  %v5430_v18 = vld [vmem:[#allocation9 + $0x100] ss:$8 sps:$4 sm:$0xff]   ;;  %v5432_v19 = vld [vmem:[#allocation9 + $0x104] ss:$8 sps:$4 sm:$0xff]  }
 0x21b   : > { %v2209_v27 = vld [vmem:[#allocation2 + $0x10] ss:$2 sm:$0xff]  ;;  %v2273_v28 = vld [vmem:[#allocation2 + $0x11] ss:$2 sm:$0xff]  ;;  %2049 = vmatmul.mubr.bf16.gmra.mrb[116].mxu0 %v1502_v26  ;;  %3382 = vmatprep.subr.bf16.mxu1 %v5432_v19 }
 0x21c   : > { %v2335_v30 = vmax.f32 %v2209_v27, %v2273_v28  ;;  %2148 = vst [vmem:[#allocation2 + $0x28] sm:$0xff] %v2084_v25  ;;  %4847 = vmatprep.mubr.msk.bf16.mxu0 %vm1251_vm0, %v961_v21 }
 0x21e   : > { %v1790_v36 = vpop.f32.mrb[12].mxu0  ;;  %v2374_v37 = vadd.f32 %v6635_v6, %v2335_v30 }
 0x21f   : > { %v1792_v40 = vpop.f32.mrb[13].mxu0 }
 0x220   : > { %v2085_v41 = vmax.f32 %v1790_v36, %v1792_v40  ;;  %v1794_v42 = vpop.f32.mrb[14].mxu0  ;;  %v2406_v45 = vmax.f32 %v2374_v37, 0.0 }
 0x221   : > { %v1796_v46 = vpop.f32.mrb[15].mxu0 }
 0x222   : > { %2149 = vst [vmem:[#allocation2 + $0x30] sm:$0xff] %v2085_v41  ;;  %v2086_v48 = vmax.f32 %v1794_v42, %v1796_v46  ;;  %2438 = vst [vmem:[#allocation3 + $0x8] sm:$0xff] %v2406_v45  ;;  %v2501_v23 = vpack.c.bf16 %v2406_v45, %v2405_v22  ;;  %v5435_v22 = vld [vmem:[#allocation9 + $0x114] ss:$8 sps:$4 sm:$0xff]  }
 0x223   : > { %v2211_v50 = vld [vmem:[#allocation2 + $0x20] ss:$2 sm:$0xff]  ;;  %v2275_v51 = vld [vmem:[#allocation2 + $0x21] ss:$2 sm:$0xff]  ;;  %2059 = vmatmul.mubr.bf16.gmra.mrb[120].mxu0 %v1505_v49 }
 0x224   : > { %v2336_v52 = vmax.f32 %v2211_v50, %v2275_v51  ;;  %2150 = vst [vmem:[#allocation2 + $0x38] sm:$0xff] %v2086_v48  ;;  %4848 = vmatprep.mubr.msk.bf16.mxu0 %vm1251_vm0, %v962_v44  ;;  %v5438_v48 = vld [vmem:[#allocation9 + $0x124] ss:$8 sps:$4 sm:$0xff]  }
 0x226   : > { %v1800_v55 = vpop.f32.mrb[16].mxu0  ;;  %v6663_v56 = vadd.f32 %v6635_v6, %v2336_v52 }
 0x227   : > { %v1802_v59 = vpop.f32.mrb[17].mxu0 }
 0x228   : > { %v2087_v60 = vmax.f32 %v1800_v55, %v1802_v59  ;;  %v1804_v61 = vpop.f32.mrb[18].mxu0  ;;  %v2407_v62 = vmax.f32 %v6663_v56, 0.0  ;;  %v5439_v56 = vld [vmem:[#allocation9 + $0x130] ss:$8 sps:$4 sm:$0xff]  }
 0x229   : > { %v1806_v63 = vpop.f32.mrb[19].mxu0  ;;  %v2517_v13 = vld [vmem:[#allocation3 + $0x1] sm:$0xff] }
 0x22a   : > { %2151 = vst [vmem:[#allocation2 + $0x40] sm:$0xff] %v2087_v60  ;;  %v2088_v0 = vmax.f32 %v1804_v61, %v1806_v63  ;;  %2439 = vst [vmem:[#allocation3 + $0x10] sm:$0xff] %v2407_v62 }
 0x22b   : > { %v2213_v2 = vld [vmem:[#allocation2 + $0x30] ss:$2 sm:$0xff]  ;;  %v2277_v3 = vld [vmem:[#allocation2 + $0x31] ss:$2 sm:$0xff]  ;;  %2069 = vmatmul.mubr.bf16.gmra.mrb[124].mxu0 %v1508_v1 }
 0x22c   : > { %v2337_v4 = vmax.f32 %v2213_v2, %v2277_v3  ;;  %2152 = vst [vmem:[#allocation2 + $0x48] sm:$0xff] %v2088_v0 }
 0x22e   : > { %v2376_v5 = vadd.f32 %v6635_v6, %v2337_v4  ;;  %v1810_v7 = vpop.f32.mrb[20].mxu0 }
 0x22f   : > { %v1812_v8 = vpop.f32.mrb[21].mxu0 }
 0x230   : > { %v2089_v9 = vmax.f32 %v1810_v7, %v1812_v8  ;;  %v1814_v10 = vpop.f32.mrb[22].mxu0  ;;  %v2408_v11 = vmax.f32 %v2376_v5, 0.0 }
 0x231   : > { %v1816_v12 = vpop.f32.mrb[23].mxu0  ;;  %v2518_v15 = vld [vmem:[#allocation3 + $0x9] sm:$0xff] }
 0x232   : > { %2153 = vst [vmem:[#allocation2 + $0x50] sm:$0xff] %v2089_v9  ;;  %v2090_v16 = vmax.f32 %v1814_v10, %v1816_v12  ;;  %v2549_v17 = vpack.c.bf16 %v2518_v15, %v2517_v13  ;;  %2440 = vst [vmem:[#allocation3 + $0x18] sm:$0xff] %v2408_v11  ;;  %v2502_v51 = vpack.c.bf16 %v2408_v11, %v2407_v62  ;;  %v5441_v62 = vld [vmem:[#allocation9 + $0x134] ss:$8 sps:$4 sm:$0xff]   ;;  %v5442_v15 = vld [vmem:[#allocation9 + $0x140] ss:$8 sps:$4 sm:$0xff]  }
 0x233   : > { %v2215_v20 = vld [vmem:[#allocation2 + $0x40] ss:$2 sm:$0xff]  ;;  %v2279_v21 = vld [vmem:[#allocation2 + $0x41] ss:$2 sm:$0xff] }
 0x234   : > { %v2338_v24 = vmax.f32 %v2215_v20, %v2279_v21  ;;  %2154 = vst [vmem:[#allocation2 + $0x58] sm:$0xff] %v2090_v16  ;;  %3221 = vmatprep.mubr.bf16.mxu1 %v2549_v17  ;;  %v5444_v16 = vld [vmem:[#allocation9 + $0x144] ss:$8 sps:$4 sm:$0xff]  }
 0x235   : > { %3222 = vmatmul.mubr.bf16.vlgmr.msra.gmra.mrb[0].mxu1 %v2501_v23 }
 0x236   : > { %v6674_v25 = vadd.f32 %v6635_v6, %v2338_v24  ;;  %v1820_v26 = vpop.f32.mrb[24].mxu0  ;;  %3383 = vmatpush1.bf16.msra.mxu1 %v5430_v18 }
 0x237   : > { %v1822_v27 = vpop.f32.mrb[25].mxu0  ;;  %3384 = vmatprep.subr.bf16.mxu1 %v5435_v22 }
 0x238   : > { %v2091_v28 = vmax.f32 %v1820_v26, %v1822_v27  ;;  %v1824_v29 = vpop.f32.mrb[26].mxu0  ;;  %v2409_v30 = vmax.f32 %v6674_v25, 0.0  ;;  %v5445_v25 = vld [vmem:[#allocation9 + $0x150] ss:$8 sps:$4 sm:$0xff]  }
 0x239   : > { %v1826_v31 = vpop.f32.mrb[27].mxu0  ;;  %v2519_v43 = vld [vmem:[#allocation3 + $0x11] sm:$0xff] }
 0x23a   : > { %2155 = vst [vmem:[#allocation2 + $0x60] sm:$0xff] %v2091_v28  ;;  %v2092_v32 = vmax.f32 %v1824_v29, %v1826_v31  ;;  %2441 = vst [vmem:[#allocation3 + $0x20] sm:$0xff] %v2409_v30  ;;  %3385 = vmatpush1.bf16.msra.mxu1 %v5433_v14 }
 0x23b   : > { %v2217_v33 = vld [vmem:[#allocation2 + $0x50] ss:$2 sm:$0xff]  ;;  %v2281_v34 = vld [vmem:[#allocation2 + $0x51] ss:$2 sm:$0xff]  ;;  %3386 = vmatprep.subr.bf16.mxu1 %v5438_v48 }
 0x23c   : > { %v2339_v35 = vmax.f32 %v2217_v33, %v2281_v34  ;;  %2156 = vst [vmem:[#allocation2 + $0x68] sm:$0xff] %v2092_v32 }
 0x23e   : > { %v2378_v36 = vadd.f32 %v6635_v6, %v2339_v35  ;;  %v1830_v37 = vpop.f32.mrb[28].mxu0  ;;  %3387 = vmatpush1.bf16.msra.mxu1 %v5436_v47 }
 0x23f   : > { %v1832_v38 = vpop.f32.mrb[29].mxu0  ;;  %3388 = vmatprep.subr.bf16.mxu1 %v5441_v62 }
 0x240   : > { %v2093_v39 = vmax.f32 %v1830_v37, %v1832_v38  ;;  %v1834_v40 = vpop.f32.mrb[30].mxu0  ;;  %v2410_v41 = vmax.f32 %v2378_v36, 0.0 }
 0x241   : > { %v1836_v42 = vpop.f32.mrb[31].mxu0  ;;  %v2520_v44 = vld [vmem:[#allocation3 + $0x19] sm:$0xff] }
 0x242   : > { %2157 = vst [vmem:[#allocation2 + $0x70] sm:$0xff] %v2093_v39  ;;  %v2094_v45 = vmax.f32 %v1834_v40, %v1836_v42  ;;  %v2550_v46 = vpack.c.bf16 %v2520_v44, %v2519_v43  ;;  %2442 = vst [vmem:[#allocation3 + $0x28] sm:$0xff] %v2410_v41  ;;  %3389 = vmatpush1.bf16.msra.mxu1 %v5439_v56  ;;  %v2503_v19 = vpack.c.bf16 %v2410_v41, %v2409_v30  ;;  %v5447_v30 = vld [vmem:[#allocation9 + $0x154] ss:$8 sps:$4 sm:$0xff]   ;;  %v5448_v44 = vld [vmem:[#allocation9 + $0x160] ss:$8 sps:$4 sm:$0xff]  }
 0x243   : > { %v2219_v49 = vld [vmem:[#allocation2 + $0x60] ss:$2 sm:$0xff]  ;;  %v2283_v50 = vld [vmem:[#allocation2 + $0x61] ss:$2 sm:$0xff]  ;;  %3390 = vmatprep.subr.bf16.mxu1 %v5444_v16 }
 0x244   : > { %v2340_v52 = vmax.f32 %v2219_v49, %v2283_v50  ;;  %2158 = vst [vmem:[#allocation2 + $0x78] sm:$0xff] %v2094_v45  ;;  %3231 = vmatprep.mubr.bf16.mxu1 %v2550_v46  ;;  %v5450_v45 = vld [vmem:[#allocation9 + $0x164] ss:$8 sps:$4 sm:$0xff]  }
 0x245   : > { %3232 = vmatmul.mubr.bf16.gmra.mrb[4].mxu1 %v2502_v51 }
 0x246   : > { %v6683_v53 = vadd.f32 %v6635_v6, %v2340_v52  ;;  %v1840_v54 = vpop.f32.mrb[32].mxu0  ;;  %3391 = vmatpush1.bf16.msra.mxu1 %v5442_v15 }
 0x247   : > { %v1842_v55 = vpop.f32.mrb[33].mxu0  ;;  %3392 = vmatprep.subr.bf16.mxu1 %v5447_v30 }
 0x248   : > { %v2095_v57 = vmax.f32 %v1840_v54, %v1842_v55  ;;  %v1844_v58 = vpop.f32.mrb[34].mxu0  ;;  %v2411_v59 = vmax.f32 %v6683_v53, 0.0  ;;  %v5451_v53 = vld [vmem:[#allocation9 + $0x170] ss:$8 sps:$4 sm:$0xff]  }
 0x249   : > { %v1846_v60 = vpop.f32.mrb[35].mxu0  ;;  %v2521_v10 = vld [vmem:[#allocation3 + $0x21] sm:$0xff] }
 0x24a   : > { %2159 = vst [vmem:[#allocation2 + $0x80] sm:$0xff] %v2095_v57  ;;  %v2096_v61 = vmax.f32 %v1844_v58, %v1846_v60  ;;  %2443 = vst [vmem:[#allocation3 + $0x30] sm:$0xff] %v2411_v59  ;;  %3393 = vmatpush1.bf16.msra.mxu1 %v5445_v25 }
 0x24b   : > { %v2221_v63 = vld [vmem:[#allocation2 + $0x70] ss:$2 sm:$0xff]  ;;  %v2285_v0 = vld [vmem:[#allocation2 + $0x71] ss:$2 sm:$0xff]  ;;  %3394 = vmatprep.subr.bf16.mxu1 %v5450_v45 }
 0x24c   : > { %v2341_v1 = vmax.f32 %v2221_v63, %v2285_v0  ;;  %2160 = vst [vmem:[#allocation2 + $0x88] sm:$0xff] %v2096_v61 }
 0x24e   : > { %v2380_v2 = vadd.f32 %v6635_v6, %v2341_v1  ;;  %v1850_v3 = vpop.f32.mrb[36].mxu0  ;;  %3395 = vmatpush1.bf16.msra.mxu1 %v5448_v44 }
 0x24f   : > { %v1852_v4 = vpop.f32.mrb[37].mxu0 }
 0x250   : > { %v2097_v5 = vmax.f32 %v1850_v3, %v1852_v4  ;;  %v1854_v7 = vpop.f32.mrb[38].mxu0  ;;  %v2412_v8 = vmax.f32 %v2380_v2, 0.0 }
 0x251   : > { %v1856_v9 = vpop.f32.mrb[39].mxu0  ;;  %v2522_v11 = vld [vmem:[#allocation3 + $0x29] sm:$0xff] }
 0x252   : > { %2161 = vst [vmem:[#allocation2 + $0x90] sm:$0xff] %v2097_v5  ;;  %v2098_v12 = vmax.f32 %v1854_v7, %v1856_v9  ;;  %v2551_v13 = vpack.c.bf16 %v2522_v11, %v2521_v10  ;;  %2444 = vst [vmem:[#allocation3 + $0x38] sm:$0xff] %v2412_v8  ;;  %v2504_v48 = vpack.c.bf16 %v2412_v8, %v2411_v59  ;;  %v5453_v59 = vld [vmem:[#allocation9 + $0x174] ss:$8 sps:$4 sm:$0xff]   ;;  %v5454_v11 = vld [vmem:[#allocation9 + $0x180] ss:$8 sps:$4 sm:$0xff]  }
 0x253   : > { %v2223_v17 = vld [vmem:[#allocation2 + $0x80] ss:$2 sm:$0xff]  ;;  %v2287_v18 = vld [vmem:[#allocation2 + $0x81] ss:$2 sm:$0xff]  ;;  %3396 = vmatprep.subr.bf16.mxu1 %v5453_v59 }
 0x254   : > { %v2342_v20 = vmax.f32 %v2223_v17, %v2287_v18  ;;  %2162 = vst [vmem:[#allocation2 + $0x98] sm:$0xff] %v2098_v12  ;;  %3241 = vmatprep.mubr.bf16.mxu1 %v2551_v13  ;;  %3397 = vmatpush1.bf16.msra.mxu1 %v5451_v53  ;;  %v5456_v12 = vld [vmem:[#allocation9 + $0x184] ss:$8 sps:$4 sm:$0xff]  }
 0x255   : > { %3242 = vmatmul.mubr.bf16.gmra.mrb[8].mxu1 %v2503_v19  ;;  %3398 = vmatprep.subr.bf16.mxu1 %v5456_v12 }
 0x256   : > { %v6692_v21 = vadd.f32 %v6635_v6, %v2342_v20  ;;  %v1860_v23 = vpop.f32.mrb[40].mxu0 }
 0x257   : > { %v1862_v24 = vpop.f32.mrb[41].mxu0 }
 0x258   : > { %v2099_v26 = vmax.f32 %v1860_v23, %v1862_v24  ;;  %v1864_v27 = vpop.f32.mrb[42].mxu0  ;;  %v2413_v28 = vmax.f32 %v6692_v21, 0.0  ;;  %3399 = vmatpush1.bf16.msra.mxu1 %v5454_v11  ;;  %v5457_v21 = vld [vmem:[#allocation9 + $0x190] ss:$8 sps:$4 sm:$0xff]  }
 0x259   : > { %v1866_v29 = vpop.f32.mrb[43].mxu0  ;;  %v2523_v40 = vld [vmem:[#allocation3 + $0x31] sm:$0xff] }
 0x25a   : > { %2163 = vst [vmem:[#allocation2 + $0xa0] sm:$0xff] %v2099_v26  ;;  %v2100_v31 = vmax.f32 %v1864_v27, %v1866_v29  ;;  %2445 = vst [vmem:[#allocation3 + $0x40] sm:$0xff] %v2413_v28 }
 0x25b   : > { %v2225_v32 = vld [vmem:[#allocation2 + $0x90] ss:$2 sm:$0xff]  ;;  %v2289_v14 = vld [vmem:[#allocation2 + $0x91] ss:$2 sm:$0xff] }
 0x25c   : > { %v2343_v22 = vmax.f32 %v2225_v32, %v2289_v14  ;;  %2164 = vst [vmem:[#allocation2 + $0xa8] sm:$0xff] %v2100_v31 }
 0x25e   : > { %v2382_v33 = vadd.f32 %v6635_v6, %v2343_v22  ;;  %v1870_v34 = vpop.f32.mrb[44].mxu0 }
 0x25f   : > { %v1872_v35 = vpop.f32.mrb[45].mxu0 }
 0x260   : > { %v2101_v36 = vmax.f32 %v1870_v34, %v1872_v35  ;;  %v1874_v37 = vpop.f32.mrb[46].mxu0  ;;  %v2414_v38 = vmax.f32 %v2382_v33, 0.0 }
 0x261   : > { %v1876_v39 = vpop.f32.mrb[47].mxu0  ;;  %v2524_v41 = vld [vmem:[#allocation3 + $0x39] sm:$0xff] }
 0x262   : > { %2165 = vst [vmem:[#allocation2 + $0xb0] sm:$0xff] %v2101_v36  ;;  %v2102_v42 = vmax.f32 %v1874_v37, %v1876_v39  ;;  %v2552_v43 = vpack.c.bf16 %v2524_v41, %v2523_v40  ;;  %2446 = vst [vmem:[#allocation3 + $0x48] sm:$0xff] %v2414_v38  ;;  %v2505_v16 = vpack.c.bf16 %v2414_v38, %v2413_v28  ;;  %v5459_v28 = vld [vmem:[#allocation9 + $0x194] ss:$8 sps:$4 sm:$0xff]   ;;  %v5460_v41 = vld [vmem:[#allocation9 + $0x1a0] ss:$8 sps:$4 sm:$0xff]  }
 0x263   : > { %v2227_v46 = vld [vmem:[#allocation2 + $0xa0] ss:$2 sm:$0xff]  ;;  %v2291_v47 = vld [vmem:[#allocation2 + $0xa1] ss:$2 sm:$0xff]  ;;  %3400 = vmatprep.subr.bf16.mxu1 %v5459_v28 }
 0x264   : > { %v2344_v49 = vmax.f32 %v2227_v46, %v2291_v47  ;;  %2166 = vst [vmem:[#allocation2 + $0xb8] sm:$0xff] %v2102_v42  ;;  %3251 = vmatprep.mubr.bf16.mxu1 %v2552_v43  ;;  %3401 = vmatpush1.bf16.msra.mxu1 %v5457_v21  ;;  %v5462_v42 = vld [vmem:[#allocation9 + $0x1a4] ss:$8 sps:$4 sm:$0xff]   ;;  %v5472_v21 = vld [vmem:[#allocation9 + $0x1e0] ss:$8 sps:$4 sm:$0xff]  }
 0x265   : > { %3252 = vmatmul.mubr.bf16.gmra.mrb[12].mxu1 %v2504_v48  ;;  %3402 = vmatprep.subr.bf16.mxu1 %v5462_v42 }
 0x266   : > { %v6701_v50 = vadd.f32 %v6635_v6, %v2344_v49  ;;  %v1880_v51 = vpop.f32.mrb[48].mxu0 }
 0x267   : > { %v1882_v52 = vpop.f32.mrb[49].mxu0 }
 0x268   : > { %v2103_v54 = vmax.f32 %v1880_v51, %v1882_v52  ;;  %v1884_v55 = vpop.f32.mrb[50].mxu0  ;;  %v2415_v57 = vmax.f32 %v6701_v50, 0.0  ;;  %3403 = vmatpush1.bf16.msra.mxu1 %v5460_v41  ;;  %v5463_v50 = vld [vmem:[#allocation9 + $0x1b0] ss:$8 sps:$4 sm:$0xff]  }
 0x269   : > { %v1886_v58 = vpop.f32.mrb[51].mxu0  ;;  %v2525_v7 = vld [vmem:[#allocation3 + $0x41] sm:$0xff] }
 0x26a   : > { %2167 = vst [vmem:[#allocation2 + $0xc0] sm:$0xff] %v2103_v54  ;;  %v2104_v60 = vmax.f32 %v1884_v55, %v1886_v58  ;;  %2447 = vst [vmem:[#allocation3 + $0x50] sm:$0xff] %v2415_v57 }
 0x26b   : > { %v2229_v61 = vld [vmem:[#allocation2 + $0xb0] ss:$2 sm:$0xff]  ;;  %v2293_v56 = vld [vmem:[#allocation2 + $0xb1] ss:$2 sm:$0xff] }
 0x26c   : > { %v2345_v62 = vmax.f32 %v2229_v61, %v2293_v56  ;;  %2168 = vst [vmem:[#allocation2 + $0xc8] sm:$0xff] %v2104_v60 }
 0x26e   : > { %v2384_v63 = vadd.f32 %v6635_v6, %v2345_v62  ;;  %v1890_v0 = vpop.f32.mrb[52].mxu0 }
 0x26f   : > { %v1892_v1 = vpop.f32.mrb[53].mxu0 }
 0x270   : > { %v2105_v2 = vmax.f32 %v1890_v0, %v1892_v1  ;;  %v1894_v3 = vpop.f32.mrb[54].mxu0  ;;  %v2416_v4 = vmax.f32 %v2384_v63, 0.0 }
 0x271   : > { %v1896_v5 = vpop.f32.mrb[55].mxu0  ;;  %v2526_v8 = vld [vmem:[#allocation3 + $0x49] sm:$0xff] }
 0x272   : > { %2169 = vst [vmem:[#allocation2 + $0xd0] sm:$0xff] %v2105_v2  ;;  %v2106_v9 = vmax.f32 %v1894_v3, %v1896_v5  ;;  %v2553_v10 = vpack.c.bf16 %v2526_v8, %v2525_v7  ;;  %2448 = vst [vmem:[#allocation3 + $0x58] sm:$0xff] %v2416_v4  ;;  %v2506_v45 = vpack.c.bf16 %v2416_v4, %v2415_v57  ;;  %v5465_v57 = vld [vmem:[#allocation9 + $0x1b4] ss:$8 sps:$4 sm:$0xff]   ;;  %v5466_v8 = vld [vmem:[#allocation9 + $0x1c0] ss:$8 sps:$4 sm:$0xff]  }
 0x273   : > { %v2231_v13 = vld [vmem:[#allocation2 + $0xc0] ss:$2 sm:$0xff]  ;;  %v2295_v15 = vld [vmem:[#allocation2 + $0xc1] ss:$2 sm:$0xff]  ;;  %3404 = vmatprep.subr.bf16.mxu1 %v5465_v57 }
 0x274   : > { %v2346_v17 = vmax.f32 %v2231_v13, %v2295_v15  ;;  %2170 = vst [vmem:[#allocation2 + $0xd8] sm:$0xff] %v2106_v9  ;;  %3261 = vmatprep.mubr.bf16.mxu1 %v2553_v10  ;;  %3405 = vmatpush1.bf16.msra.mxu1 %v5463_v50  ;;  %v5468_v9 = vld [vmem:[#allocation9 + $0x1c4] ss:$8 sps:$4 sm:$0xff]   ;;  %v5471_v13 = vld [vmem:[#allocation9 + $0x1d4] ss:$8 sps:$4 sm:$0xff]  }
 0x275   : > { %3262 = vmatmul.mubr.bf16.gmra.mrb[16].mxu1 %v2505_v16  ;;  %3406 = vmatprep.subr.bf16.mxu1 %v5468_v9 }
 0x276   : > { %v6710_v18 = vadd.f32 %v6635_v6, %v2346_v17  ;;  %v1900_v19 = vpop.f32.mrb[56].mxu0 }
 0x277   : > { %v1902_v20 = vpop.f32.mrb[57].mxu0 }
 0x278   : > { %v2107_v23 = vmax.f32 %v1900_v19, %v1902_v20  ;;  %v1904_v24 = vpop.f32.mrb[58].mxu0  ;;  %v2417_v26 = vmax.f32 %v6710_v18, 0.0  ;;  %3407 = vmatpush1.bf16.msra.mxu1 %v5466_v8  ;;  %v5469_v19 = vld [vmem:[#allocation9 + $0x1d0] ss:$8 sps:$4 sm:$0xff]  }
 0x279   : > { %v1906_v27 = vpop.f32.mrb[59].mxu0  ;;  %v2527_v37 = vld [vmem:[#allocation3 + $0x51] sm:$0xff]  ;;  %3408 = vmatprep.subr.bf16.mxu1 %v5471_v13 }
 0x27a   : > { %2171 = vst [vmem:[#allocation2 + $0xe0] sm:$0xff] %v2107_v23  ;;  %v2108_v29 = vmax.f32 %v1904_v24, %v1906_v27  ;;  %2449 = vst [vmem:[#allocation3 + $0x60] sm:$0xff] %v2417_v26  ;;  %v5474_v23 = vld [vmem:[#allocation9 + $0x1e4] ss:$8 sps:$4 sm:$0xff]  }
 0x27b   : > { %v2233_v31 = vld [vmem:[#allocation2 + $0xd0] ss:$2 sm:$0xff]  ;;  %v2297_v25 = vld [vmem:[#allocation2 + $0xd1] ss:$2 sm:$0xff] }
 0x27c   : > { %v2347_v30 = vmax.f32 %v2233_v31, %v2297_v25  ;;  %2172 = vst [vmem:[#allocation2 + $0xe8] sm:$0xff] %v2108_v29  ;;  %3409 = vmatpush1.bf16.msra.mxu1 %v5469_v19 }
 0x27d   : > { %3410 = vmatprep.subr.bf16.mxu1 %v5474_v23 }
 0x27e   : > { %v2386_v32 = vadd.f32 %v6635_v6, %v2347_v30  ;;  %v1910_v14 = vpop.f32.mrb[60].mxu0  ;;  %v5477_v30 = vld [vmem:[#allocation9 + $0x1f4] ss:$8 sps:$4 sm:$0xff]  }
 0x27f   : > { %v1912_v22 = vpop.f32.mrb[61].mxu0 }
 0x280   : > { %v2109_v33 = vmax.f32 %v1910_v14, %v1912_v22  ;;  %v1914_v34 = vpop.f32.mrb[62].mxu0  ;;  %v2418_v35 = vmax.f32 %v2386_v32, 0.0  ;;  %3411 = vmatpush1.bf16.msra.mxu1 %v5472_v21  ;;  %v5475_v22 = vld [vmem:[#allocation9 + $0x1f0] ss:$8 sps:$4 sm:$0xff]  }
 0x281   : > { %v1916_v36 = vpop.f32.mrb[63].mxu0  ;;  %v2528_v38 = vld [vmem:[#allocation3 + $0x59] sm:$0xff]  ;;  %3412 = vmatprep.subr.bf16.mxu1 %v5477_v30 }
 0x282   : > { %2173 = vst [vmem:[#allocation2 + $0xf0] sm:$0xff] %v2109_v33  ;;  %v2110_v39 = vmax.f32 %v1914_v34, %v1916_v36  ;;  %v2554_v40 = vpack.c.bf16 %v2528_v38, %v2527_v37  ;;  %2450 = vst [vmem:[#allocation3 + $0x68] sm:$0xff] %v2418_v35  ;;  %v2507_v12 = vpack.c.bf16 %v2418_v35, %v2417_v26  ;;  %v5480_v34 = vld [vmem:[#allocation9 + $0x204] ss:$8 sps:$4 sm:$0xff]  }
 0x283   : > { %v2235_v43 = vld [vmem:[#allocation2 + $0xe0] ss:$2 sm:$0xff]  ;;  %v2299_v44 = vld [vmem:[#allocation2 + $0xe1] ss:$2 sm:$0xff] }
 0x284   : > { %v2348_v46 = vmax.f32 %v2235_v43, %v2299_v44  ;;  %2174 = vst [vmem:[#allocation2 + $0xf8] sm:$0xff] %v2110_v39  ;;  %3271 = vmatprep.mubr.bf16.mxu1 %v2554_v40  ;;  %3413 = vmatpush1.bf16.msra.mxu1 %v5475_v22 }
 0x285   : > { %3272 = vmatmul.mubr.bf16.gmra.mrb[20].mxu1 %v2506_v45  ;;  %3575 = vmatprep.subr.bf16.mxu1 %v5480_v34 }
 0x286   : > { %v6719_v47 = vadd.f32 %v6635_v6, %v2348_v46  ;;  %v1920_v48 = vpop.f32.mrb[64].mxu0 }
 0x287   : > { %v1922_v49 = vpop.f32.mrb[65].mxu0 }
 0x288   : > { %v2111_v51 = vmax.f32 %v1920_v48, %v1922_v49  ;;  %v1924_v52 = vpop.f32.mrb[66].mxu0  ;;  %v2419_v54 = vmax.f32 %v6719_v47, 0.0 }
 0x289   : > { %v1926_v55 = vpop.f32.mrb[67].mxu0  ;;  %v2529_v3 = vld [vmem:[#allocation3 + $0x61] sm:$0xff] }
 0x28a   : > { %2175 = vst [vmem:[#allocation2 + $0x100] sm:$0xff] %v2111_v51  ;;  %v2112_v58 = vmax.f32 %v1924_v52, %v1926_v55  ;;  %2451 = vst [vmem:[#allocation3 + $0x70] sm:$0xff] %v2419_v54 }
 0x28b   : > { %v2237_v60 = vld [vmem:[#allocation2 + $0xf0] ss:$2 sm:$0xff]  ;;  %v2301_v53 = vld [vmem:[#allocation2 + $0xf1] ss:$2 sm:$0xff] }
 0x28c   : > { %v2349_v59 = vmax.f32 %v2237_v60, %v2301_v53  ;;  %2176 = vst [vmem:[#allocation2 + $0x108] sm:$0xff] %v2112_v58 }
 0x28e   : > { %v6725_v61 = vadd.f32 %v6635_v6, %v2349_v59  ;;  %v1930_v56 = vpop.f32.mrb[68].mxu0 }
 0x28f   : > { %v1932_v62 = vpop.f32.mrb[69].mxu0 }
 0x290   : > { %v2113_v63 = vmax.f32 %v1930_v56, %v1932_v62  ;;  %v1934_v0 = vpop.f32.mrb[70].mxu0  ;;  %v2420_v1 = vmax.f32 %v6725_v61, 0.0 }
 0x291   : > { %v1936_v2 = vpop.f32.mrb[71].mxu0  ;;  %v2530_v4 = vld [vmem:[#allocation3 + $0x69] sm:$0xff] }
 0x292   : > { %2177 = vst [vmem:[#allocation2 + $0x110] sm:$0xff] %v2113_v63  ;;  %v2114_v5 = vmax.f32 %v1934_v0, %v1936_v2  ;;  %v2555_v7 = vpack.c.bf16 %v2530_v4, %v2529_v3  ;;  %2452 = vst [vmem:[#allocation3 + $0x78] sm:$0xff] %v2420_v1  ;;  %v2508_v45 = vpack.c.bf16 %v2420_v1, %v2419_v54 }
 0x293   : > { %v2239_v10 = vld [vmem:[#allocation2 + $0x100] ss:$2 sm:$0xff]  ;;  %v2303_v11 = vld [vmem:[#allocation2 + $0x101] ss:$2 sm:$0xff] }
 0x294   : > { %v2350_v15 = vmax.f32 %v2239_v10, %v2303_v11  ;;  %2178 = vst [vmem:[#allocation2 + $0x118] sm:$0xff] %v2114_v5  ;;  %3281 = vmatprep.mubr.bf16.mxu1 %v2555_v7 }
 0x295   : > { %3282 = vmatmul.mubr.bf16.gmra.mrb[24].mxu1 %v2507_v12 }
 0x296   : > { %v6731_v16 = vadd.f32 %v6635_v6, %v2350_v15  ;;  %v1940_v17 = vpop.f32.mrb[72].mxu0 }
 0x297   : > { %v1942_v20 = vpop.f32.mrb[73].mxu0 }
 0x298   : > { %v2421_v24 = vmax.f32 %v6731_v16, 0.0  ;;  %v2115_v27 = vmax.f32 %v1940_v17, %v1942_v20  ;;  %v1944_v18 = vpop.f32.mrb[74].mxu0 }
 0x299   : > { %v1946_v26 = vpop.f32.mrb[75].mxu0  ;;  %v2531_v39 = vld [vmem:[#allocation3 + $0x71] sm:$0xff] }
 0x29a   : > { %2453 = vst [vmem:[#allocation3 + $0x80] sm:$0xff] %v2421_v24  ;;  %2179 = vst [vmem:[#allocation2 + $0x120] sm:$0xff] %v2115_v27  ;;  %v2116_v29 = vmax.f32 %v1944_v18, %v1946_v26 }
 0x29b   : > { %v2241_v28 = vld [vmem:[#allocation2 + $0x110] ss:$2 sm:$0xff]  ;;  %v2305_v31 = vld [vmem:[#allocation2 + $0x111] ss:$2 sm:$0xff] }
 0x29c   : > { %v2351_v25 = vmax.f32 %v2241_v28, %v2305_v31  ;;  %2180 = vst [vmem:[#allocation2 + $0x128] sm:$0xff] %v2116_v29 }
 0x29e   : > { %v2390_v32 = vadd.f32 %v6635_v6, %v2351_v25  ;;  %v1950_v14 = vpop.f32.mrb[76].mxu0 }
 0x29f   : > { %v1952_v33 = vpop.f32.mrb[77].mxu0 }
 0x2a0   : > { %v2422_v35 = vmax.f32 %v2390_v32, 0.0  ;;  %v2117_v36 = vmax.f32 %v1950_v14, %v1952_v33  ;;  %v1954_v37 = vpop.f32.mrb[78].mxu0 }
 0x2a1   : > { %v1956_v38 = vpop.f32.mrb[79].mxu0  ;;  %v2532_v40 = vld [vmem:[#allocation3 + $0x79] sm:$0xff] }
 0x2a2   : > { %2454 = vst [vmem:[#allocation3 + $0x88] sm:$0xff] %v2422_v35  ;;  %2181 = vst [vmem:[#allocation2 + $0x130] sm:$0xff] %v2117_v36  ;;  %v2118_v41 = vmax.f32 %v1954_v37, %v1956_v38  ;;  %v2556_v42 = vpack.c.bf16 %v2532_v40, %v2531_v39  ;;  %v2509_v8 = vpack.c.bf16 %v2422_v35, %v2421_v24 }
 0x2a3   : > { %v2243_v43 = vld [vmem:[#allocation2 + $0x120] ss:$2 sm:$0xff]  ;;  %v2307_v44 = vld [vmem:[#allocation2 + $0x121] ss:$2 sm:$0xff] }
 0x2a4   : > { %v2352_v46 = vmax.f32 %v2243_v43, %v2307_v44  ;;  %2182 = vst [vmem:[#allocation2 + $0x138] sm:$0xff] %v2118_v41  ;;  %3291 = vmatprep.mubr.bf16.mxu1 %v2556_v42 }
 0x2a5   : > { %3292 = vmatmul.mubr.bf16.gmra.mrb[28].mxu1 %v2508_v45 }
 0x2a6   : > { %v6740_v48 = vadd.f32 %v6635_v6, %v2352_v46  ;;  %v1960_v49 = vpop.f32.mrb[80].mxu0 }
 0x2a7   : > { %v1962_v51 = vpop.f32.mrb[81].mxu0 }
 0x2a8   : > { %v2423_v52 = vmax.f32 %v6740_v48, 0.0  ;;  %v2119_v55 = vmax.f32 %v1960_v49, %v1962_v51  ;;  %v1964_v58 = vpop.f32.mrb[82].mxu0 }
 0x2a9   : > { %v1966_v50 = vpop.f32.mrb[83].mxu0  ;;  %v2533_v1 = vld [vmem:[#allocation3 + $0x81] sm:$0xff] }
 0x2aa   : > { %2455 = vst [vmem:[#allocation3 + $0x90] sm:$0xff] %v2423_v52  ;;  %2183 = vst [vmem:[#allocation2 + $0x140] sm:$0xff] %v2119_v55  ;;  %v2120_v57 = vmax.f32 %v1964_v58, %v1966_v50 }
 0x2ab   : > { %v2245_v47 = vld [vmem:[#allocation2 + $0x130] ss:$2 sm:$0xff]  ;;  %v2309_v54 = vld [vmem:[#allocation2 + $0x131] ss:$2 sm:$0xff] }
 0x2ac   : > { %v2353_v60 = vmax.f32 %v2245_v47, %v2309_v54  ;;  %2184 = vst [vmem:[#allocation2 + $0x148] sm:$0xff] %v2120_v57 }
 0x2ae   : > { %v2392_v53 = vadd.f32 %v6635_v6, %v2353_v60  ;;  %v1970_v59 = vpop.f32.mrb[84].mxu0 }
 0x2af   : > { %v1972_v61 = vpop.f32.mrb[85].mxu0 }
 0x2b0   : > { %v2424_v56 = vmax.f32 %v2392_v53, 0.0  ;;  %v2121_v62 = vmax.f32 %v1970_v59, %v1972_v61  ;;  %v1974_v63 = vpop.f32.mrb[86].mxu0 }
 0x2b1   : > { %v1976_v0 = vpop.f32.mrb[87].mxu0  ;;  %v2534_v2 = vld [vmem:[#allocation3 + $0x89] sm:$0xff] }
 0x2b2   : > { %2456 = vst [vmem:[#allocation3 + $0x98] sm:$0xff] %v2424_v56  ;;  %2185 = vst [vmem:[#allocation2 + $0x150] sm:$0xff] %v2121_v62  ;;  %v2122_v3 = vmax.f32 %v1974_v63, %v1976_v0  ;;  %v2557_v4 = vpack.c.bf16 %v2534_v2, %v2533_v1  ;;  %v2510_v34 = vpack.c.bf16 %v2424_v56, %v2423_v52 }
 0x2b3   : > { %v2247_v5 = vld [vmem:[#allocation2 + $0x140] ss:$2 sm:$0xff]  ;;  %v2311_v7 = vld [vmem:[#allocation2 + $0x141] ss:$2 sm:$0xff] }
 0x2b4   : > { %v2354_v9 = vmax.f32 %v2247_v5, %v2311_v7  ;;  %2186 = vst [vmem:[#allocation2 + $0x158] sm:$0xff] %v2122_v3  ;;  %3301 = vmatprep.mubr.bf16.mxu1 %v2557_v4 }
 0x2b5   : > { %3302 = vmatmul.mubr.bf16.gmra.mrb[32].mxu1 %v2509_v8 }
 0x2b6   : > { %v6747_v10 = vadd.f32 %v6635_v6, %v2354_v9  ;;  %v1980_v11 = vpop.f32.mrb[88].mxu0 }
 0x2b7   : > { %v1982_v12 = vpop.f32.mrb[89].mxu0 }
 0x2b8   : > { %v2425_v13 = vmax.f32 %v6747_v10, 0.0  ;;  %v2123_v15 = vmax.f32 %v1980_v11, %v1982_v12  ;;  %v1984_v17 = vpop.f32.mrb[90].mxu0  ;;  %v6763_v10 = vld [vmem:[%s6871_s2] ss:$0 sm:$0xff] }
 0x2b9   : > { %v1986_v19 = vpop.f32.mrb[91].mxu0  ;;  %v2535_v25 = vld [vmem:[#allocation3 + $0x91] sm:$0xff] }
 0x2ba   : > { %2457 = vst [vmem:[#allocation3 + $0xa0] sm:$0xff] %v2425_v13  ;;  %2187 = vst [vmem:[#allocation2 + $0x160] sm:$0xff] %v2123_v15  ;;  %v2124_v20 = vmax.f32 %v1984_v17, %v1986_v19 }
 0x2bb   : > { %v2249_v23 = vld [vmem:[#allocation2 + $0x150] ss:$2 sm:$0xff]  ;;  %v2313_v16 = vld [vmem:[#allocation2 + $0x151] ss:$2 sm:$0xff] }
 0x2bc   : > { %v2355_v24 = vmax.f32 %v2249_v23, %v2313_v16  ;;  %2188 = vst [vmem:[#allocation2 + $0x168] sm:$0xff] %v2124_v20 }
 0x2be   : > { %v2394_v27 = vadd.f32 %v6635_v6, %v2355_v24  ;;  %v1990_v18 = vpop.f32.mrb[92].mxu0 }
 0x2bf   : > { %v1992_v26 = vpop.f32.mrb[93].mxu0 }
 0x2c0   : > { %v2426_v29 = vmax.f32 %v2394_v27, 0.0  ;;  %v2125_v21 = vmax.f32 %v1990_v18, %v1992_v26  ;;  %v1994_v28 = vpop.f32.mrb[94].mxu0 }
 0x2c1   : > { %v1996_v31 = vpop.f32.mrb[95].mxu0  ;;  %v2536_v30 = vld [vmem:[#allocation3 + $0x99] sm:$0xff] }
 0x2c2   : > { %2458 = vst [vmem:[#allocation3 + $0xa8] sm:$0xff] %v2426_v29  ;;  %2189 = vst [vmem:[#allocation2 + $0x170] sm:$0xff] %v2125_v21  ;;  %v2126_v32 = vmax.f32 %v1994_v28, %v1996_v31  ;;  %v2558_v14 = vpack.c.bf16 %v2536_v30, %v2535_v25  ;;  %v2511_v61 = vpack.c.bf16 %v2426_v29, %v2425_v13 }
 0x2c3   : > { %v2251_v22 = vld [vmem:[#allocation2 + $0x160] ss:$2 sm:$0xff]  ;;  %v2315_v33 = vld [vmem:[#allocation2 + $0x161] ss:$2 sm:$0xff] }
 0x2c4   : > { %v2356_v35 = vmax.f32 %v2251_v22, %v2315_v33  ;;  %2190 = vst [vmem:[#allocation2 + $0x178] sm:$0xff] %v2126_v32  ;;  %3311 = vmatprep.mubr.bf16.mxu1 %v2558_v14 }
 0x2c5   : > { %3312 = vmatmul.mubr.bf16.gmra.mrb[36].mxu1 %v2510_v34 }
 0x2c6   : > { %v6752_v36 = vadd.f32 %v6635_v6, %v2356_v35  ;;  %v2000_v37 = vpop.f32.mrb[96].mxu0 }
 0x2c7   : > { %v2002_v38 = vpop.f32.mrb[97].mxu0 }
 0x2c8   : > { %v2427_v39 = vmax.f32 %v6752_v36, 0.0  ;;  %v2127_v40 = vmax.f32 %v2000_v37, %v2002_v38  ;;  %v2004_v41 = vpop.f32.mrb[98].mxu0 }
 0x2c9   : > { %v2006_v42 = vpop.f32.mrb[99].mxu0  ;;  %v2537_v57 = vld [vmem:[#allocation3 + $0xa1] sm:$0xff] }
 0x2ca   : > { %2459 = vst [vmem:[#allocation3 + $0xb0] sm:$0xff] %v2427_v39  ;;  %2191 = vst [vmem:[#allocation2 + $0x180] sm:$0xff] %v2127_v40  ;;  %v2128_v43 = vmax.f32 %v2004_v41, %v2006_v42 }
 0x2cb   : > { %v2253_v44 = vld [vmem:[#allocation2 + $0x170] ss:$2 sm:$0xff]  ;;  %v2317_v45 = vld [vmem:[#allocation2 + $0x171] ss:$2 sm:$0xff] }
 0x2cc   : > { %v2357_v46 = vmax.f32 %v2253_v44, %v2317_v45  ;;  %2192 = vst [vmem:[#allocation2 + $0x188] sm:$0xff] %v2128_v43 }
 0x2ce   : > { %v2396_v48 = vadd.f32 %v6635_v6, %v2357_v46  ;;  %v2010_v49 = vpop.f32.mrb[100].mxu0 }
 0x2cf   : > { %v2012_v51 = vpop.f32.mrb[101].mxu0 }
 0x2d0   : > { %v2428_v52 = vmax.f32 %v2396_v48, 0.0  ;;  %v2129_v55 = vmax.f32 %v2010_v49, %v2012_v51  ;;  %v2014_v58 = vpop.f32.mrb[102].mxu0 }
 0x2d1   : > { %v2016_v50 = vpop.f32.mrb[103].mxu0  ;;  %v2538_v47 = vld [vmem:[#allocation3 + $0xa9] sm:$0xff] }
 0x2d2   : > { %2460 = vst [vmem:[#allocation3 + $0xb8] sm:$0xff] %v2428_v52  ;;  %2193 = vst [vmem:[#allocation2 + $0x190] sm:$0xff] %v2129_v55  ;;  %v2130_v54 = vmax.f32 %v2014_v58, %v2016_v50  ;;  %v2559_v60 = vpack.c.bf16 %v2538_v47, %v2537_v57  ;;  %v2512_v26 = vpack.c.bf16 %v2428_v52, %v2427_v39 }
 0x2d3   : > { %v2255_v53 = vld [vmem:[#allocation2 + $0x180] ss:$2 sm:$0xff]  ;;  %v2319_v59 = vld [vmem:[#allocation2 + $0x181] ss:$2 sm:$0xff] }
 0x2d4   : > { %v2358_v56 = vmax.f32 %v2255_v53, %v2319_v59  ;;  %2194 = vst [vmem:[#allocation2 + $0x198] sm:$0xff] %v2130_v54  ;;  %3321 = vmatprep.mubr.bf16.mxu1 %v2559_v60 }
 0x2d5   : > { %3322 = vmatmul.mubr.bf16.gmra.mrb[40].mxu1 %v2511_v61 }
 0x2d6   : > { %v6757_v62 = vadd.f32 %v6635_v6, %v2358_v56  ;;  %v2020_v63 = vpop.f32.mrb[104].mxu0 }
 0x2d7   : > { %v2022_v0 = vpop.f32.mrb[105].mxu0 }
 0x2d8   : > { %v2429_v1 = vmax.f32 %v6757_v62, 0.0  ;;  %v2131_v2 = vmax.f32 %v2020_v63, %v2022_v0  ;;  %v2024_v3 = vpop.f32.mrb[106].mxu0 }
 0x2d9   : > { %v2026_v4 = vpop.f32.mrb[107].mxu0  ;;  %v2539_v20 = vld [vmem:[#allocation3 + $0xb1] sm:$0xff] }
 0x2da   : > { %2461 = vst [vmem:[#allocation3 + $0xc0] sm:$0xff] %v2429_v1  ;;  %2195 = vst [vmem:[#allocation2 + $0x1a0] sm:$0xff] %v2131_v2  ;;  %v2132_v5 = vmax.f32 %v2024_v3, %v2026_v4 }
 0x2db   : > { %v2257_v7 = vld [vmem:[#allocation2 + $0x190] ss:$2 sm:$0xff]  ;;  %v2321_v8 = vld [vmem:[#allocation2 + $0x191] ss:$2 sm:$0xff] }
 0x2dc   : > { %v2359_v9 = vmax.f32 %v2257_v7, %v2321_v8  ;;  %2196 = vst [vmem:[#allocation2 + $0x1a8] sm:$0xff] %v2132_v5 }
 0x2de   : > { %v2398_v6 = vadd.f32 %v6763_v10, %v2359_v9  ;;  %v2030_v11 = vpop.f32.mrb[108].mxu0 }
 0x2df   : > { %v2032_v12 = vpop.f32.mrb[109].mxu0 }
 0x2e0   : > { %v2430_v13 = vmax.f32 %v2398_v6, 0.0  ;;  %v2133_v15 = vmax.f32 %v2030_v11, %v2032_v12  ;;  %v2034_v17 = vpop.f32.mrb[110].mxu0 }
 0x2e1   : > { %v2036_v19 = vpop.f32.mrb[111].mxu0  ;;  %v2540_v23 = vld [vmem:[#allocation3 + $0xb9] sm:$0xff] }
 0x2e2   : > { %2462 = vst [vmem:[#allocation3 + $0xc8] sm:$0xff] %v2430_v13  ;;  %2197 = vst [vmem:[#allocation2 + $0x1b0] sm:$0xff] %v2133_v15  ;;  %v2134_v16 = vmax.f32 %v2034_v17, %v2036_v19  ;;  %v2560_v24 = vpack.c.bf16 %v2540_v23, %v2539_v20  ;;  %v2513_v51 = vpack.c.bf16 %v2430_v13, %v2429_v1 }
 0x2e3   : > { %v2259_v27 = vld [vmem:[#allocation2 + $0x1a0] ss:$2 sm:$0xff]  ;;  %v2323_v18 = vld [vmem:[#allocation2 + $0x1a1] ss:$2 sm:$0xff] }
 0x2e4   : > { %v2360_v29 = vmax.f32 %v2259_v27, %v2323_v18  ;;  %2198 = vst [vmem:[#allocation2 + $0x1b8] sm:$0xff] %v2134_v16  ;;  %3331 = vmatprep.mubr.bf16.mxu1 %v2560_v24 }
 0x2e5   : > { %3332 = vmatmul.mubr.bf16.gmra.mrb[44].mxu1 %v2512_v26 }
 0x2e6   : > { %v6767_v21 = vadd.f32 %v6763_v10, %v2360_v29  ;;  %v2040_v28 = vpop.f32.mrb[112].mxu0 }
 0x2e7   : > { %v2042_v31 = vpop.f32.mrb[113].mxu0 }
 0x2e8   : > { %v2431_v25 = vmax.f32 %v6767_v21, 0.0  ;;  %v2135_v30 = vmax.f32 %v2040_v28, %v2042_v31  ;;  %v2044_v32 = vpop.f32.mrb[114].mxu0  ;;  %v2614_v21 = vld [vmem:[#allocation3 + $0xb] sm:$0xff] }
 0x2e9   : > { %v2046_v14 = vpop.f32.mrb[115].mxu0  ;;  %v2541_v43 = vld [vmem:[#allocation3 + $0xc1] sm:$0xff] }
 0x2ea   : > { %2463 = vst [vmem:[#allocation3 + $0xd0] sm:$0xff] %v2431_v25  ;;  %2199 = vst [vmem:[#allocation2 + $0x1c0] sm:$0xff] %v2135_v30  ;;  %v2136_v22 = vmax.f32 %v2044_v32, %v2046_v14  ;;  %v2613_v14 = vld [vmem:[#allocation3 + $0x3] sm:$0xff] }
 0x2eb   : > { %v2261_v33 = vld [vmem:[#allocation2 + $0x1b0] ss:$2 sm:$0xff]  ;;  %v2325_v34 = vld [vmem:[#allocation2 + $0x1b1] ss:$2 sm:$0xff] }
 0x2ec   : > { %v2361_v35 = vmax.f32 %v2261_v33, %v2325_v34  ;;  %2200 = vst [vmem:[#allocation2 + $0x1c8] sm:$0xff] %v2136_v22  ;;  %v2645_v22 = vpack.c.bf16 %v2614_v21, %v2613_v14  ;;  %v2616_v33 = vld [vmem:[#allocation3 + $0x1b] sm:$0xff] }
 0x2ed   : > { %v5478_v34 = vld [vmem:[#allocation9 + $0x200] ss:$8 sps:$4 sm:$0xff]  }
 0x2ee   : > { %v2400_v36 = vadd.f32 %v6763_v10, %v2361_v35  ;;  %v2050_v37 = vpop.f32.mrb[116].mxu0  ;;  %v2565_v35 = vld [vmem:[#allocation3 + $0x2] sm:$0xff] }
 0x2ef   : > { %v2052_v38 = vpop.f32.mrb[117].mxu0 }
 0x2f0   : > { %v2432_v39 = vmax.f32 %v2400_v36, 0.0  ;;  %v2137_v40 = vmax.f32 %v2050_v37, %v2052_v38  ;;  %v2054_v41 = vpop.f32.mrb[118].mxu0  ;;  %v2615_v37 = vld [vmem:[#allocation3 + $0x13] sm:$0xff] }
 0x2f1   : > { %v2056_v42 = vpop.f32.mrb[119].mxu0  ;;  %v2542_v44 = vld [vmem:[#allocation3 + $0xc9] sm:$0xff]  ;;  %v5483_v38 = vld [vmem:[#allocation9 + $0x214] ss:$8 sps:$4 sm:$0xff]  }
 0x2f2   : > { %2464 = vst [vmem:[#allocation3 + $0xd8] sm:$0xff] %v2432_v39  ;;  %2201 = vst [vmem:[#allocation2 + $0x1d0] sm:$0xff] %v2137_v40  ;;  %v2138_v45 = vmax.f32 %v2054_v41, %v2056_v42  ;;  %v2561_v46 = vpack.c.bf16 %v2542_v44, %v2541_v43  ;;  %v2514_v12 = vpack.c.bf16 %v2432_v39, %v2431_v25  ;;  %v5481_v40 = vld [vmem:[#allocation9 + $0x210] ss:$8 sps:$4 sm:$0xff]   ;;  %v5486_v41 = vld [vmem:[#allocation9 + $0x224] ss:$8 sps:$4 sm:$0xff]  }
 0x2f3   : > { %v2263_v48 = vld [vmem:[#allocation2 + $0x1c0] ss:$2 sm:$0xff]  ;;  %v2327_v49 = vld [vmem:[#allocation2 + $0x1c1] ss:$2 sm:$0xff]  ;;  %v2646_v39 = vpack.c.bf16 %v2616_v33, %v2615_v37  ;;  %v2567_v44 = vld [vmem:[#allocation3 + $0x12] sm:$0xff] }
 0x2f4   : > { %v2362_v52 = vmax.f32 %v2263_v48, %v2327_v49  ;;  %2202 = vst [vmem:[#allocation2 + $0x1d8] sm:$0xff] %v2138_v45  ;;  %3341 = vmatprep.mubr.bf16.mxu1 %v2561_v46  ;;  %v2568_v42 = vld [vmem:[#allocation3 + $0x1a] sm:$0xff]  ;;  %v2618_v43 = vld [vmem:[#allocation3 + $0x2b] sm:$0xff]  ;;  %v2617_v48 = vld [vmem:[#allocation3 + $0x23] sm:$0xff] }
 0x2f5   : > { %3342 = vmatmul.mubr.bf16.gmra.mrb[48].mxu1 %v2513_v51  ;;  %v5484_v45 = vld [vmem:[#allocation9 + $0x220] ss:$8 sps:$4 sm:$0xff]   ;;  %v2598_v46 = vpack.c.bf16 %v2568_v42, %v2567_v44  ;;  %v5489_v49 = vld [vmem:[#allocation9 + $0x234] ss:$8 sps:$4 sm:$0xff]   ;;  %v2647_v51 = vpack.c.bf16 %v2618_v43, %v2617_v48 }
 0x2f6   : > { %v2401_v55 = vadd.f32 %v6763_v10, %v2362_v52  ;;  %v2060_v58 = vpop.f32.mrb[120].mxu0  ;;  %v5487_v52 = vld [vmem:[#allocation9 + $0x230] ss:$8 sps:$4 sm:$0xff]   ;;  %v2581_v33 = vld [vmem:[#allocation3 + $0x82] sm:$0xff] }
 0x2f7   : > { %v2062_v50 = vpop.f32.mrb[121].mxu0  ;;  %v2584_v37 = vld [vmem:[#allocation3 + $0x9a] sm:$0xff]  ;;  %v2586_v43 = vld [vmem:[#allocation3 + $0xaa] sm:$0xff] }
 0x2f8   : > { %v2433_v57 = vmax.f32 %v2401_v55, 0.0  ;;  %v2139_v47 = vmax.f32 %v2060_v58, %v2062_v50  ;;  %v2064_v54 = vpop.f32.mrb[122].mxu0  ;;  %v5492_v55 = vld [vmem:[#allocation9 + $0x244] ss:$8 sps:$4 sm:$0xff]   ;;  %v2620_v50 = vld [vmem:[#allocation3 + $0x3b] sm:$0xff]  ;;  %v2635_v48 = vld [vmem:[#allocation3 + $0xb3] sm:$0xff] }
 0x2f9   : > { %v2066_v60 = vpop.f32.mrb[123].mxu0  ;;  %v2543_v5 = vld [vmem:[#allocation3 + $0xd1] sm:$0xff]  ;;  %v2636_v44 = vld [vmem:[#allocation3 + $0xbb] sm:$0xff] }
 0x2fa   : > { %2465 = vst [vmem:[#allocation3 + $0xe0] sm:$0xff] %v2433_v57  ;;  %2203 = vst [vmem:[#allocation2 + $0x1e0] sm:$0xff] %v2139_v47  ;;  %v2140_v53 = vmax.f32 %v2064_v54, %v2066_v60  ;;  %v2570_v58 = vld [vmem:[#allocation3 + $0x2a] sm:$0xff]  ;;  %v2619_v60 = vld [vmem:[#allocation3 + $0x33] sm:$0xff] }
 0x2fb   : > { %v2265_v59 = vld [vmem:[#allocation2 + $0x1d0] ss:$2 sm:$0xff]  ;;  %v2329_v61 = vld [vmem:[#allocation2 + $0x1d1] ss:$2 sm:$0xff]  ;;  %v5490_v47 = vld [vmem:[#allocation9 + $0x240] ss:$8 sps:$4 sm:$0xff]  }
 0x2fc   : > { %v2363_v56 = vmax.f32 %v2265_v59, %v2329_v61  ;;  %2204 = vst [vmem:[#allocation2 + $0x1e8] sm:$0xff] %v2140_v53  ;;  %v5495_v53 = vld [vmem:[#allocation9 + $0x254] ss:$8 sps:$4 sm:$0xff]   ;;  %v2648_v59 = vpack.c.bf16 %v2620_v50, %v2619_v60  ;;  %v5493_v61 = vld [vmem:[#allocation9 + $0x250] ss:$8 sps:$4 sm:$0xff]   ;;  %v2637_v50 = vld [vmem:[#allocation3 + $0xc3] sm:$0xff] }
 0x2fd   : > { %v2589_v60 = vld [vmem:[#allocation3 + $0xc2] sm:$0xff] }
 0x2fe   : > { %v2402_v62 = vadd.f32 %v6763_v10, %v2363_v56  ;;  %v2070_v63 = vpop.f32.mrb[124].mxu0  ;;  %v5498_v56 = vld [vmem:[#allocation9 + $0x264] ss:$8 sps:$4 sm:$0xff]  }
 0x2ff   : > { %v2072_v0 = vpop.f32.mrb[125].mxu0 }
 0x300   : > { %v2434_v1 = vmax.f32 %v2402_v62, 0.0  ;;  %v2141_v2 = vmax.f32 %v2070_v63, %v2072_v0  ;;  %v2074_v3 = vpop.f32.mrb[126].mxu0  ;;  %v2572_v62 = vld [vmem:[#allocation3 + $0x3a] sm:$0xff]  ;;  %v2622_v63 = vld [vmem:[#allocation3 + $0x4b] sm:$0xff] }
 0x301   : > { %v2076_v4 = vpop.f32.mrb[127].mxu0  ;;  %v2544_v7 = vld [vmem:[#allocation3 + $0xd9] sm:$0xff] }
 0x302   : > { %2466 = vst [vmem:[#allocation3 + $0xe8] sm:$0xff] %v2434_v1  ;;  %2205 = vst [vmem:[#allocation2 + $0x1f0] sm:$0xff] %v2141_v2  ;;  %v2142_v8 = vmax.f32 %v2074_v3, %v2076_v4  ;;  %v2562_v9 = vpack.c.bf16 %v2544_v7, %v2543_v5  ;;  %v2515_v29 = vpack.c.bf16 %v2434_v1, %v2433_v57  ;;  %v2569_v57 = vld [vmem:[#allocation3 + $0x22] sm:$0xff]  ;;  %v2571_v0 = vld [vmem:[#allocation3 + $0x32] sm:$0xff] }
 0x303   : > { %v2267_v6 = vld [vmem:[#allocation2 + $0x1e0] ss:$2 sm:$0xff]  ;;  %v2331_v11 = vld [vmem:[#allocation2 + $0x1e1] ss:$2 sm:$0xff]  ;;  %v2599_v54 = vpack.c.bf16 %v2570_v58, %v2569_v57  ;;  %v2600_v2 = vpack.c.bf16 %v2572_v62, %v2571_v0  ;;  %v5501_v4 = vld [vmem:[#allocation9 + $0x274] ss:$8 sps:$4 sm:$0xff]  }
 0x304   : > { %v2364_v13 = vmax.f32 %v2267_v6, %v2331_v11  ;;  %2206 = vst [vmem:[#allocation2 + $0x1f8] sm:$0xf] %v2142_v8  ;;  %3351 = vmatprep.mubr.bf16.mxu1 %v2562_v9  ;;  %v5496_v1 = vld [vmem:[#allocation9 + $0x260] ss:$8 sps:$4 sm:$0xff]   ;;  %v5499_v7 = vld [vmem:[#allocation9 + $0x270] ss:$8 sps:$4 sm:$0xff]  }
 0x305   : > { %3352 = vmatmul.mubr.bf16.gmra.mrb[52].mxu1 %v2514_v12  ;;  %v2621_v3 = vld [vmem:[#allocation3 + $0x43] sm:$0xff]  ;;  %v2624_v9 = vld [vmem:[#allocation3 + $0x5b] sm:$0xff]  ;;  %v2623_v12 = vld [vmem:[#allocation3 + $0x53] sm:$0xff] }
 0x306   : > { %v2403_v15 = vadd.f32 %v6763_v10, %v2364_v13  ;;  %v2649_v5 = vpack.c.bf16 %v2622_v63, %v2621_v3  ;;  %v2574_v8 = vld [vmem:[#allocation3 + $0x4a] sm:$0xff]  ;;  %v2573_v6 = vld [vmem:[#allocation3 + $0x42] sm:$0xff]  ;;  %v2650_v13 = vpack.c.bf16 %v2624_v9, %v2623_v12  ;;  %v2591_v63 = vld [vmem:[#allocation3 + $0xd2] sm:$0xff] }
 0x307   : > { %v2601_v11 = vpack.c.bf16 %v2574_v8, %v2573_v6  ;;  %v5502_v3 = vld [vmem:[#allocation10 + $0x40] sm:$0xff]  }
 0x308   : > { %v2435_v17 = vmax.f32 %v2403_v15, 0.0  ;;  %v2576_v15 = vld [vmem:[#allocation3 + $0x5a] sm:$0xff]  ;;  %4993 = vmatprep.subr.bf16.mxu0 %v5502_v3 }
 0x309   : > { %v2545_v27 = vld [vmem:[#allocation3 + $0xe1] sm:$0xff] }
 0x30a   : > { %2467 = vst [vmem:[#allocation3 + $0xf0] sm:$0xff] %v2435_v17  ;;  %v2593_v9 = vld [vmem:[#allocation3 + $0xe2] sm:$0xff] }
 0x30b   : > { %v2269_v19 = vld [vmem:[#allocation2 + $0x1f0] ss:$2 sm:$0x3f]  ;;  %v2333_v20 = vld [vmem:[#allocation2 + $0x1f1] ss:$2 sm:$0x3f] }
 0x30c   : > { %v2365_v23 = vmax.f32 %v2269_v19, %v2333_v20  ;;  %v2575_v19 = vld [vmem:[#allocation3 + $0x52] sm:$0xff]  ;;  %v5511_v3 = vld [vmem:[#allocation10 + $0x20] sm:$0xff]  }
 0x30d   : > { %v2602_v20 = vpack.c.bf16 %v2576_v15, %v2575_v19  ;;  %v5505_v19 = vld [vmem:[#allocation10 + $0x8] sm:$0xff]  }
 0x30e   : > { %v2404_v16 = vadd.f32 %v6763_v10, %v2365_v23  ;;  %v2566_v10 = vld [vmem:[#allocation3 + $0xa] sm:$0xff] }
 0x30f   : > { %v2597_v36 = vpack.c.bf16 %v2566_v10, %v2565_v35  ;;  %v2625_v23 = vld [vmem:[#allocation3 + $0x63] sm:$0xff]  ;;  %v2632_v10 = vld [vmem:[#allocation3 + $0x9b] sm:$0xff]  ;;  %v2631_v35 = vld [vmem:[#allocation3 + $0x93] sm:$0xff] }
 0x310   : > { %v2436_v24 = vmax.f32 %v2404_v16, 0.0 }
 0x311   : > { %v2546_v18 = vld [vmem:[#allocation3 + $0xe9] sm:$0xff] }
 0x312   : > { %2468 = vst [vmem:[#allocation3 + $0xf8] sm:$0x3f] %v2436_v24  ;;  %v2563_v26 = vpack.c.bf16 %v2546_v18, %v2545_v27  ;;  %v2578_v24 = vld [vmem:[#allocation3 + $0x6a] sm:$0xff]  ;;  %v2628_v27 = vld [vmem:[#allocation3 + $0x7b] sm:$0xff] }
 0x313   : > { %v2577_v18 = vld [vmem:[#allocation3 + $0x62] sm:$0xff]  ;;  %v2642_v62 = vld [vmem:[#allocation3 + $0xeb] sm:$0xff] }
 0x314   : > { %3361 = vmatprep.mubr.bf16.mxu1 %v2563_v26  ;;  %v2603_v26 = vpack.c.bf16 %v2578_v24, %v2577_v18  ;;  %v5507_v24 = vld [vmem:[#allocation10 + $0x10] sm:$0xff]   ;;  %v2661_v18 = vld [vmem:[#allocation3 + $0x4] sm:$0xff] }
 0x315   : > { %3362 = vmatmul.mubr.bf16.gmra.mrb[56].mxu1 %v2515_v29  ;;  %v2627_v29 = vld [vmem:[#allocation3 + $0x73] sm:$0xff] }
 0x316   : > { %v2652_v21 = vpack.c.bf16 %v2628_v27, %v2627_v29  ;;  %v5508_v27 = vld [vmem:[#allocation10 + $0x58] sm:$0xff]  }
 0x317   : > { %v5509_v29 = vld [vmem:[#allocation10 + $0x18] sm:$0xff]  }
 0x319   : > { %v2547_v28 = vld [vmem:[#allocation3 + $0xf1] sm:$0xff]  ;;  %v2548_v31 = vld [vmem:[#allocation3 + $0xf9] sm:$0xf] }
 0x31a   : > { %v2500_v25 = vld [vmem:[#allocation3 + $0xf8] sm:$0xf]  ;;  %v2564_v30 = vpack.c.bf16 %v2548_v31, %v2547_v28  ;;  %v2630_v31 = vld [vmem:[#allocation3 + $0x8b] sm:$0xff] }
 0x31b   : > { %v2516_v32 = vpack.c.bf16 %v2500_v25, %v2435_v17  ;;  %v2626_v17 = vld [vmem:[#allocation3 + $0x6b] sm:$0xff]  ;;  %v2580_v28 = vld [vmem:[#allocation3 + $0x7a] sm:$0xff] }
 0x31c   : > { %3371 = vmatprep.mubr.bf16.mxu1 %v2564_v30  ;;  %v2651_v16 = vpack.c.bf16 %v2626_v17, %v2625_v23  ;;  %v2579_v25 = vld [vmem:[#allocation3 + $0x72] sm:$0xff]  ;;  %v2644_v8 = vld [vmem:[#allocation3 + $0xfb] sm:$0xf]  ;;  %v5504_v17 = vld [vmem:[#allocation10 + $0x48] sm:$0xff]   ;;  %v5790_v23 = vmov 0  }
 0x31d   : > { %3372 = vmatmul.mubr.bf16.gmra.mrb[60].mxu1 %v2516_v32  ;;  %v2604_v30 = vpack.c.bf16 %v2580_v28, %v2579_v25  ;;  %v2629_v32 = vld [vmem:[#allocation3 + $0x83] sm:$0xff]  ;;  %v2595_v12 = vld [vmem:[#allocation3 + $0xf2] sm:$0xff] }
 0x31e   : > { %3414 = vmatprep.mubr.bf16.mxu1 %v2645_v22  ;;  %v2653_v14 = vpack.c.bf16 %v2630_v31, %v2629_v32  ;;  %v2582_v22 = vld [vmem:[#allocation3 + $0x8a] sm:$0xff]  ;;  %v2663_v28 = vld [vmem:[#allocation3 + $0x14] sm:$0xff] }
 0x31f   : > { %v2666_v25 = vld [vmem:[#allocation3 + $0x2c] sm:$0xff] }
 0x325   : > { %3415 = vmatmul.mubr.bf16.vlgmr.msra.gmra.mrb[0].mxu1 %v2597_v36  ;;  %v2654_v36 = vpack.c.bf16 %v2632_v10, %v2631_v35 }
 0x326   : > { %3576 = vmatpush1.bf16.msra.mxu1 %v5478_v34  ;;  %3424 = vmatprep.mubr.bf16.mxu1 %v2646_v39  ;;  %v2605_v34 = vpack.c.bf16 %v2582_v22, %v2581_v33  ;;  %v2583_v39 = vld [vmem:[#allocation3 + $0x92] sm:$0xff] }
 0x327   : > { %3577 = vmatprep.subr.bf16.mxu1 %v5483_v38  ;;  %v2634_v38 = vld [vmem:[#allocation3 + $0xab] sm:$0xff]  ;;  %v2667_v22 = vld [vmem:[#allocation3 + $0x34] sm:$0xff] }
 0x328   : > { %v2670_v33 = vld [vmem:[#allocation3 + $0x4c] sm:$0xff] }
 0x32a   : > { %3578 = vmatpush1.bf16.msra.mxu1 %v5481_v40  ;;  %v2606_v40 = vpack.c.bf16 %v2584_v37, %v2583_v39  ;;  %v2671_v37 = vld [vmem:[#allocation3 + $0x54] sm:$0xff]  ;;  %v2674_v39 = vld [vmem:[#allocation3 + $0x6c] sm:$0xff] }
 0x32b   : > { %3579 = vmatprep.subr.bf16.mxu1 %v5486_v41  ;;  %v2633_v41 = vld [vmem:[#allocation3 + $0xa3] sm:$0xff] }
 0x32c   : > { %v2655_v42 = vpack.c.bf16 %v2634_v38, %v2633_v41 }
 0x32d   : > { %3425 = vmatmul.mubr.bf16.gmra.mrb[4].mxu1 %v2598_v46 }
 0x32e   : > { %3434 = vmatprep.mubr.bf16.mxu1 %v2647_v51  ;;  %3580 = vmatpush1.bf16.msra.mxu1 %v5484_v45  ;;  %v2585_v45 = vld [vmem:[#allocation3 + $0xa2] sm:$0xff]  ;;  %v2588_v51 = vld [vmem:[#allocation3 + $0xba] sm:$0xff] }
 0x32f   : > { %3581 = vmatprep.subr.bf16.mxu1 %v5489_v49  ;;  %v2607_v46 = vpack.c.bf16 %v2586_v43, %v2585_v45  ;;  %v2656_v49 = vpack.c.bf16 %v2636_v44, %v2635_v48  ;;  %v2675_v43 = vld [vmem:[#allocation3 + $0x74] sm:$0xff]  ;;  %v2678_v45 = vld [vmem:[#allocation3 + $0x8c] sm:$0xff] }
 0x332   : > { %3582 = vmatpush1.bf16.msra.mxu1 %v5487_v52  ;;  %v2638_v52 = vld [vmem:[#allocation3 + $0xcb] sm:$0xff] }
 0x333   : > { %3583 = vmatprep.subr.bf16.mxu1 %v5492_v55  ;;  %v2587_v55 = vld [vmem:[#allocation3 + $0xb2] sm:$0xff]  ;;  %v2657_v57 = vpack.c.bf16 %v2638_v52, %v2637_v50 }
 0x334   : > { %v2608_v58 = vpack.c.bf16 %v2588_v51, %v2587_v55  ;;  %v2679_v51 = vld [vmem:[#allocation3 + $0x94] sm:$0xff]  ;;  %v2682_v55 = vld [vmem:[#allocation3 + $0xac] sm:$0xff] }
 0x335   : > { %3435 = vmatmul.mubr.bf16.gmra.mrb[8].mxu1 %v2599_v54  ;;  %v2640_v54 = vld [vmem:[#allocation3 + $0xdb] sm:$0xff] }
 0x336   : > { %3444 = vmatprep.mubr.bf16.mxu1 %v2648_v59  ;;  %3584 = vmatpush1.bf16.msra.mxu1 %v5490_v47  ;;  %v2590_v47 = vld [vmem:[#allocation3 + $0xca] sm:$0xff]  ;;  %v2639_v59 = vld [vmem:[#allocation3 + $0xd3] sm:$0xff] }
 0x337   : > { %3585 = vmatprep.subr.bf16.mxu1 %v5495_v53  ;;  %v2609_v53 = vpack.c.bf16 %v2590_v47, %v2589_v60  ;;  %v2683_v47 = vld [vmem:[#allocation3 + $0xb4] sm:$0xff]  ;;  %v2686_v60 = vld [vmem:[#allocation3 + $0xcc] sm:$0xff] }
 0x33a   : > { %3586 = vmatpush1.bf16.msra.mxu1 %v5493_v61  ;;  %v2658_v61 = vpack.c.bf16 %v2640_v54, %v2639_v59 }
 0x33b   : > { %3587 = vmatprep.subr.bf16.mxu1 %v5498_v56  ;;  %v2592_v56 = vld [vmem:[#allocation3 + $0xda] sm:$0xff] }
 0x33c   : > { %v2610_v0 = vpack.c.bf16 %v2592_v56, %v2591_v63  ;;  %v2687_v56 = vld [vmem:[#allocation3 + $0xd4] sm:$0xff]  ;;  %v2690_v63 = vld [vmem:[#allocation3 + $0xec] sm:$0xff] }
 0x33d   : > { %3445 = vmatmul.mubr.bf16.gmra.mrb[12].mxu1 %v2600_v2 }
 0x33e   : > { %3454 = vmatprep.mubr.bf16.mxu1 %v2649_v5  ;;  %3588 = vmatpush1.bf16.msra.mxu1 %v5496_v1  ;;  %v2641_v1 = vld [vmem:[#allocation3 + $0xe3] sm:$0xff] }
 0x33f   : > { %3589 = vmatprep.subr.bf16.mxu1 %v5501_v4  ;;  %v2659_v2 = vpack.c.bf16 %v2642_v62, %v2641_v1  ;;  %v5503_v4 = vld [vmem:[#allocation10] sm:$0xff]   ;;  %v2594_v5 = vld [vmem:[#allocation3 + $0xea] sm:$0xff] }
 0x340   : > { %4994 = vmatpush3.bf16.msra.mxu0 %v5503_v4  ;;  %v2611_v6 = vpack.c.bf16 %v2594_v5, %v2593_v9  ;;  %v2689_v1 = vld [vmem:[#allocation3 + $0xe4] sm:$0xff]  ;;  %v2691_v4 = vld [vmem:[#allocation3 + $0xf4] sm:$0xff]  ;;  %v2692_v5 = vld [vmem:[#allocation3 + $0xfc] sm:$0xf] }
 0x341   : > { %4995 = vmatprep.subr.bf16.mxu0 %v5504_v17  ;;  %v5513_v9 = vld [vmem:[#allocation10 + $0x28] sm:$0xff]  }
 0x342   : > { %3590 = vmatpush1.bf16.msra.mxu1 %v5499_v7  ;;  %v2643_v7 = vld [vmem:[#allocation3 + $0xf3] sm:$0xff] }
 0x344   : > { %4996 = vmatpush3.bf16.msra.mxu0 %v5505_v19 }
 0x345   : > { %3455 = vmatmul.mubr.bf16.gmra.mrb[16].mxu1 %v2601_v11  ;;  %v2660_v11 = vpack.c.bf16 %v2644_v8, %v2643_v7  ;;  %v2708_v7 = vpack.c.bf16 %v2692_v5, %v2691_v4  ;;  %v5512_v8 = vld [vmem:[#allocation10 + $0x68] sm:$0xff]  }
 0x346   : > { %3464 = vmatprep.mubr.bf16.mxu1 %v2650_v13  ;;  %v2596_v13 = vld [vmem:[#allocation3 + $0xfa] sm:$0xf] }
 0x347   : > { %v2612_v15 = vpack.c.bf16 %v2596_v13, %v2595_v12  ;;  %v5516_v12 = vld [vmem:[#allocation10 + $0x78] sm:$0xff]  }
 0x348   : > { %v5517_v13 = vld [vmem:[#allocation10 + $0x38] sm:$0xff]  }
 0x34d   : > { %3465 = vmatmul.mubr.bf16.gmra.mrb[20].mxu1 %v2602_v20  ;;  %v5506_v20 = vld [vmem:[#allocation10 + $0x50] sm:$0xff]  }
 0x34e   : > { %3474 = vmatprep.mubr.bf16.mxu1 %v2651_v16  ;;  %v2662_v16 = vld [vmem:[#allocation3 + $0xc] sm:$0xff]  ;;  %4997 = vmatprep.subr.bf16.mxu0 %v5506_v20 }
 0x34f   : > { %4998 = vmatpush3.bf16.msra.mxu0 %v5507_v24 }
 0x350   : > { %4999 = vmatprep.subr.bf16.mxu0 %v5508_v27 }
 0x353   : > { %5000 = vmatpush3.bf16.msra.mxu0 %v5509_v29 }
 0x355   : > { %3475 = vmatmul.mubr.bf16.gmra.mrb[24].mxu1 %v2603_v26  ;;  %v2693_v26 = vpack.c.bf16 %v2662_v16, %v2661_v18 }
 0x356   : > { %3484 = vmatprep.mubr.bf16.mxu1 %v2652_v21  ;;  %v2664_v21 = vld [vmem:[#allocation3 + $0x1c] sm:$0xff] }
 0x357   : > { %v2694_v31 = vpack.c.bf16 %v2664_v21, %v2663_v28 }
 0x35d   : > { %3485 = vmatmul.mubr.bf16.gmra.mrb[28].mxu1 %v2604_v30  ;;  %v2665_v30 = vld [vmem:[#allocation3 + $0x24] sm:$0xff] }
 0x35e   : > { %3494 = vmatprep.mubr.bf16.mxu1 %v2653_v14  ;;  %v2695_v32 = vpack.c.bf16 %v2666_v25, %v2665_v30  ;;  %v2668_v14 = vld [vmem:[#allocation3 + $0x3c] sm:$0xff] }
 0x35f   : > { %v2696_v10 = vpack.c.bf16 %v2668_v14, %v2667_v22  ;;  %v6794_v25 = vld [vmem:[%s6873_s4] ss:$0 sm:$0xff] }
 0x365   : > { %3495 = vmatmul.mubr.bf16.gmra.mrb[32].mxu1 %v2605_v34  ;;  %v2669_v34 = vld [vmem:[#allocation3 + $0x44] sm:$0xff] }
 0x366   : > { %3504 = vmatprep.mubr.bf16.mxu1 %v2654_v36  ;;  %v2697_v35 = vpack.c.bf16 %v2670_v33, %v2669_v34  ;;  %v2672_v36 = vld [vmem:[#allocation3 + $0x5c] sm:$0xff] }
 0x367   : > { %v2698_v38 = vpack.c.bf16 %v2672_v36, %v2671_v37 }
 0x36d   : > { %3505 = vmatmul.mubr.bf16.gmra.mrb[36].mxu1 %v2606_v40  ;;  %v2673_v40 = vld [vmem:[#allocation3 + $0x64] sm:$0xff] }
 0x36e   : > { %3514 = vmatprep.mubr.bf16.mxu1 %v2655_v42  ;;  %v2699_v41 = vpack.c.bf16 %v2674_v39, %v2673_v40  ;;  %v2676_v42 = vld [vmem:[#allocation3 + $0x7c] sm:$0xff] }
 0x36f   : > { %v2700_v44 = vpack.c.bf16 %v2676_v42, %v2675_v43  ;;  %v5518_v42 = vld [vmem:[#allocation10 + $0xc0] sm:$0xff]  }
 0x375   : > { %3515 = vmatmul.mubr.bf16.gmra.mrb[40].mxu1 %v2607_v46  ;;  %v2677_v46 = vld [vmem:[#allocation3 + $0x84] sm:$0xff] }
 0x376   : > { %3524 = vmatprep.mubr.bf16.mxu1 %v2656_v49  ;;  %v2701_v48 = vpack.c.bf16 %v2678_v45, %v2677_v46  ;;  %v2680_v49 = vld [vmem:[#allocation3 + $0x9c] sm:$0xff] }
 0x377   : > { %v2702_v52 = vpack.c.bf16 %v2680_v49, %v2679_v51 }
 0x37d   : > { %3525 = vmatmul.mubr.bf16.gmra.mrb[44].mxu1 %v2608_v58  ;;  %v2681_v58 = vld [vmem:[#allocation3 + $0xa4] sm:$0xff] }
 0x37e   : > { %3534 = vmatprep.mubr.bf16.mxu1 %v2657_v57  ;;  %v2703_v50 = vpack.c.bf16 %v2682_v55, %v2681_v58  ;;  %v2684_v57 = vld [vmem:[#allocation3 + $0xbc] sm:$0xff] }
 0x37f   : > { %v2704_v54 = vpack.c.bf16 %v2684_v57, %v2683_v47 }
 0x385   : > { %3535 = vmatmul.mubr.bf16.gmra.mrb[48].mxu1 %v2609_v53  ;;  %v2685_v53 = vld [vmem:[#allocation3 + $0xc4] sm:$0xff] }
 0x386   : > { %3544 = vmatprep.mubr.bf16.mxu1 %v2658_v61  ;;  %v2705_v59 = vpack.c.bf16 %v2686_v60, %v2685_v53  ;;  %v2688_v61 = vld [vmem:[#allocation3 + $0xdc] sm:$0xff] }
 0x387   : > { %v2706_v62 = vpack.c.bf16 %v2688_v61, %v2687_v56 }
 0x38d   : > { %3545 = vmatmul.mubr.bf16.gmra.mrb[52].mxu1 %v2610_v0  ;;  %v5510_v0 = vld [vmem:[#allocation10 + $0x60] sm:$0xff]  }
 0x38e   : > { %3554 = vmatprep.mubr.bf16.mxu1 %v2659_v2  ;;  %5001 = vmatprep.subr.bf16.mxu0 %v5510_v0  ;;  %v2707_v2 = vpack.c.bf16 %v2690_v63, %v2689_v1 }
 0x38f   : > { %5002 = vmatpush3.bf16.msra.mxu0 %v5511_v3 }
 0x390   : > { %5003 = vmatprep.subr.bf16.mxu0 %v5512_v8 }
 0x393   : > { %5004 = vmatpush3.bf16.msra.mxu0 %v5513_v9 }
 0x395   : > { %3555 = vmatmul.mubr.bf16.gmra.mrb[56].mxu1 %v2611_v6  ;;  %v5514_v6 = vld [vmem:[#allocation10 + $0x70] sm:$0xff]  }
 0x396   : > { %3564 = vmatprep.mubr.bf16.mxu1 %v2660_v11  ;;  %5005 = vmatprep.subr.bf16.mxu0 %v5514_v6  ;;  %v5515_v11 = vld [vmem:[#allocation10 + $0x30] sm:$0xff]  }
 0x397   : > { %5006 = vmatpush3.bf16.msra.mxu0 %v5515_v11 }
 0x398   : > { %5007 = vmatprep.subr.bf16.mxu0 %v5516_v12 }
 0x39b   : > { %5008 = vmatpush3.bf16.msra.mxu0 %v5517_v13 }
 0x39c   : > { %5015 = vmatprep.subr.bf16.mxu0 %v5518_v42 }
 0x39d   : > { %3565 = vmatmul.mubr.bf16.gmra.mrb[60].mxu1 %v2612_v15 }
 0x39e   : > { %3607 = vmatprep.mubr.bf16.mxu1 %v5790_v23 }
 0x3a5   : > { %3608 = vmatmul.mubr.bf16.vlgmr.msra.gmra.mrb[0].mxu1 %v2693_v26 }
 0x3a6   : > { %3617 = vmatprep.mubr.bf16.mxu1 %v5790_v23 }
 0x3ad   : > { %3618 = vmatmul.mubr.bf16.gmra.mrb[4].mxu1 %v2694_v31 }
 0x3ae   : > { %3627 = vmatprep.mubr.bf16.mxu1 %v5790_v23 }
 0x3b5   : > { %3628 = vmatmul.mubr.bf16.gmra.mrb[8].mxu1 %v2695_v32 }
 0x3b6   : > { %3637 = vmatprep.mubr.bf16.mxu1 %v5790_v23 }
 0x3bd   : > { %3638 = vmatmul.mubr.bf16.gmra.mrb[12].mxu1 %v2696_v10 }
 0x3be   : > { %3647 = vmatprep.mubr.bf16.mxu1 %v5790_v23 }
 0x3c5   : > { %3648 = vmatmul.mubr.bf16.gmra.mrb[16].mxu1 %v2697_v35 }
 0x3c6   : > { %3657 = vmatprep.mubr.bf16.mxu1 %v5790_v23 }
 0x3cd   : > { %3658 = vmatmul.mubr.bf16.gmra.mrb[20].mxu1 %v2698_v38 }
 0x3ce   : > { %3667 = vmatprep.mubr.bf16.mxu1 %v5790_v23 }
 0x3d5   : > { %3668 = vmatmul.mubr.bf16.gmra.mrb[24].mxu1 %v2699_v41 }
 0x3d6   : > { %3677 = vmatprep.mubr.bf16.mxu1 %v5790_v23 }
 0x3dd   : > { %3678 = vmatmul.mubr.bf16.gmra.mrb[28].mxu1 %v2700_v44 }
 0x3de   : > { %3687 = vmatprep.mubr.bf16.mxu1 %v5790_v23 }
 0x3e5   : > { %3688 = vmatmul.mubr.bf16.gmra.mrb[32].mxu1 %v2701_v48 }
 0x3e6   : > { %3697 = vmatprep.mubr.bf16.mxu1 %v5790_v23 }
 0x3ed   : > { %3698 = vmatmul.mubr.bf16.gmra.mrb[36].mxu1 %v2702_v52 }
 0x3ee   : > { %3707 = vmatprep.mubr.bf16.mxu1 %v5790_v23 }
 0x3f5   : > { %3708 = vmatmul.mubr.bf16.gmra.mrb[40].mxu1 %v2703_v50 }
 0x3f6   : > { %3717 = vmatprep.mubr.bf16.mxu1 %v5790_v23 }
 0x3fd   : > { %3718 = vmatmul.mubr.bf16.gmra.mrb[44].mxu1 %v2704_v54 }
 0x3fe   : > { %3727 = vmatprep.mubr.bf16.mxu1 %v5790_v23 }
 0x405   : > { %3728 = vmatmul.mubr.bf16.gmra.mrb[48].mxu1 %v2705_v59 }
 0x406   : > { %3737 = vmatprep.mubr.bf16.mxu1 %v5790_v23 }
 0x40d   : > { %3738 = vmatmul.mubr.bf16.gmra.mrb[52].mxu1 %v2706_v62 }
 0x40e   : > { %3747 = vmatprep.mubr.bf16.mxu1 %v5790_v23 }
 0x415   : > { %3748 = vmatmul.mubr.bf16.gmra.mrb[56].mxu1 %v2707_v2 }
 0x416   : > { %3757 = vmatprep.mubr.bf16.mxu1 %v5790_v23 }
 0x41d   : > { %3758 = vmatmul.mubr.bf16.gmra.mrb[60].mxu1 %v2708_v7 }
 0x478   : > { %v3609_v15 = vpop.f32.mrb[0].mxu1 }
 0x479   : > { %v3611_v17 = vpop.f32.mrb[1].mxu1 }
 0x47a   : > { %v3768_v19 = vmax.f32 %v3609_v15, %v3611_v17  ;;  %v3613_v20 = vpop.f32.mrb[2].mxu1 }
 0x47b   : > { %v3615_v23 = vpop.f32.mrb[3].mxu1 }
 0x47c   : > { %3800 = vst [vmem:[#allocation2] sm:$0xff] %v3768_v19  ;;  %v3769_v16 = vmax.f32 %v3613_v20, %v3615_v23 }
 0x47e   : > { %3801 = vst [vmem:[#allocation2 + $0x8] sm:$0xff] %v3769_v16 }
 0x480   : > { %v3619_v24 = vpop.f32.mrb[4].mxu1 }
 0x481   : > { %v3621_v27 = vpop.f32.mrb[5].mxu1 }
 0x482   : > { %v3770_v18 = vmax.f32 %v3619_v24, %v3621_v27  ;;  %v3623_v26 = vpop.f32.mrb[6].mxu1 }
 0x483   : > { %v3625_v29 = vpop.f32.mrb[7].mxu1 }
 0x484   : > { %3802 = vst [vmem:[#allocation2 + $0x10] sm:$0xff] %v3770_v18  ;;  %v3771_v21 = vmax.f32 %v3623_v26, %v3625_v29 }
 0x485   : > { %v3832_v28 = vld [vmem:[#allocation2] ss:$2 sm:$0xff]  ;;  %v3848_v31 = vld [vmem:[#allocation2 + $0x1] ss:$2 sm:$0xff] }
 0x486   : > { %3803 = vst [vmem:[#allocation2 + $0x18] sm:$0xff] %v3771_v21  ;;  %v3864_v30 = vmax.f32 %v3832_v28, %v3848_v31 }
 0x488   : > { %v3629_v32 = vpop.f32.mrb[8].mxu1  ;;  %v3887_v14 = vadd.f32 %v6794_v25, %v3864_v30 }
 0x489   : > { %v3631_v22 = vpop.f32.mrb[9].mxu1 }
 0x48a   : > { %v3772_v10 = vmax.f32 %v3629_v32, %v3631_v22  ;;  %v3633_v33 = vpop.f32.mrb[10].mxu1  ;;  %v3903_v34 = vmax.f32 %v3887_v14, 0.0 }
 0x48b   : > { %v3635_v35 = vpop.f32.mrb[11].mxu1 }
 0x48c   : > { %3804 = vst [vmem:[#allocation2 + $0x20] sm:$0xff] %v3772_v10  ;;  %v3773_v36 = vmax.f32 %v3633_v33, %v3635_v35  ;;  %3919 = vst [vmem:[#allocation4] sm:$0xff] %v3903_v34 }
 0x48d   : > { %v3833_v37 = vld [vmem:[#allocation2 + $0x10] ss:$2 sm:$0xff]  ;;  %v3849_v38 = vld [vmem:[#allocation2 + $0x11] ss:$2 sm:$0xff] }
 0x48e   : > { %3805 = vst [vmem:[#allocation2 + $0x28] sm:$0xff] %v3773_v36  ;;  %v3865_v39 = vmax.f32 %v3833_v37, %v3849_v38 }
 0x490   : > { %v3639_v40 = vpop.f32.mrb[12].mxu1  ;;  %v3888_v41 = vadd.f32 %v6794_v25, %v3865_v39 }
 0x491   : > { %v3641_v43 = vpop.f32.mrb[13].mxu1 }
 0x492   : > { %v3774_v44 = vmax.f32 %v3639_v40, %v3641_v43  ;;  %v3643_v45 = vpop.f32.mrb[14].mxu1  ;;  %v3904_v46 = vmax.f32 %v3888_v41, 0.0 }
 0x493   : > { %v3645_v48 = vpop.f32.mrb[15].mxu1 }
 0x494   : > { %3806 = vst [vmem:[#allocation2 + $0x30] sm:$0xff] %v3774_v44  ;;  %v3775_v49 = vmax.f32 %v3643_v45, %v3645_v48  ;;  %3920 = vst [vmem:[#allocation4 + $0x8] sm:$0xff] %v3904_v46 }
 0x495   : > { %v3834_v51 = vld [vmem:[#allocation2 + $0x20] ss:$2 sm:$0xff]  ;;  %v3850_v52 = vld [vmem:[#allocation2 + $0x21] ss:$2 sm:$0xff] }
 0x496   : > { %3807 = vst [vmem:[#allocation2 + $0x38] sm:$0xff] %v3775_v49  ;;  %v3866_v55 = vmax.f32 %v3834_v51, %v3850_v52 }
 0x498   : > { %v3649_v58 = vpop.f32.mrb[16].mxu1  ;;  %v3889_v50 = vadd.f32 %v6794_v25, %v3866_v55 }
 0x499   : > { %v3651_v57 = vpop.f32.mrb[17].mxu1 }
 0x49a   : > { %v3776_v47 = vmax.f32 %v3649_v58, %v3651_v57  ;;  %v3653_v54 = vpop.f32.mrb[18].mxu1  ;;  %v3905_v60 = vmax.f32 %v3889_v50, 0.0 }
 0x49b   : > { %v3655_v53 = vpop.f32.mrb[19].mxu1 }
 0x49c   : > { %3808 = vst [vmem:[#allocation2 + $0x40] sm:$0xff] %v3776_v47  ;;  %v3777_v59 = vmax.f32 %v3653_v54, %v3655_v53  ;;  %3921 = vst [vmem:[#allocation4 + $0x10] sm:$0xff] %v3905_v60 }
 0x49d   : > { %v3835_v61 = vld [vmem:[#allocation2 + $0x30] ss:$2 sm:$0xff]  ;;  %v3851_v56 = vld [vmem:[#allocation2 + $0x31] ss:$2 sm:$0xff] }
 0x49e   : > { %3809 = vst [vmem:[#allocation2 + $0x48] sm:$0xff] %v3777_v59  ;;  %v3867_v62 = vmax.f32 %v3835_v61, %v3851_v56 }
 0x4a0   : > { %v3659_v63 = vpop.f32.mrb[20].mxu1  ;;  %v3890_v0 = vadd.f32 %v6794_v25, %v3867_v62 }
 0x4a1   : > { %v3661_v1 = vpop.f32.mrb[21].mxu1 }
 0x4a2   : > { %v3778_v2 = vmax.f32 %v3659_v63, %v3661_v1  ;;  %v3663_v3 = vpop.f32.mrb[22].mxu1  ;;  %v3906_v4 = vmax.f32 %v3890_v0, 0.0 }
 0x4a3   : > { %v3665_v5 = vpop.f32.mrb[23].mxu1 }
 0x4a4   : > { %3810 = vst [vmem:[#allocation2 + $0x50] sm:$0xff] %v3778_v2  ;;  %v3779_v7 = vmax.f32 %v3663_v3, %v3665_v5  ;;  %3922 = vst [vmem:[#allocation4 + $0x18] sm:$0xff] %v3906_v4 }
 0x4a5   : > { %v3836_v8 = vld [vmem:[#allocation2 + $0x40] ss:$2 sm:$0xff]  ;;  %v3852_v9 = vld [vmem:[#allocation2 + $0x41] ss:$2 sm:$0xff] }
 0x4a6   : > { %3811 = vst [vmem:[#allocation2 + $0x58] sm:$0xff] %v3779_v7  ;;  %v3868_v6 = vmax.f32 %v3836_v8, %v3852_v9 }
 0x4a8   : > { %v3669_v11 = vpop.f32.mrb[24].mxu1  ;;  %v3891_v12 = vadd.f32 %v6794_v25, %v3868_v6 }
 0x4a9   : > { %v3671_v13 = vpop.f32.mrb[25].mxu1 }
 0x4aa   : > { %v3780_v15 = vmax.f32 %v3669_v11, %v3671_v13  ;;  %v3673_v17 = vpop.f32.mrb[26].mxu1  ;;  %v3907_v19 = vmax.f32 %v3891_v12, 0.0 }
 0x4ab   : > { %v3675_v20 = vpop.f32.mrb[27].mxu1 }
 0x4ac   : > { %3812 = vst [vmem:[#allocation2 + $0x60] sm:$0xff] %v3780_v15  ;;  %v3781_v23 = vmax.f32 %v3673_v17, %v3675_v20  ;;  %3923 = vst [vmem:[#allocation4 + $0x20] sm:$0xff] %v3907_v19 }
 0x4ad   : > { %v3837_v16 = vld [vmem:[#allocation2 + $0x50] ss:$2 sm:$0xff]  ;;  %v3853_v24 = vld [vmem:[#allocation2 + $0x51] ss:$2 sm:$0xff] }
 0x4ae   : > { %3813 = vst [vmem:[#allocation2 + $0x68] sm:$0xff] %v3781_v23  ;;  %v3869_v27 = vmax.f32 %v3837_v16, %v3853_v24 }
 0x4b0   : > { %v3679_v18 = vpop.f32.mrb[28].mxu1  ;;  %v3892_v26 = vadd.f32 %v6794_v25, %v3869_v27 }
 0x4b1   : > { %v3681_v29 = vpop.f32.mrb[29].mxu1 }
 0x4b2   : > { %v3782_v21 = vmax.f32 %v3679_v18, %v3681_v29  ;;  %v3683_v28 = vpop.f32.mrb[30].mxu1  ;;  %v3908_v31 = vmax.f32 %v3892_v26, 0.0 }
 0x4b3   : > { %v3685_v30 = vpop.f32.mrb[31].mxu1 }
 0x4b4   : > { %3814 = vst [vmem:[#allocation2 + $0x70] sm:$0xff] %v3782_v21  ;;  %v3783_v32 = vmax.f32 %v3683_v28, %v3685_v30  ;;  %3924 = vst [vmem:[#allocation4 + $0x28] sm:$0xff] %v3908_v31 }
 0x4b5   : > { %v3838_v14 = vld [vmem:[#allocation2 + $0x60] ss:$2 sm:$0xff]  ;;  %v3854_v22 = vld [vmem:[#allocation2 + $0x61] ss:$2 sm:$0xff] }
 0x4b6   : > { %3815 = vst [vmem:[#allocation2 + $0x78] sm:$0xff] %v3783_v32  ;;  %v3870_v10 = vmax.f32 %v3838_v14, %v3854_v22 }
 0x4b8   : > { %v3689_v33 = vpop.f32.mrb[32].mxu1  ;;  %v3893_v34 = vadd.f32 %v6794_v25, %v3870_v10 }
 0x4b9   : > { %v3691_v35 = vpop.f32.mrb[33].mxu1 }
 0x4ba   : > { %v3784_v36 = vmax.f32 %v3689_v33, %v3691_v35  ;;  %v3693_v37 = vpop.f32.mrb[34].mxu1  ;;  %v3909_v38 = vmax.f32 %v3893_v34, 0.0 }
 0x4bb   : > { %v3695_v39 = vpop.f32.mrb[35].mxu1 }
 0x4bc   : > { %3816 = vst [vmem:[#allocation2 + $0x80] sm:$0xff] %v3784_v36  ;;  %v3785_v40 = vmax.f32 %v3693_v37, %v3695_v39  ;;  %3925 = vst [vmem:[#allocation4 + $0x30] sm:$0xff] %v3909_v38 }
 0x4bd   : > { %v3839_v41 = vld [vmem:[#allocation2 + $0x70] ss:$2 sm:$0xff]  ;;  %v3855_v42 = vld [vmem:[#allocation2 + $0x71] ss:$2 sm:$0xff] }
 0x4be   : > { %3817 = vst [vmem:[#allocation2 + $0x88] sm:$0xff] %v3785_v40  ;;  %v3871_v43 = vmax.f32 %v3839_v41, %v3855_v42 }
 0x4c0   : > { %v3699_v44 = vpop.f32.mrb[36].mxu1  ;;  %v3894_v45 = vadd.f32 %v6794_v25, %v3871_v43 }
 0x4c1   : > { %v3701_v46 = vpop.f32.mrb[37].mxu1 }
 0x4c2   : > { %v3786_v48 = vmax.f32 %v3699_v44, %v3701_v46  ;;  %v3703_v49 = vpop.f32.mrb[38].mxu1  ;;  %v3910_v51 = vmax.f32 %v3894_v45, 0.0 }
 0x4c3   : > { %v3705_v52 = vpop.f32.mrb[39].mxu1 }
 0x4c4   : > { %3818 = vst [vmem:[#allocation2 + $0x90] sm:$0xff] %v3786_v48  ;;  %v3787_v55 = vmax.f32 %v3703_v49, %v3705_v52  ;;  %3926 = vst [vmem:[#allocation4 + $0x38] sm:$0xff] %v3910_v51 }
 0x4c5   : > { %v3840_v58 = vld [vmem:[#allocation2 + $0x80] ss:$2 sm:$0xff]  ;;  %v3856_v50 = vld [vmem:[#allocation2 + $0x81] ss:$2 sm:$0xff] }
 0x4c6   : > { %3819 = vst [vmem:[#allocation2 + $0x98] sm:$0xff] %v3787_v55  ;;  %v3872_v57 = vmax.f32 %v3840_v58, %v3856_v50 }
 0x4c8   : > { %v3709_v47 = vpop.f32.mrb[40].mxu1  ;;  %v3895_v54 = vadd.f32 %v6794_v25, %v3872_v57 }
 0x4c9   : > { %v3711_v60 = vpop.f32.mrb[41].mxu1 }
 0x4ca   : > { %v3788_v53 = vmax.f32 %v3709_v47, %v3711_v60  ;;  %v3713_v59 = vpop.f32.mrb[42].mxu1  ;;  %v3911_v61 = vmax.f32 %v3895_v54, 0.0 }
 0x4cb   : > { %v3715_v56 = vpop.f32.mrb[43].mxu1 }
 0x4cc   : > { %3820 = vst [vmem:[#allocation2 + $0xa0] sm:$0xff] %v3788_v53  ;;  %v3789_v62 = vmax.f32 %v3713_v59, %v3715_v56  ;;  %3927 = vst [vmem:[#allocation4 + $0x40] sm:$0xff] %v3911_v61 }
 0x4cd   : > { %v3841_v63 = vld [vmem:[#allocation2 + $0x90] ss:$2 sm:$0xff]  ;;  %v3857_v0 = vld [vmem:[#allocation2 + $0x91] ss:$2 sm:$0xff] }
 0x4ce   : > { %3821 = vst [vmem:[#allocation2 + $0xa8] sm:$0xff] %v3789_v62  ;;  %v3873_v1 = vmax.f32 %v3841_v63, %v3857_v0 }
 0x4d0   : > { %v3719_v2 = vpop.f32.mrb[44].mxu1  ;;  %v3896_v3 = vadd.f32 %v6794_v25, %v3873_v1  ;;  %v3945_v1 = vld [vmem:[#allocation4 + $0x1] ss:$8 sm:$0xf0] }
 0x4d1   : > { %v3721_v4 = vpop.f32.mrb[45].mxu1 }
 0x4d2   : > { %v3790_v5 = vmax.f32 %v3719_v2, %v3721_v4  ;;  %v3723_v7 = vpop.f32.mrb[46].mxu1  ;;  %v3912_v8 = vmax.f32 %v3896_v3, 0.0  ;;  %v3944_v2 = vld [vmem:[#allocation4 + $0x1] ss:$8 sm:$0xf] }
 0x4d3   : > { %v3725_v9 = vpop.f32.mrb[47].mxu1  ;;  %v3935_v3 = vld [vmem:[#allocation4] ss:$8 sm:$0xf] }
 0x4d4   : > { %3822 = vst [vmem:[#allocation2 + $0xb0] sm:$0xff] %v3790_v5  ;;  %v3791_v6 = vmax.f32 %v3723_v7, %v3725_v9  ;;  %3928 = vst [vmem:[#allocation4 + $0x48] sm:$0xff] %v3912_v8  ;;  %v3936_v4 = vld [vmem:[#allocation4] ss:$8 sm:$0xf0] }
 0x4d5   : > { %v3842_v11 = vld [vmem:[#allocation2 + $0xa0] ss:$2 sm:$0xff]  ;;  %v3858_v12 = vld [vmem:[#allocation2 + $0xa1] ss:$2 sm:$0xff] }
 0x4d6   : > { %3823 = vst [vmem:[#allocation2 + $0xb8] sm:$0xff] %v3791_v6  ;;  %v3874_v13 = vmax.f32 %v3842_v11, %v3858_v12  ;;  %v3963_v5 = vld [vmem:[#allocation4 + $0x3] ss:$8 sm:$0xf0]  ;;  %v3946_v11 = vor.u32 %v3945_v1, %v3944_v2 }
 0x4d7   : > { %v5547_v1 = vld [vmem:[#allocation12 + $0x28] sm:$0xff]   ;;  %v5548_v2 = vld [vmem:[#allocation12 + $0x30] sm:$0xff]  }
 0x4d8   : > { %v3729_v15 = vpop.f32.mrb[48].mxu1  ;;  %v3897_v17 = vadd.f32 %v6794_v25, %v3874_v13  ;;  %v3937_v13 = vor.u32 %v3936_v4, %v3935_v3  ;;  %v5549_v3 = vld [vmem:[#allocation12 + $0x38] sm:$0xff]  }
 0x4d9   : > { %v3731_v19 = vpop.f32.mrb[49].mxu1 }
 0x4da   : > { %v3792_v20 = vmax.f32 %v3729_v15, %v3731_v19  ;;  %v3733_v23 = vpop.f32.mrb[50].mxu1  ;;  %v3913_v16 = vmax.f32 %v3897_v17, 0.0 }
 0x4db   : > { %v3735_v24 = vpop.f32.mrb[51].mxu1 }
 0x4dc   : > { %3824 = vst [vmem:[#allocation2 + $0xc0] sm:$0xff] %v3792_v20  ;;  %v3793_v27 = vmax.f32 %v3733_v23, %v3735_v24  ;;  %3929 = vst [vmem:[#allocation4 + $0x50] sm:$0xff] %v3913_v16  ;;  %v3962_v20 = vld [vmem:[#allocation4 + $0x3] ss:$8 sm:$0xf] }
 0x4dd   : > { %v3843_v18 = vld [vmem:[#allocation2 + $0xb0] ss:$2 sm:$0xff]  ;;  %v3859_v26 = vld [vmem:[#allocation2 + $0xb1] ss:$2 sm:$0xff]  ;;  %v5519_v24 = vld [vmem:[#allocation10 + $0x80] sm:$0xff]  }
 0x4de   : > { %3825 = vst [vmem:[#allocation2 + $0xc8] sm:$0xff] %v3793_v27  ;;  %v3875_v29 = vmax.f32 %v3843_v18, %v3859_v26  ;;  %v3964_v27 = vor.u32 %v3963_v5, %v3962_v20  ;;  %v5520_v18 = vld [vmem:[#allocation10 + $0xc8] sm:$0xff]  }
 0x4e0   : > { %v3739_v21 = vpop.f32.mrb[52].mxu1  ;;  %v3898_v28 = vadd.f32 %v6794_v25, %v3875_v29  ;;  %v5521_v29 = vld [vmem:[#allocation10 + $0x88] sm:$0xff]  }
 0x4e1   : > { %v3741_v31 = vpop.f32.mrb[53].mxu1 }
 0x4e2   : > { %v3794_v30 = vmax.f32 %v3739_v21, %v3741_v31  ;;  %v3743_v32 = vpop.f32.mrb[54].mxu1  ;;  %v3914_v14 = vmax.f32 %v3898_v28, 0.0  ;;  %v5522_v21 = vld [vmem:[#allocation10 + $0xd0] sm:$0xff]   ;;  %v5524_v31 = vld [vmem:[#allocation10 + $0xd8] sm:$0xff]  }
 0x4e3   : > { %v3745_v22 = vpop.f32.mrb[55].mxu1  ;;  %v5523_v28 = vld [vmem:[#allocation10 + $0x90] sm:$0xff]  }
 0x4e4   : > { %3826 = vst [vmem:[#allocation2 + $0xd0] sm:$0xff] %v3794_v30  ;;  %v3795_v10 = vmax.f32 %v3743_v32, %v3745_v22  ;;  %3930 = vst [vmem:[#allocation4 + $0x58] sm:$0xff] %v3914_v14  ;;  %v5525_v30 = vld [vmem:[#allocation10 + $0x98] sm:$0xff]   ;;  %v5526_v32 = vld [vmem:[#allocation10 + $0xe0] sm:$0xff]  }
 0x4e5   : > { %v3844_v33 = vld [vmem:[#allocation2 + $0xc0] ss:$2 sm:$0xff]  ;;  %v3860_v34 = vld [vmem:[#allocation2 + $0xc1] ss:$2 sm:$0xff] }
 0x4e6   : > { %3827 = vst [vmem:[#allocation2 + $0xd8] sm:$0xff] %v3795_v10  ;;  %v3876_v35 = vmax.f32 %v3844_v33, %v3860_v34  ;;  %v5527_v14 = vld [vmem:[#allocation10 + $0xa0] sm:$0xff]   ;;  %v5528_v22 = vld [vmem:[#allocation10 + $0xe8] sm:$0xff]   ;;  %v5530_v33 = vld [vmem:[#allocation10 + $0xf0] sm:$0xff]  }
 0x4e7   : > { %v5529_v10 = vld [vmem:[#allocation10 + $0xa8] sm:$0xff]   ;;  %v5531_v34 = vld [vmem:[#allocation10 + $0xb0] sm:$0xff]  }
 0x4e8   : > { %v3749_v36 = vpop.f32.mrb[56].mxu1  ;;  %v3899_v37 = vadd.f32 %v6794_v25, %v3876_v35  ;;  %v5532_v35 = vld [vmem:[#allocation10 + $0xf8] sm:$0xff]  }
 0x4e9   : > { %v3751_v38 = vpop.f32.mrb[57].mxu1 }
 0x4ea   : > { %v3796_v39 = vmax.f32 %v3749_v36, %v3751_v38  ;;  %v3753_v40 = vpop.f32.mrb[58].mxu1  ;;  %v3915_v41 = vmax.f32 %v3899_v37, 0.0  ;;  %v5533_v37 = vld [vmem:[#allocation10 + $0xb8] sm:$0xff]  }
 0x4eb   : > { %v3755_v42 = vpop.f32.mrb[59].mxu1  ;;  %v3948_v7 = vld [vmem:[#allocation4 + $0x41] ss:$8 sm:$0xf] }
 0x4ec   : > { %3828 = vst [vmem:[#allocation2 + $0xe0] sm:$0xff] %v3796_v39  ;;  %v3797_v43 = vmax.f32 %v3753_v40, %v3755_v42  ;;  %3931 = vst [vmem:[#allocation4 + $0x60] sm:$0xff] %v3915_v41  ;;  %v3939_v8 = vld [vmem:[#allocation4 + $0x40] ss:$8 sm:$0xf] }
 0x4ed   : > { %v3845_v44 = vld [vmem:[#allocation2 + $0xd0] ss:$2 sm:$0xff]  ;;  %v3861_v45 = vld [vmem:[#allocation2 + $0xd1] ss:$2 sm:$0xff] }
 0x4ee   : > { %3829 = vst [vmem:[#allocation2 + $0xe8] sm:$0xff] %v3797_v43  ;;  %v3877_v46 = vmax.f32 %v3845_v44, %v3861_v45  ;;  %v3966_v17 = vld [vmem:[#allocation4 + $0x43] ss:$8 sm:$0xf]  ;;  %v5791_v45 = vmov 0.0  }
 0x4ef   : > { %v3954_v38 = vld [vmem:[#allocation4 + $0x2] ss:$8 sm:$0xf0] }
 0x4f0   : > { %v3759_v48 = vpop.f32.mrb[60].mxu1  ;;  %v3900_v49 = vadd.f32 %v6794_v25, %v3877_v46  ;;  %v3957_v39 = vld [vmem:[#allocation4 + $0x42] ss:$8 sm:$0xf] }
 0x4f1   : > { %v3761_v51 = vpop.f32.mrb[61].mxu1  ;;  %v3953_v41 = vld [vmem:[#allocation4 + $0x2] ss:$8 sm:$0xf] }
 0x4f2   : > { %v3798_v52 = vmax.f32 %v3759_v48, %v3761_v51  ;;  %v3763_v55 = vpop.f32.mrb[62].mxu1  ;;  %v3916_v58 = vmax.f32 %v3900_v49, 0.0  ;;  %v3955_v42 = vor.u32 %v3954_v38, %v3953_v41  ;;  %v5534_v43 = vld [vmem:[#allocation10 + $0x100] sm:$0xff]   ;;  %v5535_v46 = vld [vmem:[#allocation10 + $0x108] sm:$0xff]   ;;  %v5536_v48 = vld [vmem:[#allocation10 + $0x110] sm:$0xff]  }
 0x4f3   : > { %v3765_v50 = vpop.f32.mrb[63].mxu1  ;;  %v5537_v49 = vld [vmem:[#allocation10 + $0x118] sm:$0xff]   ;;  %v5538_v51 = vld [vmem:[#allocation10 + $0x120] sm:$0xff]  }
 0x4f4   : > { %3830 = vst [vmem:[#allocation2 + $0xf0] sm:$0xff] %v3798_v52  ;;  %v3799_v57 = vmax.f32 %v3763_v55, %v3765_v50  ;;  %3932 = vst [vmem:[#allocation4 + $0x68] sm:$0xff] %v3916_v58  ;;  %v5539_v52 = vld [vmem:[#allocation10 + $0x128] sm:$0xff]   ;;  %v5540_v55 = vld [vmem:[#allocation10 + $0x130] sm:$0xff]  }
 0x4f5   : > { %v3846_v47 = vld [vmem:[#allocation2 + $0xe0] ss:$2 sm:$0xff]  ;;  %v3862_v54 = vld [vmem:[#allocation2 + $0xe1] ss:$2 sm:$0xff]  ;;  %v5541_v50 = vld [vmem:[#allocation10 + $0x138] sm:$0xff]  }
 0x4f6   : > { %3831 = vst [vmem:[#allocation2 + $0xf8] sm:$0xf] %v3799_v57  ;;  %v3878_v60 = vmax.f32 %v3846_v47, %v3862_v54  ;;  %v3972_v57 = vld [vmem:[#allocation4 + $0x4] ss:$8 sm:$0xf0] }
 0x4f7   : > { %v3975_v47 = vld [vmem:[#allocation4 + $0x44] ss:$8 sm:$0xf]  ;;  %v4972_v38 = vld [vmem:[%s6908_s21] ss:$0 sm:$0xff] }
 0x4f8   : > { %v3901_v53 = vadd.f32 %v6794_v25, %v3878_v60  ;;  %v3971_v60 = vld [vmem:[#allocation4 + $0x4] ss:$8 sm:$0xf] }
 0x4fa   : > { %v3917_v59 = vmax.f32 %v3901_v53, 0.0  ;;  %v3973_v53 = vor.u32 %v3972_v57, %v3971_v60 }
 0x4fc   : > { %3933 = vst [vmem:[#allocation4 + $0x70] sm:$0xff] %v3917_v59 }
 0x4fd   : > { %v3847_v61 = vld [vmem:[#allocation2 + $0xf0] ss:$2 sm:$0x3f]  ;;  %v3863_v56 = vld [vmem:[#allocation2 + $0xf1] ss:$2 sm:$0x3f] }
 0x4fe   : > { %v3879_v62 = vmax.f32 %v3847_v61, %v3863_v56  ;;  %v5542_v61 = vld [vmem:[#allocation12] sm:$0xff]   ;;  %v5543_v56 = vld [vmem:[#allocation12 + $0x8] sm:$0xff]  }
 0x500   : > { %v3902_v63 = vadd.f32 %v6794_v25, %v3879_v62  ;;  %v5544_v62 = vld [vmem:[#allocation12 + $0x10] sm:$0xff]  }
 0x502   : > { %v3918_v0 = vmax.f32 %v3902_v63, 0.0  ;;  %v5545_v63 = vld [vmem:[#allocation12 + $0x18] sm:$0xff]  }
 0x504   : > { %3934 = vst [vmem:[#allocation4 + $0x78] sm:$0x3f] %v3918_v0  ;;  %v5546_v0 = vld [vmem:[#allocation12 + $0x20] sm:$0xff]  }
 0x50b   : > { %v3949_v9 = vld [vmem:[#allocation4 + $0x41] ss:$8 sm:$0xf0]  ;;  %v3940_v6 = vld [vmem:[#allocation4 + $0x40] ss:$8 sm:$0xf0] }
 0x50c   : > { %v3950_v12 = vor.u32 %v3949_v9, %v3948_v7  ;;  %v3941_v15 = vor.u32 %v3940_v6, %v3939_v8  ;;  %v3967_v19 = vld [vmem:[#allocation4 + $0x43] ss:$8 sm:$0xf0]  ;;  %v3958_v36 = vld [vmem:[#allocation4 + $0x42] ss:$8 sm:$0xf0] }
 0x50d   : > { %v3968_v23 = vor.u32 %v3967_v19, %v3966_v17  ;;  %v3959_v40 = vor.u32 %v3958_v36, %v3957_v39  ;;  %v3976_v58 = vld [vmem:[#allocation4 + $0x44] ss:$8 sm:$0xf0] }
 0x50e   : > { %v3951_v25 = vpack.c.bf16 %v3950_v12, %v3946_v11  ;;  %v3942_v16 = vpack.c.bf16 %v3941_v15, %v3937_v13  ;;  %v3977_v54 = vor.u32 %v3976_v58, %v3975_v47  ;;  %v4931_v11 = vld [vmem:[%s6875_s6] ss:$0 sm:$0xff]  ;;  %v5556_v36 = vld [vmem:[#allocation13 + $0x30] sm:$0xff]  }
 0x50f   : > { %v3969_v26 = vpack.c.bf16 %v3968_v23, %v3964_v27  ;;  %v3960_v44 = vpack.c.bf16 %v3959_v40, %v3955_v42 }
 0x510   : > { %4338 = vmatprep.mubr.bf16.mxu0 %v3951_v25  ;;  %v3978_v59 = vpack.c.bf16 %v3977_v54, %v3973_v53 }
 0x511   : > { %4339 = vmatmul.mubr.bf16.vlgmr.msra.gmra.mrb[128].mxu0 %v3942_v16 }
 0x512   : > { %5016 = vmatpush3.bf16.msra.mxu0 %v5519_v24  ;;  %4379 = vmatprep.mubr.bf16.mxu0 %v3969_v26 }
 0x513   : > { %5017 = vmatprep.subr.bf16.mxu0 %v5520_v18 }
 0x516   : > { %5018 = vmatpush3.bf16.msra.mxu0 %v5521_v29 }
 0x517   : > { %5019 = vmatprep.subr.bf16.mxu0 %v5522_v21 }
 0x51a   : > { %5020 = vmatpush3.bf16.msra.mxu0 %v5523_v28 }
 0x51b   : > { %5021 = vmatprep.subr.bf16.mxu0 %v5524_v31 }
 0x51e   : > { %5022 = vmatpush3.bf16.msra.mxu0 %v5525_v30 }
 0x51f   : > { %5023 = vmatprep.subr.bf16.mxu0 %v5526_v32  ;;  %v5550_v32 = vld [vmem:[#allocation13] sm:$0xff]  }
 0x522   : > { %5024 = vmatpush3.bf16.msra.mxu0 %v5527_v14 }
 0x523   : > { %5025 = vmatprep.subr.bf16.mxu0 %v5528_v22  ;;  %v5551_v22 = vld [vmem:[#allocation13 + $0x8] sm:$0xff]  }
 0x526   : > { %5026 = vmatpush3.bf16.msra.mxu0 %v5529_v10  ;;  %v5552_v10 = vld [vmem:[#allocation13 + $0x10] sm:$0xff]  }
 0x527   : > { %5027 = vmatprep.subr.bf16.mxu0 %v5530_v33  ;;  %v5553_v33 = vld [vmem:[#allocation13 + $0x18] sm:$0xff]  }
 0x52a   : > { %5028 = vmatpush3.bf16.msra.mxu0 %v5531_v34  ;;  %v5554_v34 = vld [vmem:[#allocation13 + $0x20] sm:$0xff]  }
 0x52b   : > { %5029 = vmatprep.subr.bf16.mxu0 %v5532_v35  ;;  %v5555_v35 = vld [vmem:[#allocation13 + $0x28] sm:$0xff]  }
 0x52e   : > { %5030 = vmatpush3.bf16.msra.mxu0 %v5533_v37  ;;  %v5557_v37 = vld [vmem:[#allocation13 + $0x38] sm:$0xff]  }
 0x52f   : > { %5064 = vmatprep.subr.bf16.mxu0 %v5791_v45 }
 0x531   : > { %4380 = vmatmul.mubr.bf16.vlgmr.msra.gmra.mrb[132].mxu0 %v3960_v44 }
 0x532   : > { %5065 = vmatpush3.bf16.msra.mxu0 %v5534_v43  ;;  %5080 = vmatprep.mubr.msk.bf16.mxu0 %vm5792_vm3, %v5791_v45 }
 0x533   : > { %5066 = vmatprep.subr.bf16.mxu0 %v5791_v45 }
 0x536   : > { %5067 = vmatpush3.bf16.msra.mxu0 %v5535_v46 }
 0x537   : > { %5068 = vmatprep.subr.bf16.mxu0 %v5791_v45 }
 0x53a   : > { %5069 = vmatpush3.bf16.msra.mxu0 %v5536_v48 }
 0x53b   : > { %5070 = vmatprep.subr.bf16.mxu0 %v5791_v45 }
 0x53e   : > { %5071 = vmatpush3.bf16.msra.mxu0 %v5537_v49 }
 0x53f   : > { %5072 = vmatprep.subr.bf16.mxu0 %v5791_v45 }
 0x542   : > { %5073 = vmatpush3.bf16.msra.mxu0 %v5538_v51 }
 0x543   : > { %5074 = vmatprep.subr.bf16.mxu0 %v5791_v45 }
 0x546   : > { %5075 = vmatpush3.bf16.msra.mxu0 %v5539_v52 }
 0x547   : > { %5076 = vmatprep.subr.bf16.mxu0 %v5791_v45 }
 0x54a   : > { %5077 = vmatpush3.bf16.msra.mxu0 %v5540_v55 }
 0x54b   : > { %5078 = vmatprep.subr.bf16.mxu0 %v5791_v45 }
 0x54e   : > { %5079 = vmatpush3.bf16.msra.mxu0 %v5541_v50 }
 0x54f   : > { %5084 = vmatprep.subr.bf16.mxu0 %v5791_v45 }
 0x551   : > { %5081 = vmatmul.mubr.bf16.vlgmr.msra.gmra.mrb[136].mxu0 %v3978_v59 }
 0x552   : > { %5100 = vmatprep.mubr.msk.bf16.mxu0 %vm5792_vm3, %v5791_v45  ;;  %5085 = vmatpush3.bf16.msra.mxu0 %v5542_v61 }
 0x553   : > { %5086 = vmatprep.subr.bf16.mxu0 %v5791_v45 }
 0x556   : > { %5087 = vmatpush3.bf16.msra.mxu0 %v5543_v56 }
 0x557   : > { %5088 = vmatprep.subr.bf16.mxu0 %v5791_v45 }
 0x55a   : > { %5089 = vmatpush3.bf16.msra.mxu0 %v5544_v62 }
 0x55b   : > { %5090 = vmatprep.subr.bf16.mxu0 %v5791_v45 }
 0x55e   : > { %5091 = vmatpush3.bf16.msra.mxu0 %v5545_v63 }
 0x55f   : > { %5092 = vmatprep.subr.bf16.mxu0 %v5791_v45 }
 0x562   : > { %5093 = vmatpush3.bf16.msra.mxu0 %v5546_v0 }
 0x563   : > { %5094 = vmatprep.subr.bf16.mxu0 %v5791_v45 }
 0x566   : > { %5095 = vmatpush3.bf16.msra.mxu0 %v5547_v1 }
 0x567   : > { %5096 = vmatprep.subr.bf16.mxu0 %v5791_v45 }
 0x56a   : > { %5097 = vmatpush3.bf16.msra.mxu0 %v5548_v2 }
 0x56b   : > { %5098 = vmatprep.subr.bf16.mxu0 %v5791_v45 }
 0x56e   : > { %5099 = vmatpush3.bf16.msra.mxu0 %v5549_v3 }
 0x56f   : > { %5104 = vmatprep.subr.bf16.mxu0 %v5791_v45 }
 0x5e4   : > { %v5009_v4 = vpop.f32.mrb[128].mxu0 }
 0x5e5   : > { %v5010_v5 = vpop.f32.mrb[129].mxu0 }
 0x5e6   : > { %v5011_v7 = vadd.f32 %v5010_v5, %v5009_v4  ;;  %v5012_v8 = vpop.f32.mrb[130].mxu0 }
 0x5e7   : > { %v5013_v9 = vpop.f32.mrb[131].mxu0 }
 0x5e8   : > { %v5014_v6 = vadd.f32 %v5013_v9, %v5012_v8  ;;  %v4341_v15 = vadd.f32 %v5011_v7, %v4931_v11 }
 0x5ea   : > { %v4344_v23 = vadd.f32 %v5014_v6, %v4931_v11 }
 0x604   : > { %v5031_v12 = vpop.f32.mrb[132].mxu0 }
 0x605   : > { %v5032_v13 = vpop.f32.mrb[133].mxu0 }
 0x606   : > { %v5033_v17 = vadd.f32 %v5032_v13, %v5031_v12  ;;  %v5034_v19 = vpop.f32.mrb[134].mxu0 }
 0x607   : > { %v5035_v20 = vpop.f32.mrb[135].mxu0 }
 0x608   : > { %v5036_v25 = vadd.f32 %v5035_v20, %v5034_v19  ;;  %v4382_v16 = vadd.f32 %v5033_v17, %v4341_v15 }
 0x60a   : > { %v4385_v24 = vadd.f32 %v5036_v25, %v4344_v23 }
 0x624   : > { %v4422_v27 = vpop.f32.mrb[136].mxu0 }
 0x625   : > { %v4423_v18 = vadd.f32 %v4422_v27, %v4382_v16  ;;  %v5082_v26 = vpop.f32.mrb[137].mxu0 }
 0x626   : > { %v4425_v29 = vpop.f32.mrb[138].mxu0 }
 0x627   : > { %v4426_v21 = vadd.f32 %v4425_v29, %v4385_v24  ;;  %v5083_v28 = vpop.f32.mrb[139].mxu0  ;;  %v4429_v31 = vmax.f32 %v4423_v18, 0.0 }
 0x629   : > { %v4430_v30 = vmax.f32 %v4426_v21, 0.0 }
 0x62b   : > { %v4431_v14 = vpack.c.bf16 %v4430_v30, %v4429_v31 }
 0x62d   : > { %5101 = vmatmul.mubr.bf16.vlgmr.msra.gmra.mrb[140].mxu0 %v4431_v14 }
 0x62e   : > { %5105 = vmatpush3.bf16.msra.mxu0 %v5550_v32  ;;  %5120 = vmatprep.mubr.msk.bf16.mxu0 %vm5792_vm3, %v5791_v45 }
 0x62f   : > { %5106 = vmatprep.subr.bf16.mxu0 %v5791_v45 }
 0x632   : > { %5107 = vmatpush3.bf16.msra.mxu0 %v5551_v22 }
 0x633   : > { %5108 = vmatprep.subr.bf16.mxu0 %v5791_v45 }
 0x636   : > { %5109 = vmatpush3.bf16.msra.mxu0 %v5552_v10 }
 0x637   : > { %5110 = vmatprep.subr.bf16.mxu0 %v5791_v45 }
 0x63a   : > { %5111 = vmatpush3.bf16.msra.mxu0 %v5553_v33 }
 0x63b   : > { %5112 = vmatprep.subr.bf16.mxu0 %v5791_v45 }
 0x63e   : > { %5113 = vmatpush3.bf16.msra.mxu0 %v5554_v34 }
 0x63f   : > { %5114 = vmatprep.subr.bf16.mxu0 %v5791_v45 }
 0x642   : > { %5115 = vmatpush3.bf16.msra.mxu0 %v5555_v35 }
 0x643   : > { %5116 = vmatprep.subr.bf16.mxu0 %v5791_v45 }
 0x646   : > { %5117 = vmatpush3.bf16.msra.mxu0 %v5556_v36 }
 0x647   : > { %5118 = vmatprep.subr.bf16.mxu0 %v5791_v45  ;;  %v4981_v45 = vld [vmem:[%s6910_s25] ss:$0 sm:$0xff] }
 0x64a   : > { %5119 = vmatpush3.bf16.msra.mxu0 %v5557_v37 }
 0x700   : > { %v4537_v39 = vpop.f32.mrb[140].mxu0 }
 0x701   : > { %v4538_v40 = vadd.f32 %v4972_v38, %v4537_v39  ;;  %v5102_v41 = vpop.f32.mrb[141].mxu0 }
 0x702   : > { %v4540_v42 = vpop.f32.mrb[142].mxu0 }
 0x703   : > { %v4541_v43 = vadd.f32 %v4972_v38, %v4540_v42  ;;  %v5103_v44 = vpop.f32.mrb[143].mxu0  ;;  %v4544_v46 = vmax.f32 %v4538_v40, 0.0 }
 0x705   : > { %v4545_v48 = vmax.f32 %v4541_v43, 0.0 }
 0x707   : > { %v4546_v49 = vpack.c.bf16 %v4545_v48, %v4544_v46 }
 0x709   : > { %5121 = vmatmul.mubr.bf16.vlgmr.msra.gmra.mrb[144].mxu0 %v4546_v49 }
 0x7dc   : > { %v4652_v51 = vpop.f32.mrb[144].mxu0 }
 0x7dd   : > { %v4653_v52 = vadd.f32 %v4981_v45, %v4652_v51  ;;  %v5122_v55 = vpop.f32.mrb[145].mxu0 }
 0x7de   : > { %v4655_v58 = vpop.f32.mrb[146].mxu0 }
 0x7df   : > { %4659 = vst [vmem:[%s480_s13] sm:$0xff] %v4653_v52  ;;  %v4656_v50 = vadd.f32 %v4981_v45, %v4655_v58  ;;  %v5123_v57 = vpop.f32.mrb[147].mxu0 }
 0x7e1   : > { %4660 = vst [vmem:[%s480_s13 + $0x8] sm:$0xff] %v4656_v50 }
 0x7e2 PF: > { %p24_p5 = scmp.ge.s32.totalorder %s6023_s28, 4   ;;  %s6912_s17 = smov %s5767_s18 }
 0x7e3   : > { %s6913_s18 = smov %s5771_s19  ;;  %s6914_s19 = smov %s6034_s26 }
 0x7e4   : > { %s6915_s20 = smov %s6023_s28  ;;  %26 = sbr.rel (!%p24_p5) target bundleno = 11 (0xb), region = 196 }
 0x7eb   :  { %4683 = vsyncpa [#allocation6], 1 }
 0x7ec   :  { %4685 = vsyncpa [#allocation6 + $0x1], 1 }
 0x7ed   :  { %4686 = vsyncpa [#allocation8], 1 }
 0x7ee   :  { %4687 = vsyncpa [#allocation11], 1 }
 0x7ef   :  { %4688 = vsyncpa [#allocation14], 1 }

</bundles_post_ra>
